<compile_context>
chip_gen: v6e
topology: v6e:2x2x1
jax: 0.10.0
libtpu: 0.0.40
codegen_flags: <defaults>
</compile_context>

<pallas_src>
import functools

import jax
import jax.numpy as jnp
from jax.experimental import pallas as pl
from jax.experimental.pallas import tpu as pltpu

NEG_SLOPE = 0.01                      # F.leaky_relu default negative_slope
LANES = 128                           # TPU vreg lane width
_MM_PREC = jax.lax.Precision.HIGHEST  # exact f32 matmuls (PyTorch-f32 fidelity)

_VMEM_LIMIT_BYTES = 40 * 1024 * 1024   # explicit scoped-VMEM cap (< v7x 64 MiB/TC)
_BLOCK_VMEM_BUDGET = 24 * 1024 * 1024  # budget for double-buffered x/out blocks


def _leaky_relu(x):
    return jnp.where(x > 0, x, NEG_SLOPE * x)


def _round_up(x, m):
    return ((x + m - 1) // m) * m


# --------------------------------------------------------------------------- #
# Kernel
# --------------------------------------------------------------------------- #
def _gate_kernel(x_ref, w1_ref, b1_ref, w2_ref, b2_ref, perm_ref, out_ref,
                 *, fold, n_exp):
    x = x_ref[...]                                             # (tbf, fold*d_in)

    # fc1 / fc2 on the MXU against resident folded weights (f32, exact).
    h1 = jnp.dot(x, w1_ref[...], precision=_MM_PREC,
                 preferred_element_type=jnp.float32) + b1_ref[...]
    h1 = _leaky_relu(h1)                                       # (tbf, fold*n)
    h2 = jnp.dot(h1, w2_ref[...], precision=_MM_PREC,
                 preferred_element_type=jnp.float32) + b2_ref[...]
    h2 = _leaky_relu(h2)

    # Segmented softmax.  Hidden lanes are expert-major (lane = e*fold + s), so
    # sample s's n_exp logits form the coset {s, s+fold, ..., s+(n_exp-1)*fold},
    # which is closed under cyclic rotation by `fold` -> max/sum via rolls
    # (direction-agnostic, XLU slots, never mix samples).
    gmax = h2
    for k in range(1, n_exp):
        gmax = jnp.maximum(gmax, pltpu.roll(h2, k * fold, axis=1))
    e = jnp.exp(h2 - gmax)
    denom = e
    for k in range(1, n_exp):
        denom = denom + pltpu.roll(e, k * fold, axis=1)
    probs = e / denom                                          # exact normalization

    # Lane permutation (e*fold + s) -> (s*n_exp + e) on the otherwise-idle MXU.
    # perm is a 0/1 matrix, HIGHEST precision => exact; makes the wrapper's
    # reshape back to (B, n_exp) free and keeps the HBM store lane-dense.
    out_ref[...] = jnp.dot(probs, perm_ref[...], precision=_MM_PREC,
                           preferred_element_type=jnp.float32).astype(out_ref.dtype)


# --------------------------------------------------------------------------- #
# Wrapper
# --------------------------------------------------------------------------- #
def _build_folded_params(w1, b1, w2, b2, fold):
    """Block-structured weights for the folded (lane-dense) layout."""
    d_in, n = w1.shape
    f32 = jnp.float32
    w1 = w1.astype(f32)
    w2 = w2.astype(f32)
    eye_f = jnp.eye(fold, dtype=f32)
    eye_n = jnp.eye(n, dtype=f32)
    # w1_big[s*d_in + f, e*fold + s'] = w1[f, e] * (s == s')
    w1_big = (eye_f[:, None, None, :] * w1[None, :, :, None]
              ).reshape(fold * d_in, n * fold)
    # w2_big[e*fold + s, e2*fold + s'] = w2[e, e2] * (s == s')
    w2_big = (w2[:, None, :, None] * eye_f[None, :, None, :]
              ).reshape(n * fold, n * fold)
    # perm[e*fold + s, s'*n + e2] = (e == e2) * (s == s')
    perm = (eye_n[:, None, None, :] * eye_f[None, :, :, None]
            ).reshape(n * fold, fold * n)
    b1_big = jnp.repeat(b1.astype(f32), fold).reshape(1, n * fold)
    b2_big = jnp.repeat(b2.astype(f32), fold).reshape(1, n * fold)
    return w1_big, b1_big, w2_big, b2_big, perm


def _choose_tile_rows(n_rows, in_w, out_w):
    """Folded rows per grid step."""
    if n_rows <= 8:
        return max(n_rows, 1)
    # Largest tile whose double-buffered x/out blocks fit the VMEM budget.
    max_rows = max(8, (_BLOCK_VMEM_BUDGET // (2 * 4 * (in_w + out_w))) // 8 * 8)
    # Keep >= 4 grid steps when possible (v7x shards the 'parallel' batch axis
    # across two TensorCores; also gives the DMA pipeline some depth).
    t = _round_up(pl.cdiv(n_rows, 4), 8)
    return min(max_rows, t)


def gate_forward(x, w1, b1, w2, b2, *, fold=None):
    """Gate forward pass.

    x: (B, d_in) float32; w1: (d_in, n); b1: (n,); w2: (n, n); b2: (n,)
    (weights transposed w.r.t. PyTorch's nn.Linear (out,in) layout).
    Returns (B, n) float32 softmax expert weights.
    """
    B, d_in = x.shape
    n = w1.shape[1]
    if x.dtype != jnp.float32:
        # TODO(synk): a bf16-x fast path (bf16 folded blocks, f32 accumulation)
        # would halve HBM traffic -- biggest payoff on v5e.
        x = x.astype(jnp.float32)
    if fold is None:
        fold = max(1, LANES // n)          # n=4 -> fold=32 -> 128 hidden lanes

    b_main = (B // fold) * fold
    n_rows = b_main // fold
    in_w = fold * d_in
    out_w = fold * n

    pieces = []
    if n_rows > 0:
        # Row-major reshape: contiguous => free; lane-dense 4*in_w-byte rows.
        x_fold = x[:b_main].reshape(n_rows, in_w)
        w1_big, b1_big, w2_big, b2_big, perm = _build_folded_params(
            w1, b1, w2, b2, fold)

        tbf = _choose_tile_rows(n_rows, in_w, out_w)
        grid = (pl.cdiv(n_rows, tbf),)     # partial last block handled by Pallas;
                                           # rows are independent, OOB rows discarded.

        kernel = functools.partial(_gate_kernel, fold=fold, n_exp=n)
        cost = pl.CostEstimate(
            flops=2 * b_main * (d_in * n + n * n),
            transcendentals=b_main * n,
            bytes_accessed=4 * (b_main * (d_in + n)
                                + in_w * out_w + 2 * out_w * out_w + 2 * out_w),
        )

        out_fold = pl.pallas_call(
            kernel,
            out_shape=jax.ShapeDtypeStruct((n_rows, out_w), jnp.float32),
            grid_spec=pltpu.PrefetchScalarGridSpec(
                num_scalar_prefetch=0,
                grid=grid,
                in_specs=[
                    pl.BlockSpec((tbf, in_w), lambda i: (i, 0)),     # x: batch-tiled
                    pl.BlockSpec((in_w, out_w), lambda i: (0, 0)),   # w1_big: resident
                    pl.BlockSpec((1, out_w), lambda i: (0, 0)),      # b1: resident
                    pl.BlockSpec((out_w, out_w), lambda i: (0, 0)),  # w2_big: resident
                    pl.BlockSpec((1, out_w), lambda i: (0, 0)),      # b2: resident
                    pl.BlockSpec((out_w, out_w), lambda i: (0, 0)),  # perm: resident
                ],
                out_specs=pl.BlockSpec((tbf, out_w), lambda i: (i, 0)),
            ),
            compiler_params=pltpu.CompilerParams(
                dimension_semantics=("parallel",),
                vmem_limit_bytes=_VMEM_LIMIT_BYTES,
            ),
            cost_estimate=cost,
        )(x_fold, w1_big, b1_big, w2_big, b2_big, perm)

        # Free reshape back: out_fold[r, s*n + e] == probs[r*fold + s, e].
        pieces.append(out_fold.reshape(b_main, n))

    if b_main < B:
        # Tail of < fold rows: trivially cheap, plain JAX, exact same math.
        xt = x[b_main:]
        h1 = _leaky_relu(jnp.dot(xt, w1, precision=_MM_PREC) + b1)
        h2 = _leaky_relu(jnp.dot(h1, w2, precision=_MM_PREC) + b2)
        pieces.append(jax.nn.softmax(h2, axis=1))

    return pieces[0] if len(pieces) == 1 else jnp.concatenate(pieces, axis=0)


# --------------------------------------------------------------------------- #
# Reference + test
# --------------------------------------------------------------------------- #
def reference_forward(x, w1, b1, w2, b2):
    h1 = _leaky_relu(jnp.dot(x, w1, precision=_MM_PREC) + b1)
    h2 = _leaky_relu(jnp.dot(h1, w2, precision=_MM_PREC) + b2)
    return jax.nn.softmax(h2, axis=1)


def _make_params(key, num_features, num_experts):
    k1, k2, k3, k4 = jax.random.split(key, 4)
    bound1 = 1.0 / (num_features ** 0.5)
    w1 = jax.random.uniform(k1, (num_features, num_experts),
                            minval=-bound1, maxval=bound1, dtype=jnp.float32)
    b1 = jax.random.uniform(k2, (num_experts,),
                            minval=-bound1, maxval=bound1, dtype=jnp.float32)
    bound2 = 1.0 / (num_experts ** 0.5)
    w2 = jax.random.uniform(k3, (num_experts, num_experts),
                            minval=-bound2, maxval=bound2, dtype=jnp.float32)
    b2 = jax.random.uniform(k4, (num_experts,),
                            minval=-bound2, maxval=bound2, dtype=jnp.float32)
    return w1, b1, w2, b2


if __name__ == "__main__":
    num_features = 20
    num_experts = 4

    key = jax.random.PRNGKey(0)
    kx1, kx2, kp = jax.random.split(key, 3)
    w1, b1, w2, b2 = _make_params(kp, num_features, num_experts)

    # --- batch that is a multiple of the fold (pure kernel path) ---
    batch = 256
    x = jax.random.normal(kx1, (batch, num_features), dtype=jnp.float32)
    out = jax.block_until_ready(gate_forward(x, w1, b1, w2, b2))
    ref = reference_forward(x, w1, b1, w2, b2)
    assert out.shape == (batch, num_experts)
    assert jnp.allclose(out, ref, atol=1e-3, rtol=1e-3), "mismatch vs reference (fold path)"
    assert jnp.allclose(jnp.sum(out, axis=1), 1.0, atol=1e-3)

    # --- non-multiple batch: multi-step grid + partial last block + jnp tail ---
    batch2 = 300
    x2 = jax.random.normal(kx2, (batch2, num_features), dtype=jnp.float32)
    out2 = jax.block_until_ready(gate_forward(x2, w1, b1, w2, b2))
    ref2 = reference_forward(x2, w1, b1, w2, b2)
    assert out2.shape == (batch2, num_experts)
    assert jnp.allclose(out2, ref2, atol=1e-3, rtol=1e-3), "mismatch vs reference (grid/tail path)"
    assert jnp.allclose(jnp.sum(out2, axis=1), 1.0, atol=1e-3)

    print("KERNEL_OK")
</pallas_src>

<mosaic_0001>
module attributes {stable_mosaic.version = 11 : i64} {
  func.func @_gate_kernel(%arg0: i32, %arg1: memref<8x640xf32, #tpu.memory_space<vmem>>, %arg2: memref<640x128xf32, #tpu.memory_space<vmem>>, %arg3: memref<1x128xf32, #tpu.memory_space<vmem>>, %arg4: memref<128x128xf32, #tpu.memory_space<vmem>>, %arg5: memref<1x128xf32, #tpu.memory_space<vmem>>, %arg6: memref<128x128xf32, #tpu.memory_space<vmem>>, %arg7: memref<8x128xf32, #tpu.memory_space<vmem>>) attributes {dimension_semantics = [#tpu.dimension_semantics<parallel>], iteration_bounds = array<i64: 1>, scalar_prefetch = 0 : i64, scratch_operands = 0 : i64, tpu.core_type = #tpu.core_type<tc>, window_params = [{transform_indices = @transform_0, window_bounds = array<i64: 8, 640>}, {pipeline_mode = #tpu.pipeline_mode<synchronous>, transform_indices = @transform_1, window_bounds = array<i64: 640, 128>}, {pipeline_mode = #tpu.pipeline_mode<synchronous>, transform_indices = @transform_2, window_bounds = array<i64: 1, 128>}, {pipeline_mode = #tpu.pipeline_mode<synchronous>, transform_indices = @transform_3, window_bounds = array<i64: 128, 128>}, {pipeline_mode = #tpu.pipeline_mode<synchronous>, transform_indices = @transform_4, window_bounds = array<i64: 1, 128>}, {pipeline_mode = #tpu.pipeline_mode<synchronous>, transform_indices = @transform_5, window_bounds = array<i64: 128, 128>}, {transform_indices = @transform_6, window_bounds = array<i64: 8, 128>}]} {
    %c0 = arith.constant 0 : index
    %c0_0 = arith.constant 0 : index
    %0 = vector.load %arg1[%c0, %c0_0] : memref<8x640xf32, #tpu.memory_space<vmem>>, vector<8x640xf32>
    %c0_1 = arith.constant 0 : index
    %c0_2 = arith.constant 0 : index
    %1 = vector.load %arg2[%c0_1, %c0_2] : memref<640x128xf32, #tpu.memory_space<vmem>>, vector<640x128xf32>
    %cst = arith.constant dense<0.000000e+00> : vector<8x128xf32>
    %2 = tpu.matmul %0, %1, %cst {dimension_numbers = #tpu.dot_dimension_numbers<[1], [0], [0], [1], [0, 0, 1, 1], [], []>, precision = #tpu.contract_precision<fp32>} : vector<8x640xf32>, vector<640x128xf32>, vector<8x128xf32> -> vector<8x128xf32>
    %c0_3 = arith.constant 0 : index
    %c0_4 = arith.constant 0 : index
    %3 = vector.load %arg3[%c0_3, %c0_4] : memref<1x128xf32, #tpu.memory_space<vmem>>, vector<1x128xf32>
    %4 = vector.broadcast %3 : vector<1x128xf32> to vector<8x128xf32>
    %5 = arith.addf %2, %4 : vector<8x128xf32>
    %cst_5 = arith.constant 0.000000e+00 : f32
    %6 = vector.broadcast %cst_5 : f32 to vector<8x128xf32>
    %7 = arith.cmpf ogt, %5, %6 : vector<8x128xf32>
    %cst_6 = arith.constant 0.00999999977 : f32
    %8 = vector.broadcast %cst_6 : f32 to vector<8x128xf32>
    %9 = arith.mulf %8, %5 : vector<8x128xf32>
    %10 = arith.select %7, %5, %9 : vector<8x128xi1>, vector<8x128xf32>
    %c0_7 = arith.constant 0 : index
    %c0_8 = arith.constant 0 : index
    %11 = vector.load %arg4[%c0_7, %c0_8] : memref<128x128xf32, #tpu.memory_space<vmem>>, vector<128x128xf32>
    %cst_9 = arith.constant dense<0.000000e+00> : vector<8x128xf32>
    %12 = tpu.matmul %10, %11, %cst_9 {dimension_numbers = #tpu.dot_dimension_numbers<[1], [0], [0], [1], [0, 0, 1, 1], [], []>, precision = #tpu.contract_precision<fp32>} : vector<8x128xf32>, vector<128x128xf32>, vector<8x128xf32> -> vector<8x128xf32>
    %c0_10 = arith.constant 0 : index
    %c0_11 = arith.constant 0 : index
    %13 = vector.load %arg5[%c0_10, %c0_11] : memref<1x128xf32, #tpu.memory_space<vmem>>, vector<1x128xf32>
    %14 = vector.broadcast %13 : vector<1x128xf32> to vector<8x128xf32>
    %15 = arith.addf %12, %14 : vector<8x128xf32>
    %cst_12 = arith.constant 0.000000e+00 : f32
    %16 = vector.broadcast %cst_12 : f32 to vector<8x128xf32>
    %17 = arith.cmpf ogt, %15, %16 : vector<8x128xf32>
    %cst_13 = arith.constant 0.00999999977 : f32
    %18 = vector.broadcast %cst_13 : f32 to vector<8x128xf32>
    %19 = arith.mulf %18, %15 : vector<8x128xf32>
    %20 = arith.select %17, %15, %19 : vector<8x128xi1>, vector<8x128xf32>
    %c32_i32 = arith.constant 32 : i32
    %21 = tpu.dynamic_rotate %20 by %c32_i32 dim 1 : vector<8x128xf32>, i32 -> vector<8x128xf32>
    %22 = arith.maximumf %20, %21 : vector<8x128xf32>
    %c64_i32 = arith.constant 64 : i32
    %23 = tpu.dynamic_rotate %20 by %c64_i32 dim 1 : vector<8x128xf32>, i32 -> vector<8x128xf32>
    %24 = arith.maximumf %22, %23 : vector<8x128xf32>
    %c96_i32 = arith.constant 96 : i32
    %25 = tpu.dynamic_rotate %20 by %c96_i32 dim 1 : vector<8x128xf32>, i32 -> vector<8x128xf32>
    %26 = arith.maximumf %24, %25 : vector<8x128xf32>
    %27 = arith.subf %20, %26 : vector<8x128xf32>
    %28 = math.exp %27 : vector<8x128xf32>
    %c32_i32_14 = arith.constant 32 : i32
    %29 = tpu.dynamic_rotate %28 by %c32_i32_14 dim 1 : vector<8x128xf32>, i32 -> vector<8x128xf32>
    %30 = arith.addf %28, %29 : vector<8x128xf32>
    %c64_i32_15 = arith.constant 64 : i32
    %31 = tpu.dynamic_rotate %28 by %c64_i32_15 dim 1 : vector<8x128xf32>, i32 -> vector<8x128xf32>
    %32 = arith.addf %30, %31 : vector<8x128xf32>
    %c96_i32_16 = arith.constant 96 : i32
    %33 = tpu.dynamic_rotate %28 by %c96_i32_16 dim 1 : vector<8x128xf32>, i32 -> vector<8x128xf32>
    %34 = arith.addf %32, %33 : vector<8x128xf32>
    %35 = arith.divf %28, %34 : vector<8x128xf32>
    %c0_17 = arith.constant 0 : index
    %c0_18 = arith.constant 0 : index
    %36 = vector.load %arg6[%c0_17, %c0_18] : memref<128x128xf32, #tpu.memory_space<vmem>>, vector<128x128xf32>
    %cst_19 = arith.constant dense<0.000000e+00> : vector<8x128xf32>
    %37 = tpu.matmul %35, %36, %cst_19 {dimension_numbers = #tpu.dot_dimension_numbers<[1], [0], [0], [1], [0, 0, 1, 1], [], []>, precision = #tpu.contract_precision<fp32>} : vector<8x128xf32>, vector<128x128xf32>, vector<8x128xf32> -> vector<8x128xf32>
    %c0_20 = arith.constant 0 : index
    %c0_21 = arith.constant 0 : index
    %38 = vector.load %arg7[%c0_20, %c0_21] : memref<8x128xf32, #tpu.memory_space<vmem>>, vector<8x128xf32>
    tpu.vector_store %arg7[%c0_20, %c0_21], %37 {strides = array<i32>} : memref<8x128xf32, #tpu.memory_space<vmem>>, vector<8x128xf32>,
    return
  }
  func.func @transform_0(%arg0: i32) -> (i32, i32) {
    %c0_i32 = arith.constant 0 : i32
    %c0_i32_0 = arith.constant 0 : i32
    return %arg0, %c0_i32 : i32, i32
  }
  func.func @transform_1(%arg0: i32) -> (i32, i32) {
    %c0_i32 = arith.constant 0 : i32
    %c0_i32_0 = arith.constant 0 : i32
    %c0_i32_1 = arith.constant 0 : i32
    return %c0_i32, %c0_i32_0 : i32, i32
  }
  func.func @transform_2(%arg0: i32) -> (i32, i32) {
    %c0_i32 = arith.constant 0 : i32
    %c0_i32_0 = arith.constant 0 : i32
    %c0_i32_1 = arith.constant 0 : i32
    return %c0_i32, %c0_i32_0 : i32, i32
  }
  func.func @transform_3(%arg0: i32) -> (i32, i32) {
    %c0_i32 = arith.constant 0 : i32
    %c0_i32_0 = arith.constant 0 : i32
    %c0_i32_1 = arith.constant 0 : i32
    return %c0_i32, %c0_i32_0 : i32, i32
  }
  func.func @transform_4(%arg0: i32) -> (i32, i32) {
    %c0_i32 = arith.constant 0 : i32
    %c0_i32_0 = arith.constant 0 : i32
    %c0_i32_1 = arith.constant 0 : i32
    return %c0_i32, %c0_i32_0 : i32, i32
  }
  func.func @transform_5(%arg0: i32) -> (i32, i32) {
    %c0_i32 = arith.constant 0 : i32
    %c0_i32_0 = arith.constant 0 : i32
    %c0_i32_1 = arith.constant 0 : i32
    return %c0_i32, %c0_i32_0 : i32, i32
  }
  func.func @transform_6(%arg0: i32) -> (i32, i32) {
    %c0_i32 = arith.constant 0 : i32
    %c0_i32_0 = arith.constant 0 : i32
    return %arg0, %c0_i32 : i32, i32
  }
}

</mosaic_0001>

<bundles_post_ra>
// kernel: tpu_custom_call.1
= control target key start
LH: loop header
LB: loop body
LE: loop exit
PB: predicated region body
PF: predicated region fallthrough
CT: control target
= control target key end

     0   :  { %11 = vsyncpa [#allocation3], 0  ;;  %s7745_s0 = inlined_call_operand.hbm [shape: f32[8,640], index: 0, kind: input, shape index: {}]   ;;  %s7746_s1 = inlined_call_operand.hbm [shape: f32[640,128], index: 1, kind: input, shape index: {}]   ;;  %s7747_s2 = inlined_call_operand.vmem [shape: f32[1,128], index: 2, kind: input, shape index: {}]   ;;  %s7748_s3 = inlined_call_operand.hbm [shape: f32[128,128], index: 3, kind: input, shape index: {}]   ;;  %s7749_s4 = inlined_call_operand.vmem [shape: f32[1,128], index: 4, kind: input, shape index: {}]   ;;  %s7750_s5 = inlined_call_operand.hbm [shape: f32[128,128], index: 5, kind: input, shape index: {}]   ;;  %s7751_s6 = inlined_call_operand.hbm [shape: f32[8,128], index: 6, kind: output, shape index: {}]  }
   0x1   :  { %12 = vsyncpa [#allocation6], 0 }
   0x2   :  { %13 = vsyncpa [#allocation9], 0 }
   0x3   :  { %14 = vsyncpa [#allocation4], 0  ;;  %s5384_s21 = smov [#allocation5]  }
   0x4   :  { %s30_s22 = sshll.u32 %s5384_s21, 4  ;;  %s31_s22 = int_to_ptr.vmem [resolvable:$true] %s30_s22 }
   0x5   :  { %s5284_s23 = scalar_lea.vmem %s31_s22, 10240  ;;  %p5289_p1 = scmp.lt.s32.totalorder %s31_s22, %s31_s22 }
   0x6   :  { %p5285_p0 = scmp.ne.s32.totalorder %s31_s22, %s5284_s23  ;;  %p5290_p2 = scmp.lt.s32.totalorder %s5284_s23, %s5284_s23 }
   0x8   :  { %p5291_p3 = por %p5290_p2, %p5289_p1 }
   0xa   :  { %p5292_p4 = pnand %p5291_p3, %p5285_p0 }
   0xc   :  { %5295 = shalt.err (!%p5292_p4)
}
   0xd   :  { %s5385_s24 = smov 128   ;;  %s5386_s25 = smov 8  }
   0xe   :  { %36 = dma.hbm_to_vmem [thread:$0]  %s7746_s1, 10240, %s31_s22, [#allocation6], %s5385_s24, %s5385_s24, %s5386_s25  }
   0xf   :  { %s5387_s28 = smov [#allocation2]   ;;  %s5388_s30 = smov [#allocation7]  }
  0x10   :  { %s21_s29 = sshll.u32 %s5387_s28, 4  ;;  %s44_s7 = sshll.u32 %s5388_s30, 4  ;;  %s22_s29 = int_to_ptr.vmem [resolvable:$true] %s21_s29  ;;  %s45_s7 = int_to_ptr.vmem [resolvable:$true] %s44_s7 }
  0x11   :  { %s5304_s8 = scalar_lea.vmem %s22_s29, 640  ;;  %p5309_p6 = scmp.lt.s32.totalorder %s22_s29, %s22_s29 }
  0x12   :  { %p5305_p5 = scmp.ne.s32.totalorder %s22_s29, %s5304_s8  ;;  %p5310_p7 = scmp.lt.s32.totalorder %s5304_s8, %s5304_s8 }
  0x14   :  { %p5311_p8 = por %p5310_p7, %p5309_p6 }
  0x16   :  { %p5312_p9 = pnand %p5311_p8, %p5305_p5 }
  0x18   :  { %5315 = shalt.err (!%p5312_p9)
}
  0x19   :  { %24 = dma.hbm_to_vmem [thread:$0]  %s7745_s0, 640, %s22_s29, [#allocation3]  }
  0x1a   :  { %s5324_s11 = scalar_lea.vmem %s45_s7, 2048  ;;  %p5329_p11 = scmp.lt.s32.totalorder %s45_s7, %s45_s7 }
  0x1b   :  { %p5325_p10 = scmp.ne.s32.totalorder %s45_s7, %s5324_s11  ;;  %p5330_p12 = scmp.lt.s32.totalorder %s5324_s11, %s5324_s11 }
  0x1d   :  { %p5331_p13 = por %p5330_p12, %p5329_p11 }
  0x1f   :  { %p5332_p0 = pnand %p5331_p13, %p5325_p10 }
  0x21   :  { %5335 = shalt.err (!%p5332_p0)
}
  0x22   :  { %50 = dma.hbm_to_vmem [thread:$0]  %s7748_s3, 2048, %s45_s7, [#allocation6], %s5385_s24, %s5385_s24, %s5386_s25  }
  0x23   :  { %s5389_s13 = smov [#allocation8]  }
  0x24   :  { %s58_s14 = sshll.u32 %s5389_s13, 4  ;;  %s59_s14 = int_to_ptr.vmem [resolvable:$true] %s58_s14 }
  0x25   :  { %s5344_s15 = scalar_lea.vmem %s59_s14, 2048  ;;  %p5349_p2 = scmp.lt.s32.totalorder %s59_s14, %s59_s14 }
  0x26   :  { %p5345_p1 = scmp.ne.s32.totalorder %s59_s14, %s5344_s15  ;;  %p5350_p3 = scmp.lt.s32.totalorder %s5344_s15, %s5344_s15 }
  0x28   :  { %p5351_p4 = por %p5350_p3, %p5349_p2 }
  0x2a   :  { %p5352_p5 = pnand %p5351_p4, %p5345_p1 }
  0x2c   :  { %5355 = shalt.err (!%p5352_p5)
}
  0x2d   :  { %64 = dma.hbm_to_vmem [thread:$0]  %s7750_s5, 2048, %s59_s14, [#allocation9], %s5385_s24, %s5385_s24, %s5386_s25  }
  0x2e   :  { %5376 = dma.done.wait [#allocation3], 640  }
  0x2f   :  { %5377 = vsyncadd [#allocation3], 4294966656 }
  0x30   :  { %5378 = dma.done.wait [#allocation6], 12288  }
  0x31   :  { %5379 = vsyncadd [#allocation6], 4294955008 }
  0x32   :  { %5380 = dma.done.wait [#allocation9], 2048  }
  0x33   :  { %5381 = vsyncadd [#allocation9], 4294965248  ;;  %v113_v0 = vld [vmem:[#allocation5 + $0xf8] sm:$0xff]  ;;  %v112_v2 = vld [vmem:[#allocation5 + $0xf0] sm:$0xff]  ;;  %vm5391_vm0 = vmmov 0   ;;  %s5392_s18 = smov 96  }
  0x34   :  { %v97_v1 = vld [vmem:[#allocation5 + $0x78] sm:$0xff]  ;;  %v5452_v3 = vand.u32 4294901760, %v113_v0  ;;  %v5456_v5 = vand.u32 4294901760, %v112_v2  ;;  %v96_v6 = vld [vmem:[#allocation5 + $0x70] sm:$0xff]  ;;  %v111_v7 = vld [vmem:[#allocation5 + $0xe8] sm:$0xff]  ;;  %s5393_s19 = smov 32  }
  0x35   :  { %v5454_v4 = vand.u32 4294901760, %v97_v1  ;;  %v95_v8 = vld [vmem:[#allocation5 + $0x68] sm:$0xff]  ;;  %v5458_v9 = vand.u32 4294901760, %v96_v6  ;;  %v5460_v10 = vand.u32 4294901760, %v111_v7  ;;  %v110_v12 = vld [vmem:[#allocation5 + $0xe0] sm:$0xff]  ;;  %v109_v14 = vld [vmem:[#allocation5 + $0xd8] sm:$0xff] }
  0x36   :  { %v5462_v11 = vand.u32 4294901760, %v95_v8  ;;  %v94_v13 = vld [vmem:[#allocation5 + $0x60] sm:$0xff]  ;;  %3904 = vmatprep.subr.mxu0 %v5452_v3  ;;  %v5465_v15 = vand.u32 4294901760, %v110_v12  ;;  %v5469_v17 = vand.u32 4294901760, %v109_v14  ;;  %v5472_v18 = vsub.f32 %v113_v0, %v5452_v3  ;;  %v5474_v19 = vld [vmem:[#allocation5 + $0x58] sm:$0xff]  ;;  %v5476_v20 = vld [vmem:[#allocation5 + $0xd0] sm:$0xff] }
  0x37   :  { %v5467_v16 = vand.u32 4294901760, %v94_v13  ;;  %v5478_v21 = vld [vmem:[#allocation5 + $0x50] sm:$0xff]  ;;  %3905 = vmatpush3.msra.mxu0 %v5454_v4  ;;  %v5482_v22 = vand.u32 4294901760, %v5474_v19  ;;  %v5485_v23 = vsub.f32 %v97_v1, %v5454_v4  ;;  %v5488_v24 = vand.u32 4294901760, %v5476_v20  ;;  %v5493_v26 = vld [vmem:[#allocation5 + $0xc8] sm:$0xff]  ;;  %v5497_v28 = vld [vmem:[#allocation5 + $0xc0] sm:$0xff] }
  0x38   :  { %v5491_v25 = vsub.f32 %v112_v2, %v5456_v5  ;;  %v5495_v27 = vld [vmem:[#allocation5 + $0x48] sm:$0xff]  ;;  %3906 = vmatprep.subr.mxu0 %v5456_v5  ;;  %v7765_v29 = vand.u32 4294901760, %v5472_v18  ;;  %v5502_v30 = vand.u32 4294901760, %v5478_v21  ;;  %v5505_v31 = vsub.f32 %v96_v6, %v5458_v9  ;;  %v5519_v37 = vld [vmem:[#allocation5 + $0x40] sm:$0xff]  ;;  %v5543_v46 = vld [vmem:[#allocation5 + $0xb8] sm:$0xff]  ;;  %s5395_s20 = smov [#allocation10]  }
  0x39   :  { %7897 = vst [vmem:[#allocation15_spill] sm:$0xff] %v5488_v24  ;;  %v5508_v32 = vand.u32 4294901760, %v5493_v26  ;;  %3907 = vmatpush3.msra.mxu0 %v5458_v9  ;;  %v7763_v33 = vand.u32 4294901760, %v5485_v23  ;;  %v5514_v35 = vsub.f32 %v111_v7, %v5460_v10  ;;  %v5517_v36 = vand.u32 4294901760, %v5495_v27  ;;  %v5553_v51 = vld [vmem:[#allocation5 + $0x38] sm:$0xff]  ;;  %v5560_v56 = vld [vmem:[#allocation5 + $0xb0] sm:$0xff] }
  0x3a   :  { %7898 = vst [vmem:[#allocation16_spill] sm:$0xff] %v5502_v30  ;;  %v7762_v34 = vand.u32 4294901760, %v5491_v25  ;;  %3908 = vmatprep.subr.mxu0 %v5460_v10  ;;  %v397_v38 = vsub.f32 %v5472_v18, %v7765_v29  ;;  %v7760_v39 = vand.u32 4294901760, %v5505_v31  ;;  %v5527_v40 = vsub.f32 %v95_v8, %v5462_v11  ;;  %v5572_v61 = vld [vmem:[#allocation5 + $0x30] sm:$0xff]  ;;  %v5584_v2 = vld [vmem:[#allocation5 + $0xa8] sm:$0xff]  ;;  %s3891_s21 = sshll.u32 %s5395_s20, 4  ;;  %s3892_s21 = int_to_ptr.vmem [resolvable:$true] %s3891_s21 }
  0x3b   :  { %7899 = vst [vmem:[#allocation17_spill] sm:$0xff] %v5508_v32  ;;  %7900 = vst [vmem:[#allocation18_spill] sm:$0xff] %v5517_v36  ;;  %v5530_v41 = vand.u32 4294901760, %v5497_v28  ;;  %3909 = vmatpush3.msra.mxu0 %v5462_v11  ;;  %v285_v42 = vsub.f32 %v5485_v23, %v7763_v33  ;;  %v7758_v44 = vand.u32 4294901760, %v5514_v35  ;;  %v5541_v45 = vsub.f32 %v110_v12, %v5465_v15  ;;  %s5356_s22 = scalar_lea.vmem %s3892_s21, 128  ;;  %p5361_p7 = scmp.lt.s32.totalorder %s3892_s21, %s3892_s21 }
  0x3c   :  { %v404_v43 = vsub.f32 %v5491_v25, %v7762_v34  ;;  %3910 = vmatprep.subr.mxu0 %v5465_v15  ;;  %v398_v47 = vand.u32 4294901760, %v397_v38  ;;  %v292_v48 = vsub.f32 %v5505_v31, %v7760_v39  ;;  %v7757_v49 = vand.u32 4294901760, %v5527_v40  ;;  %v5675_v39 = vld [vmem:[#allocation5 + $0x90] sm:$0xff]  ;;  %p5357_p6 = scmp.ne.s32.totalorder %s3892_s21, %s5356_s22  ;;  %p5362_p8 = scmp.lt.s32.totalorder %s5356_s22, %s5356_s22 }
  0x3d   :  { %7901 = vst [vmem:[#allocation19_spill] sm:$0xff] %v5530_v41  ;;  %v5551_v50 = vand.u32 4294901760, %v5519_v37  ;;  %3911 = vmatpush3.msra.mxu0 %v5467_v16  ;;  %v286_v52 = vand.u32 4294901760, %v285_v42  ;;  %v411_v54 = vsub.f32 %v5514_v35, %v7758_v44  ;;  %v7755_v55 = vand.u32 4294901760, %v5541_v45  ;;  %v5685_v34 = vld [vmem:[#allocation5 + $0x10] sm:$0xff] }
  0x3e   :  { %v405_v53 = vand.u32 4294901760, %v404_v43  ;;  %3912 = vmatprep.subr.mxu0 %v5469_v17  ;;  %3939 = vmatprep.subr.mxu1 %v398_v47  ;;  %v293_v57 = vand.u32 4294901760, %v292_v48  ;;  %v299_v58 = vsub.f32 %v5527_v40, %v7757_v49  ;;  %v5567_v59 = vsub.f32 %v94_v13, %v5467_v16  ;;  %v5595_v13 = vld [vmem:[#allocation5 + $0x28] sm:$0xff]  ;;  %v5662_v49 = vld [vmem:[#allocation5 + $0x18] sm:$0xff]  ;;  %p5363_p9 = por %p5362_p8, %p5361_p7 }
  0x3f   :  { %7902 = vst [vmem:[#allocation20_spill] sm:$0xff] %v5551_v50  ;;  %v5570_v60 = vand.u32 4294901760, %v5543_v46  ;;  %3913 = vmatpush3.msra.mxu0 %v5482_v22  ;;  %3940 = vmatpush3.msra.mxu1 %v286_v52  ;;  %v412_v62 = vand.u32 4294901760, %v411_v54  ;;  %v418_v63 = vsub.f32 %v5541_v45, %v7755_v55  ;;  %v5579_v0 = vsub.f32 %v109_v14, %v5469_v17 }
  0x40   :  { %v5582_v1 = vand.u32 4294901760, %v5553_v51  ;;  %3914 = vmatprep.subr.mxu0 %v5488_v24  ;;  %3941 = vmatprep.subr.mxu1 %v405_v53  ;;  %v300_v6 = vand.u32 4294901760, %v299_v58  ;;  %v7753_v7 = vand.u32 4294901760, %v5567_v59  ;;  %v5590_v8 = vsub.f32 %v5474_v19, %v5482_v22  ;;  %p5364_p10 = pnand %p5363_p9, %p5357_p6 }
  0x41   :  { %7903 = vst [vmem:[#allocation21_spill] sm:$0xff] %v5570_v60  ;;  %v5593_v12 = vand.u32 4294901760, %v5560_v56  ;;  %3915 = vmatpush3.msra.mxu0 %v5502_v30  ;;  %3942 = vmatpush3.msra.mxu1 %v293_v57  ;;  %v419_v14 = vand.u32 4294901760, %v418_v63  ;;  %v7752_v38 = vand.u32 4294901760, %v5579_v0  ;;  %v5601_v42 = vsub.f32 %v5476_v20, %v5488_v24  ;;  %v5618_v20 = vld [vmem:[#allocation5 + $0xa0] sm:$0xff] }
  0x42   :  { %7904 = vst [vmem:[#allocation22_spill] sm:$0xff] %v5582_v1  ;;  %v5604_v43 = vand.u32 4294901760, %v5572_v61  ;;  %3916 = vmatprep.subr.mxu0 %v5508_v32  ;;  %3943 = vmatprep.subr.mxu1 %v412_v62  ;;  %v306_v19 = vsub.f32 %v5567_v59, %v7753_v7  ;;  %v7754_v47 = vand.u32 4294901760, %v5590_v8  ;;  %v5613_v48 = vsub.f32 %v5478_v21, %v5502_v30 }
  0x43   :  { %7905 = vst [vmem:[#allocation23_spill] sm:$0xff] %v5593_v12  ;;  %v5616_v52 = vand.u32 4294901760, %v5584_v2  ;;  %3917 = vmatpush3.msra.mxu0 %v5517_v36  ;;  %3944 = vmatpush3.msra.mxu1 %v300_v6  ;;  %v425_v53 = vsub.f32 %v5579_v0, %v7752_v38  ;;  %v7756_v54 = vand.u32 4294901760, %v5601_v42  ;;  %v5627_v57 = vsub.f32 %v5493_v26, %v5508_v32  ;;  %v5641_v38 = vld [vmem:[#allocation5 + $0x20] sm:$0xff] }
  0x44   :  { %7906 = vst [vmem:[#allocation24_spill] sm:$0xff] %v5604_v43  ;;  %v5630_v21 = vand.u32 4294901760, %v5595_v13  ;;  %3918 = vmatprep.subr.mxu0 %v5530_v41  ;;  %3945 = vmatprep.subr.mxu1 %v419_v14  ;;  %v307_v58 = vand.u32 4294901760, %v306_v19  ;;  %v313_v62 = vsub.f32 %v5590_v8, %v7754_v47  ;;  %v7759_v63 = vand.u32 4294901760, %v5613_v48  ;;  %v5651_v47 = vld [vmem:[#allocation5 + $0x98] sm:$0xff] }
  0x45   :  { %7907 = vst [vmem:[#allocation25_spill] sm:$0xff] %v5616_v52  ;;  %v5639_v6 = vsub.f32 %v5495_v27, %v5517_v36  ;;  %3919 = vmatpush3.msra.mxu0 %v5551_v50  ;;  %v426_v26 = vand.u32 4294901760, %v425_v53  ;;  %v432_v14 = vsub.f32 %v5601_v42, %v7756_v54  ;;  %v7761_v19 = vand.u32 4294901760, %v5627_v57  ;;  %v78_v36 = vld [vmem:[#allocation2 + $0x8] sm:$0xff] }
  0x46   :  { %7908 = vst [vmem:[#allocation26_spill] sm:$0xff] %v5630_v21  ;;  %v5649_v7 = vand.u32 4294901760, %v5618_v20  ;;  %3946 = vmatpush3.msra.mxu1 %v307_v58  ;;  %3920 = vmatprep.subr.mxu0 %v5570_v60  ;;  %v314_v27 = vand.u32 4294901760, %v313_v62  ;;  %v320_v55 = vsub.f32 %v5613_v48, %v7759_v63  ;;  %v5660_v54 = vsub.f32 %v5497_v28, %v5530_v41 }
  0x47   :  { %v7764_v53 = vand.u32 4294901760, %v5639_v6  ;;  %3947 = vmatprep.subr.mxu1 %v426_v26  ;;  %3921 = vmatpush3.msra.mxu0 %v5582_v1  ;;  %v433_v44 = vand.u32 4294901760, %v432_v14  ;;  %v439_v58 = vsub.f32 %v5627_v57, %v7761_v19  ;;  %v5669_v62 = vand.u32 4294901760, %v5641_v38 }
  0x48   :  { %7909 = vst [vmem:[#allocation27_spill] sm:$0xff] %v5649_v7  ;;  %v5673_v63 = vsub.f32 %v5519_v37, %v5551_v50  ;;  %3948 = vmatpush3.msra.mxu1 %v314_v27  ;;  %3922 = vmatprep.subr.mxu0 %v5593_v12  ;;  %v321_v28 = vand.u32 4294901760, %v320_v55  ;;  %v7768_v14 = vand.u32 4294901760, %v5660_v54  ;;  %v5683_v19 = vand.u32 4294901760, %v5651_v47 }
  0x49   :  { %7910 = vst [vmem:[#allocation28_spill] sm:$0xff] %v5669_v62  ;;  %v327_v26 = vsub.f32 %v5639_v6, %v7764_v53  ;;  %3949 = vmatprep.subr.mxu1 %v433_v44  ;;  %3923 = vmatpush3.msra.mxu0 %v5604_v43  ;;  %v440_v37 = vand.u32 4294901760, %v439_v58  ;;  %v5691_v55 = vsub.f32 %v5543_v46, %v5570_v60  ;;  %v5694_v33 = vand.u32 4294901760, %v5662_v49  ;;  %v5696_v53 = vld [vmem:[#allocation5 + $0x88] sm:$0xff] }
  0x4a   :  { %v7771_v27 = vand.u32 4294901760, %v5673_v63  ;;  %3950 = vmatpush3.msra.mxu1 %v321_v28  ;;  %3924 = vmatprep.subr.mxu0 %v5616_v52  ;;  %v446_v44 = vsub.f32 %v5660_v54, %v7768_v14  ;;  %v5704_v58 = vsub.f32 %v5553_v51, %v5582_v1  ;;  %v5707_v46 = vand.u32 4294901760, %v5675_v39  ;;  %v5721_v51 = vld [vmem:[#allocation5 + $0x8] sm:$0xff] }
  0x4b   :  { %7911 = vst [vmem:[#allocation29_spill] sm:$0xff] %v5694_v33  ;;  %v328_v29 = vand.u32 4294901760, %v327_v26  ;;  %3951 = vmatprep.subr.mxu1 %v440_v37  ;;  %3925 = vmatpush3.msra.mxu0 %v5630_v21  ;;  %v5716_v60 = vsub.f32 %v5560_v56, %v5593_v12  ;;  %v5719_v14 = vand.u32 4294901760, %v5685_v34  ;;  %v5730_v26 = vand.u32 4294901760, %v5696_v53  ;;  %v5732_v56 = vld [vmem:[#allocation5 + $0x80] sm:$0xff] }
  0x4c   :  { %7912 = vst [vmem:[#allocation30_spill] sm:$0xff] %v5707_v46  ;;  %v334_v28 = vsub.f32 %v5673_v63, %v7771_v27  ;;  %3926 = vmatprep.subr.mxu0 %v5649_v7  ;;  %v447_v37 = vand.u32 4294901760, %v446_v44  ;;  %v5727_v27 = vsub.f32 %v5572_v61, %v5604_v43  ;;  %v7915_v50 = vand.u32 4294901760, %v5691_v55  ;;  %v5755_v44 = vld [vmem:[#allocation5] sm:$0xff] }
  0x4d   :  { %7913 = vst [vmem:[#allocation31_spill] sm:$0xff] %v5719_v14  ;;  %3952 = vmatpush3.msra.mxu1 %v328_v29  ;;  %7914 = vst [vmem:[#allocation32_spill] sm:$0xff] %v5730_v26  ;;  %3927 = vmatpush3.msra.mxu0 %v5669_v62  ;;  %v5741_v1 = vsub.f32 %v5584_v2, %v5616_v52  ;;  %v7917_v61 = vand.u32 4294901760, %v5704_v58  ;;  %v5763_v41 = vand.u32 4294901760, %v5732_v56  ;;  %v5779_v24 = vand.u32 4294901760, %v5755_v44 }
  0x4e   :  { %v335_v12 = vand.u32 4294901760, %v334_v28  ;;  %v453_v29 = vsub.f32 %v5691_v55, %v7915_v50  ;;  %3953 = vmatprep.subr.mxu1 %v447_v37  ;;  %3928 = vmatprep.subr.mxu0 %v5683_v19  ;;  %v5749_v28 = vand.u32 4294901760, %v5721_v51  ;;  %v5753_v50 = vsub.f32 %v5595_v13, %v5630_v21 }
  0x4f   :  { %7916 = vst [vmem:[#allocation33_spill] sm:$0xff] %v5741_v1  ;;  %v341_v43 = vsub.f32 %v5704_v58, %v7917_v61  ;;  %3929 = vmatpush3.msra.mxu0 %v5694_v33  ;;  %v7918_v37 = vand.u32 4294901760, %v5716_v60  ;;  %v7919_v13 = vand.u32 4294901760, %v5727_v27  ;;  %v5772_v21 = vsub.f32 %v5618_v20, %v5649_v7 }
  0x50   :  { %3954 = vmatpush3.msra.mxu1 %v335_v12  ;;  %v454_v2 = vand.u32 4294901760, %v453_v29  ;;  %3930 = vmatprep.subr.mxu0 %v5707_v46  ;;  %v7920_v30 = vand.u32 4294901760, %v5741_v1  ;;  %v7921_v20 = vand.u32 4294901760, %v5753_v50  ;;  %v5790_v7 = vand.u32 4294901760, %v78_v36 }
  0x51   :  { %v460_v52 = vsub.f32 %v5716_v60, %v7918_v37  ;;  %v342_v32 = vand.u32 4294901760, %v341_v43  ;;  %v348_v12 = vsub.f32 %v5727_v27, %v7919_v13  ;;  %v77_v37 = vld [vmem:[#allocation2] sm:$0xff]  ;;  %3931 = vmatpush3.msra.mxu0 %v5719_v14  ;;  %v5783_v13 = vsub.f32 %v5641_v38, %v5669_v62 }
  0x52   :  { %3955 = vmatprep.subr.mxu1 %v454_v2  ;;  %v467_v43 = vsub.f32 %v5741_v1, %v7920_v30  ;;  %3932 = vmatprep.subr.mxu0 %v5730_v26  ;;  %v7796_v2 = vand.u32 4294901760, %v5772_v21  ;;  %7922 = vst [vmem:[#allocation34_spill] sm:$0xff] %v5790_v7  ;;  %v5798_v38 = vand.u32 4294901760, %v77_v37 }
  0x53   :  { %v461_v61 = vand.u32 4294901760, %v460_v52  ;;  %3956 = vmatpush3.msra.mxu1 %v342_v32  ;;  %v349_v29 = vand.u32 4294901760, %v348_v12  ;;  %v355_v52 = vsub.f32 %v5753_v50, %v7921_v20  ;;  %3933 = vmatpush3.msra.mxu0 %v5749_v28  ;;  %v7797_v1 = vand.u32 4294901760, %v5783_v13 }
  0x54   :  { %v468_v30 = vand.u32 4294901760, %v467_v43  ;;  %v5796_v32 = vsub.f32 %v5651_v47, %v5683_v19  ;;  %7923 = vst [vmem:[#allocation35_spill] sm:$0xff] %v5798_v38  ;;  %3934 = vmatprep.subr.mxu0 %v5763_v41  ;;  %v474_v20 = vsub.f32 %v5772_v21, %v7796_v2  ;;  %v5809_v43 = vsub.f32 %v5662_v49, %v5694_v33 }
  0x55   :  { %3957 = vmatprep.subr.mxu1 %v461_v61  ;;  %v356_v12 = vand.u32 4294901760, %v355_v52  ;;  %v5805_v61 = vsub.f32 %v78_v36, %v5790_v7  ;;  %3935 = vmatpush3.msra.mxu0 %v5779_v24  ;;  %v362_v47 = vsub.f32 %v5783_v13, %v7797_v1  ;;  %v5817_v52 = vsub.f32 %v77_v37, %v5798_v38 }
  0x56   :  { %3958 = vmatpush3.msra.mxu1 %v349_v29  ;;  %v5821_v36 = vsub.f32 %v5675_v39, %v5707_v46  ;;  %v475_v2 = vand.u32 4294901760, %v474_v20  ;;  %3974 = vmatprep.subr.mxu0 %v5472_v18  ;;  %v5828_v1 = vsub.f32 %v5685_v34, %v5719_v14  ;;  %v7924_v37 = vand.u32 4294901760, %v5796_v32 }
  0x57   :  { %3959 = vmatprep.subr.mxu1 %v468_v30  ;;  %v7802_v49 = vand.u32 4294901760, %v5805_v61  ;;  %v7805_v30 = vand.u32 4294901760, %v5809_v43  ;;  %v363_v29 = vand.u32 4294901760, %v362_v47  ;;  %506 = vmatprep.mubr.f32.mxu1 %v5790_v7  ;;  %v5855_v14 = vsub.f32 %v5721_v51, %v5749_v28 }
  0x58   :  { %3960 = vmatpush3.msra.mxu1 %v356_v12  ;;  %v481_v33 = vsub.f32 %v5796_v32, %v7924_v37  ;;  %v5845_v37 = vsub.f32 %v5696_v53, %v5730_v26  ;;  %v7925_v12 = vand.u32 4294901760, %v5817_v52  ;;  %v7926_v7 = vand.u32 4294901760, %v5821_v36 }
  0x59   :  { %3961 = vmatprep.subr.mxu1 %v475_v2  ;;  %v268_v20 = vsub.f32 %v5805_v61, %v7802_v49  ;;  %v369_v34 = vsub.f32 %v5809_v43, %v7805_v30  ;;  %7927 = vst [vmem:[#allocation36_spill] sm:$0xff] %v5855_v14  ;;  %v7928_v46 = vand.u32 4294901760, %v5828_v1 }
  0x5a   :  { %3962 = vmatpush3.msra.mxu1 %v363_v29  ;;  %v482_v39 = vand.u32 4294901760, %v481_v33  ;;  %v274_v2 = vsub.f32 %v5817_v52, %v7925_v12  ;;  %v488_v49 = vsub.f32 %v5821_v36, %v7926_v7  ;;  %v7813_v33 = vand.u32 4294901760, %v5845_v37 }
  0x5b   :  { %v269_v30 = vand.u32 4294901760, %v268_v20  ;;  %v370_v47 = vand.u32 4294901760, %v369_v34  ;;  %v376_v53 = vsub.f32 %v5828_v1, %v7928_v46  ;;  %v7812_v12 = vand.u32 4294901760, %v5855_v14 }
  0x5c   :  { %3963 = vmatprep.subr.mxu1 %v482_v39  ;;  %v275_v29 = vand.u32 4294901760, %v274_v2  ;;  %v489_v26 = vand.u32 4294901760, %v488_v49  ;;  %v5864_v7 = vsub.f32 %v5732_v56, %v5763_v41  ;;  %v495_v20 = vsub.f32 %v5845_v37, %v7813_v33 }
  0x5d   :  { %270 = vmatprep.mubr.f32.mxu0 %v269_v30  ;;  %3964 = vmatpush3.msra.mxu1 %v370_v47  ;;  %v377_v51 = vand.u32 4294901760, %v376_v53  ;;  %v5871_v46 = vsub.f32 %v5755_v44, %v5779_v24  ;;  %v383_v49 = vsub.f32 %v5855_v14, %v7812_v12  ;;  %v7931_v53 = vld [vmem:[#allocation15_spill] sm:$0xff]  ;;  %v7945_v33 = vand.u32 4294901760, %v5472_v18 }
  0x5e   :  { %7929 = vst [vmem:[#allocation37_spill] sm:$0xff] %v5864_v7  ;;  %276 = vmatmul.mubr.f32.vlgmr.msra.gmra.mxu0 %v275_v29  ;;  %3965 = vmatprep.subr.mxu1 %v489_v26  ;;  %v7811_v56 = vand.u32 4294901760, %v5864_v7  ;;  %v496_v30 = vand.u32 4294901760, %v495_v20  ;;  %v7932_v29 = vld [vmem:[#allocation16_spill] sm:$0xff]  ;;  %v7934_v20 = vld [vmem:[#allocation17_spill] sm:$0xff]  ;;  %v7944_v12 = vld [vmem:[#allocation27_spill] sm:$0xff] }
  0x5f   :  { %7930 = vst [vmem:[#allocation38_spill] sm:$0xff] %v5871_v46  ;;  %3975 = vmatpush3.msra.mxu0 %v5485_v23  ;;  %3966 = vmatpush3.msra.mxu1 %v377_v51  ;;  %v7810_v39 = vand.u32 4294901760, %v5871_v46  ;;  %v384_v34 = vand.u32 4294901760, %v383_v49  ;;  %v7933_v51 = vld [vmem:[#allocation33_spill] sm:$0xff]  ;;  %v7935_v49 = vld [vmem:[#allocation18_spill] sm:$0xff]  ;;  %v7953_v18 = vand.u32 4294901760, %v5514_v35 }
  0x60   :  { %3976 = vmatprep.subr.mxu0 %v5491_v25  ;;  %v502_v44 = vsub.f32 %v5864_v7, %v7811_v56  ;;  %643 = vmatprep.mubr.f32.mxu0 %v5805_v61  ;;  %v7943_v56 = vld [vmem:[#allocation26_spill] sm:$0xff] }
  0x61   :  { %3977 = vmatpush3.msra.mxu0 %v5505_v31  ;;  %3967 = vmatprep.subr.mxu1 %v496_v30  ;;  %v390_v26 = vsub.f32 %v5871_v46, %v7810_v39  ;;  %v7936_v30 = vld [vmem:[#allocation19_spill] sm:$0xff]  ;;  %v7942_v39 = vld [vmem:[#allocation25_spill] sm:$0xff] }
  0x62   :  { %3978 = vmatprep.subr.mxu0 %v5514_v35  ;;  %3968 = vmatpush3.msra.mxu1 %v384_v34  ;;  %v503_v47 = vand.u32 4294901760, %v502_v44  ;;  %v7937_v34 = vld [vmem:[#allocation20_spill] sm:$0xff]  ;;  %v7938_v44 = vld [vmem:[#allocation21_spill] sm:$0xff]  ;;  %v7958_v35 = vand.u32 4294901760, %v5817_v52 }
  0x63   :  { %3979 = vmatpush3.msra.mxu0 %v5527_v40  ;;  %v391_v2 = vand.u32 4294901760, %v390_v26  ;;  %v7939_v26 = vld [vmem:[#allocation22_spill] sm:$0xff] }
  0x64   :  { %3969 = vmatprep.subr.mxu1 %v503_v47  ;;  %3980 = vmatprep.subr.mxu0 %v5541_v45  ;;  %v7940_v47 = vld [vmem:[#allocation23_spill] sm:$0xff] }
  0x65   :  { %3970 = vmatpush3.msra.mxu1 %v391_v2  ;;  %3981 = vmatpush3.msra.mxu0 %v5567_v59  ;;  %v7941_v2 = vld [vmem:[#allocation24_spill] sm:$0xff] }
  0x66   :  { %508 = vmatmul.mubr.f32.vlgmr.msra.gmra.mxu1 %v5798_v38  ;;  %3982 = vmatprep.subr.mxu0 %v5579_v0  ;;  %v7946_v38 = vld [vmem:[#allocation29_spill] sm:$0xff] }
  0x67   :  { %4009 = vmatprep.subr.mxu1 %v5452_v3  ;;  %3983 = vmatpush3.msra.mxu0 %v5590_v8 }
  0x68   :  { %4010 = vmatpush3.msra.mxu1 %v5454_v4  ;;  %3984 = vmatprep.subr.mxu0 %v5601_v42 }
  0x69   :  { %4011 = vmatprep.subr.mxu1 %v5456_v5  ;;  %3985 = vmatpush3.msra.mxu0 %v5613_v48 }
  0x6a   :  { %4012 = vmatpush3.msra.mxu1 %v5458_v9  ;;  %3986 = vmatprep.subr.mxu0 %v5627_v57 }
  0x6b   :  { %4013 = vmatprep.subr.mxu1 %v5460_v10  ;;  %3987 = vmatpush3.msra.mxu0 %v5639_v6 }
  0x6c   :  { %4014 = vmatpush3.msra.mxu1 %v5462_v11  ;;  %3988 = vmatprep.subr.mxu0 %v5660_v54 }
  0x6d   :  { %4015 = vmatprep.subr.mxu1 %v5465_v15  ;;  %3989 = vmatpush3.msra.mxu0 %v5673_v63 }
  0x6e   :  { %4016 = vmatpush3.msra.mxu1 %v5467_v16  ;;  %3990 = vmatprep.subr.mxu0 %v5691_v55 }
  0x6f   :  { %4017 = vmatprep.subr.mxu1 %v5469_v17  ;;  %3991 = vmatpush3.msra.mxu0 %v5704_v58 }
  0x70   :  { %4018 = vmatpush3.msra.mxu1 %v5482_v22  ;;  %3992 = vmatprep.subr.mxu0 %v5716_v60 }
  0x71   :  { %4019 = vmatprep.subr.mxu1 %v7931_v53  ;;  %3993 = vmatpush3.msra.mxu0 %v5727_v27 }
  0x72   :  { %4020 = vmatpush3.msra.mxu1 %v7932_v29  ;;  %3994 = vmatprep.subr.mxu0 %v7933_v51 }
  0x73   :  { %4021 = vmatprep.subr.mxu1 %v7934_v20  ;;  %3995 = vmatpush3.msra.mxu0 %v5753_v50 }
  0x74   :  { %4022 = vmatpush3.msra.mxu1 %v7935_v49  ;;  %3996 = vmatprep.subr.mxu0 %v5772_v21 }
  0x75   :  { %4023 = vmatprep.subr.mxu1 %v7936_v30  ;;  %3997 = vmatpush3.msra.mxu0 %v5783_v13 }
  0x76   :  { %4024 = vmatpush3.msra.mxu1 %v7937_v34  ;;  %3998 = vmatprep.subr.mxu0 %v5796_v32 }
  0x77   :  { %4025 = vmatprep.subr.mxu1 %v7938_v44  ;;  %3999 = vmatpush3.msra.mxu0 %v5809_v43 }
  0x78   :  { %4026 = vmatpush3.msra.mxu1 %v7939_v26  ;;  %4000 = vmatprep.subr.mxu0 %v5821_v36 }
  0x79   :  { %4027 = vmatprep.subr.mxu1 %v7940_v47  ;;  %4001 = vmatpush3.msra.mxu0 %v5828_v1 }
  0x7a   :  { %4028 = vmatpush3.msra.mxu1 %v7941_v2  ;;  %4002 = vmatprep.subr.mxu0 %v5845_v37 }
  0x7b   :  { %4029 = vmatprep.subr.mxu1 %v7942_v39  ;;  %4003 = vmatpush3.msra.mxu0 %v5855_v14  ;;  %v7947_v14 = vand.u32 4294901760, %v5485_v23  ;;  %v7954_v23 = vand.u32 4294901760, %v5527_v40  ;;  %v7960_v40 = vand.u32 4294901760, %v5590_v8  ;;  %v129_v8 = vld [vmem:[#allocation5 + $0x178] sm:$0xff] }
  0x7c   :  { %4030 = vmatpush3.msra.mxu1 %v7943_v56  ;;  %4004 = vmatprep.subr.mxu0 %v5864_v7  ;;  %v7948_v56 = vld [vmem:[#allocation30_spill] sm:$0xff]  ;;  %v7952_v7 = vld [vmem:[#allocation32_spill] sm:$0xff] }
  0x7d   :  { %4031 = vmatprep.subr.mxu1 %v7944_v12  ;;  %4005 = vmatpush3.msra.mxu0 %v5871_v46  ;;  %v7949_v12 = vand.u32 4294901760, %v5491_v25  ;;  %v7950_v46 = vld [vmem:[#allocation31_spill] sm:$0xff]  ;;  %v7955_v25 = vand.u32 4294901760, %v5541_v45  ;;  %v7961_v45 = vand.u32 4294901760, %v5601_v42  ;;  %v7965_v42 = vand.u32 4294901760, %v5660_v54 }
  0x7e   :  { %4032 = vmatpush3.msra.mxu1 %v5669_v62  ;;  %646 = vmatmul.mubr.f32.vlgmr.msra.gmra.mxu0 %v5817_v52  ;;  %v7951_v62 = vand.u32 4294901760, %v5505_v31  ;;  %v7956_v31 = vand.u32 4294901760, %v5805_v61  ;;  %v127_v54 = vld [vmem:[#allocation5 + $0x168] sm:$0xff] }
  0x7f   :  { %4033 = vmatprep.subr.mxu1 %v5683_v19  ;;  %4044 = vmatprep.subr.mxu0 %v7945_v33  ;;  %v6014_v61 = vand.u32 4294901760, %v127_v54  ;;  %v7974_v33 = vand.u32 4294901760, %v5753_v50 }
  0x80   :  { %4034 = vmatpush3.msra.mxu1 %v7946_v38  ;;  %4045 = vmatpush3.msra.mxu0 %v7947_v14  ;;  %v7959_v14 = vand.u32 4294901760, %v5579_v0  ;;  %v7963_v0 = vand.u32 4294901760, %v5627_v57  ;;  %v144_v57 = vld [vmem:[#allocation5 + $0x1f0] sm:$0xff] }
  0x81   :  { %4035 = vmatprep.subr.mxu1 %v7948_v56  ;;  %4046 = vmatprep.subr.mxu0 %v7949_v12  ;;  %7971 = vst [vmem:[#allocation15_spill] sm:$0xff] %v6014_v61  ;;  %v6042_v50 = vsub.f32 %v127_v54, %v6014_v61  ;;  %v7993_v54 = vld [vmem:[#allocation27_spill] sm:$0xff] }
  0x82   :  { %4036 = vmatpush3.msra.mxu1 %v7950_v46  ;;  %4047 = vmatpush3.msra.mxu0 %v7951_v62  ;;  %v7957_v62 = vand.u32 4294901760, %v5567_v59  ;;  %v7962_v59 = vand.u32 4294901760, %v5613_v48 }
  0x83   :  { %4037 = vmatprep.subr.mxu1 %v7952_v7  ;;  %4048 = vmatprep.subr.mxu0 %v7953_v18  ;;  %v125_v18 = vld [vmem:[#allocation5 + $0x158] sm:$0xff] }
  0x84   :  { %4038 = vmatpush3.msra.mxu1 %v5749_v28  ;;  %4049 = vmatpush3.msra.mxu0 %v7954_v23 }
  0x85   :  { %4039 = vmatprep.subr.mxu1 %v5763_v41  ;;  %4050 = vmatprep.subr.mxu0 %v7955_v25  ;;  %v124_v25 = vld [vmem:[#allocation5 + $0x150] sm:$0xff] }
  0x86   :  { %4040 = vmatpush3.msra.mxu1 %v5779_v24  ;;  %750 = vmatprep.mubr.f32.mxu1 %v7956_v31  ;;  %v7979_v31 = vand.u32 4294901760, %v5809_v43  ;;  %v7984_v43 = vand.u32 4294901760, %v5828_v1 }
  0x87   :  { %4051 = vmatpush3.msra.mxu0 %v7957_v62  ;;  %754 = vmatmul.mubr.f32.vlgmr.msra.gmra.mxu1 %v7958_v35  ;;  %v140_v35 = vld [vmem:[#allocation5 + $0x1d0] sm:$0xff] }
  0x88   :  { %4052 = vmatprep.subr.mxu0 %v7959_v14  ;;  %4079 = vmatprep.subr.mxu1 %v5452_v3  ;;  %v7964_v3 = vand.u32 4294901760, %v5639_v6  ;;  %v7968_v6 = vand.u32 4294901760, %v5704_v58  ;;  %v126_v58 = vld [vmem:[#allocation5 + $0x160] sm:$0xff] }
  0x89   :  { %4053 = vmatpush3.msra.mxu0 %v7960_v40  ;;  %4080 = vmatpush3.msra.mxu1 %v5454_v4  ;;  %v145_v4 = vld [vmem:[#allocation5 + $0x1f8] sm:$0xff] }
  0x8a   :  { %4054 = vmatprep.subr.mxu0 %v7961_v45  ;;  %4081 = vmatprep.subr.mxu1 %v5456_v5  ;;  %v128_v5 = vld [vmem:[#allocation5 + $0x170] sm:$0xff]  ;;  %v5997_v48 = vand.u32 4294901760, %v145_v4  ;;  %v6069_v45 = vand.u32 4294901760, %v125_v18 }
  0x8b   :  { %4055 = vmatpush3.msra.mxu0 %v7962_v59  ;;  %4082 = vmatpush3.msra.mxu1 %v5458_v9  ;;  %v7966_v9 = vand.u32 4294901760, %v5673_v63  ;;  %v143_v63 = vld [vmem:[#allocation5 + $0x1e8] sm:$0xff]  ;;  %v6075_v59 = vand.u32 4294901760, %v124_v25 }
  0x8c   :  { %4056 = vmatprep.subr.mxu0 %v7963_v0  ;;  %4083 = vmatprep.subr.mxu1 %v5460_v10  ;;  %v7967_v10 = vand.u32 4294901760, %v5691_v55  ;;  %v6012_v55 = vand.u32 4294901760, %v144_v57  ;;  %v6022_v52 = vand.u32 4294901760, %v143_v63  ;;  %7983 = vst [vmem:[#allocation19_spill] sm:$0xff] %v6069_v45  ;;  %v7820_v0 = vand.u32 4294901760, %v6042_v50 }
  0x8d   :  { %4057 = vmatpush3.msra.mxu0 %v7964_v3  ;;  %4084 = vmatpush3.msra.mxu1 %v5462_v11  ;;  %v5999_v11 = vand.u32 4294901760, %v129_v8  ;;  %7985 = vst [vmem:[#allocation20_spill] sm:$0xff] %v6075_v59 }
  0x8e   :  { %4058 = vmatprep.subr.mxu0 %v7965_v42  ;;  %4085 = vmatprep.subr.mxu1 %v5465_v15  ;;  %v6004_v15 = vand.u32 4294901760, %v128_v5  ;;  %7973 = vst [vmem:[#allocation16_spill] sm:$0xff] %v6022_v52  ;;  %v6045_v23 = vsub.f32 %v144_v57, %v6012_v55  ;;  %v7988_v42 = vld [vmem:[#allocation36_spill] sm:$0xff] }
  0x8f   :  { %4059 = vmatpush3.msra.mxu0 %v7966_v9  ;;  %4086 = vmatpush3.msra.mxu1 %v5467_v16  ;;  %v7969_v16 = vand.u32 4294901760, %v5716_v60  ;;  %v6020_v60 = vsub.f32 %v129_v8, %v5999_v11 }
  0x90   :  { %4060 = vmatprep.subr.mxu0 %v7967_v10  ;;  %4087 = vmatprep.subr.mxu1 %v5469_v17  ;;  %v7970_v17 = vand.u32 4294901760, %v5727_v27  ;;  %v6025_v27 = vsub.f32 %v145_v4, %v5997_v48  ;;  %v6031_v12 = vsub.f32 %v128_v5, %v6004_v15  ;;  %v139_v4 = vld [vmem:[#allocation5 + $0x1c8] sm:$0xff]  ;;  %v7990_v5 = vld [vmem:[#allocation26_spill] sm:$0xff]  ;;  %v7991_v10 = vld [vmem:[#allocation37_spill] sm:$0xff] }
  0x91   :  { %4061 = vmatpush3.msra.mxu0 %v7968_v6  ;;  %4088 = vmatpush3.msra.mxu1 %v5482_v22  ;;  %v7972_v22 = vand.u32 4294901760, %v7933_v51  ;;  %v6036_v51 = vand.u32 4294901760, %v126_v58  ;;  %v7992_v57 = vand.u32 4294901760, %v7991_v10  ;;  %v6109_v6 = vsub.f32 %v125_v18, %v6069_v45 }
  0x92   :  { %4062 = vmatprep.subr.mxu0 %v7969_v16  ;;  %4089 = vmatprep.subr.mxu1 %v7931_v53  ;;  %v7975_v53 = vand.u32 4294901760, %v5772_v21  ;;  %v7978_v21 = vand.u32 4294901760, %v5796_v32  ;;  %v7822_v32 = vand.u32 4294901760, %v6031_v12  ;;  %v138_v16 = vld [vmem:[#allocation5 + $0x1c0] sm:$0xff]  ;;  %v6126_v18 = vsub.f32 %v124_v25, %v6075_v59 }
  0x93   :  { %4063 = vmatpush3.msra.mxu0 %v7970_v17  ;;  %4090 = vmatpush3.msra.mxu1 %v7932_v29  ;;  %v142_v29 = vld [vmem:[#allocation5 + $0x1e0] sm:$0xff]  ;;  %7976 = vst [vmem:[#allocation33_spill] sm:$0xff] %v6036_v51  ;;  %v6065_v14 = vsub.f32 %v126_v58, %v6036_v51 }
  0x94   :  { %4064 = vmatprep.subr.mxu0 %v7972_v22  ;;  %4091 = vmatprep.subr.mxu1 %v7934_v20  ;;  %v7977_v20 = vand.u32 4294901760, %v5783_v13  ;;  %v7825_v13 = vand.u32 4294901760, %v6020_v60  ;;  %v6058_v62 = vand.u32 4294901760, %v142_v29  ;;  %v122_v17 = vld [vmem:[#allocation5 + $0x140] sm:$0xff] }
  0x95   :  { %4065 = vmatpush3.msra.mxu0 %v7974_v33  ;;  %4092 = vmatpush3.msra.mxu1 %v7935_v49  ;;  %v141_v49 = vld [vmem:[#allocation5 + $0x1d8] sm:$0xff]  ;;  %v7823_v58 = vand.u32 4294901760, %v6065_v14  ;;  %v7995_v33 = vld [vmem:[#allocation38_spill] sm:$0xff] }
  0x96   :  { %4066 = vmatprep.subr.mxu0 %v7975_v53  ;;  %4093 = vmatprep.subr.mxu1 %v7936_v30  ;;  %v7826_v30 = vand.u32 4294901760, %v6025_v27  ;;  %7980 = vst [vmem:[#allocation17_spill] sm:$0xff] %v6058_v62  ;;  %v6067_v40 = vand.u32 4294901760, %v141_v49  ;;  %v6089_v1 = vsub.f32 %v6020_v60, %v7825_v13  ;;  %v6103_v9 = vsub.f32 %v142_v29, %v6058_v62  ;;  %v7997_v29 = vld [vmem:[#allocation34_spill] sm:$0xff] }
  0x97   :  { %4067 = vmatpush3.msra.mxu0 %v7977_v20  ;;  %4094 = vmatpush3.msra.mxu1 %v7937_v34  ;;  %v6053_v34 = vsub.f32 %v143_v63, %v6022_v52  ;;  %v7996_v53 = vand.u32 4294901760, %v7995_v33  ;;  %v121_v33 = vld [vmem:[#allocation5 + $0x138] sm:$0xff] }
  0x98   :  { %4068 = vmatprep.subr.mxu0 %v7978_v21  ;;  %4095 = vmatprep.subr.mxu1 %v7938_v44  ;;  %v7981_v44 = vand.u32 4294901760, %v5821_v36  ;;  %7982 = vst [vmem:[#allocation18_spill] sm:$0xff] %v6067_v40  ;;  %v123_v36 = vld [vmem:[#allocation5 + $0x148] sm:$0xff]  ;;  %v6084_v3 = vsub.f32 %v6025_v27, %v7826_v30  ;;  %v6115_v22 = vsub.f32 %v141_v49, %v6067_v40  ;;  %v6128_v21 = vand.u32 4294901760, %v139_v4 }
  0x99   :  { %4069 = vmatpush3.msra.mxu0 %v7979_v31  ;;  %4096 = vmatpush3.msra.mxu1 %v7939_v26  ;;  %v7824_v26 = vand.u32 4294901760, %v6045_v23  ;;  %v7821_v8 = vand.u32 4294901760, %v6053_v34  ;;  %v6111_v63 = vand.u32 4294901760, %v123_v36  ;;  %v6133_v49 = vsub.f32 %v6042_v50, %v7820_v0  ;;  %v7999_v31 = vld [vmem:[#allocation28_spill] sm:$0xff]  ;;  %v119_v30 = vld [vmem:[#allocation5 + $0x128] sm:$0xff] }
  0x9a   :  { %4070 = vmatprep.subr.mxu0 %v7981_v44  ;;  %4097 = vmatprep.subr.mxu1 %v7940_v47  ;;  %v7986_v47 = vand.u32 4294901760, %v5845_v37  ;;  %v7989_v37 = vand.u32 4294901760, %v7988_v42  ;;  %7998 = vst [vmem:[#allocation23_spill] sm:$0xff] %v6128_v21  ;;  %v8000_v44 = vld [vmem:[#allocation35_spill] sm:$0xff]  ;;  %v7827_v10 = vand.u32 4294901760, %v6103_v9  ;;  %v120_v0 = vld [vmem:[#allocation5 + $0x130] sm:$0xff] }
  0x9b   :  { %4071 = vmatpush3.msra.mxu0 %v7984_v43  ;;  %4098 = vmatpush3.msra.mxu1 %v7941_v2  ;;  %v6091_v2 = vand.u32 4294901760, %v140_v35  ;;  %7994 = vst [vmem:[#allocation22_spill] sm:$0xff] %v6111_v63  ;;  %v6123_v20 = vsub.f32 %v6045_v23, %v7824_v26  ;;  %v6142_v25 = vsub.f32 %v6053_v34, %v7821_v8  ;;  %v6182_v13 = vand.u32 4294901760, %v121_v33  ;;  %v134_v43 = vld [vmem:[#allocation5 + $0x1a0] sm:$0xff] }
  0x9c   :  { %4072 = vmatprep.subr.mxu0 %v7986_v47  ;;  %4099 = vmatprep.subr.mxu1 %v7942_v39  ;;  %v6100_v39 = vsub.f32 %v6031_v12, %v7822_v32  ;;  %v7830_v32 = vand.u32 4294901760, %v6126_v18  ;;  %v6195_v8 = vand.u32 4294901760, %v120_v0  ;;  %v6224_v47 = vand.u32 4294901760, %v119_v30 }
  0x9d   :  { %7987 = vst [vmem:[#allocation21_spill] sm:$0xff] %v6091_v2  ;;  %4073 = vmatpush3.msra.mxu0 %v7989_v37  ;;  %4100 = vmatpush3.msra.mxu1 %v7990_v5  ;;  %v6145_v42 = vsub.f32 %v140_v35, %v6091_v2  ;;  %v6150_v5 = vand.u32 4294901760, %v138_v16  ;;  %v6158_v35 = vsub.f32 %v123_v36, %v6111_v63  ;;  %v6171_v36 = vld [vmem:[#allocation5 + $0x1b0] sm:$0xff]  ;;  %8005 = vst [vmem:[#allocation31_spill] sm:$0xff] %v6182_v13  ;;  %v118_v37 = vld [vmem:[#allocation5 + $0x120] sm:$0xff] }
  0x9e   :  { %4074 = vmatprep.subr.mxu0 %v7992_v57  ;;  %4101 = vmatprep.subr.mxu1 %v7993_v54  ;;  %v6153_v57 = vand.u32 4294901760, %v122_v17  ;;  %v137_v54 = vld [vmem:[#allocation5 + $0x1b8] sm:$0xff]  ;;  %8007 = vst [vmem:[#allocation36_spill] sm:$0xff] %v6195_v8  ;;  %8010 = vst [vmem:[#allocation27_spill] sm:$0xff] %v6224_v47 }
  0x9f   :  { %4075 = vmatpush3.msra.mxu0 %v7996_v53  ;;  %920 = vmatprep.mubr.f32.mxu0 %v7997_v29  ;;  %8001 = vst [vmem:[#allocation24_spill] sm:$0xff] %v6150_v5  ;;  %8003 = vst [vmem:[#allocation29_spill] sm:$0xff] %v6158_v35  ;;  %v7828_v53 = vand.u32 4294901760, %v6115_v22  ;;  %v6198_v26 = vsub.f32 %v138_v16, %v6150_v5  ;;  %v6214_v16 = vand.u32 4294901760, %v6171_v36 }
  0xa0   :  { %4102 = vmatpush3.msra.mxu1 %v7999_v31  ;;  %922 = vmatmul.mubr.f32.vlgmr.msra.gmra.mxu0 %v8000_v44  ;;  %8002 = vst [vmem:[#allocation25_spill] sm:$0xff] %v6153_v57  ;;  %v7829_v31 = vand.u32 4294901760, %v6109_v6 }
  0xa1   :  { %4103 = vmatprep.subr.mxu1 %v5683_v19  ;;  %4114 = vmatprep.subr.mxu0 %v5997_v48  ;;  %v6163_v19 = vsub.f32 %v6065_v14, %v7823_v58  ;;  %v6175_v58 = vsub.f32 %v139_v4, %v6128_v21  ;;  %v6190_v4 = vsub.f32 %v6103_v9, %v7827_v10 }
  0xa2   :  { %4104 = vmatpush3.msra.mxu1 %v7946_v38  ;;  %4115 = vmatpush3.msra.mxu0 %v5999_v11  ;;  %v1267_v38 = vand.u32 4294901760, %v6123_v20  ;;  %v7833_v20 = vand.u32 4294901760, %v6145_v42  ;;  %8008 = vst [vmem:[#allocation26_spill] sm:$0xff] %v6198_v26  ;;  %v6206_v10 = vsub.f32 %v6115_v22, %v7828_v53  ;;  %8009 = vst [vmem:[#allocation37_spill] sm:$0xff] %v6214_v16 }
  0xa3   :  { %4105 = vmatprep.subr.mxu1 %v7948_v56  ;;  %4116 = vmatprep.subr.mxu0 %v6012_v55  ;;  %v6180_v56 = vand.u32 4294901760, %v137_v54 }
  0xa4   :  { %4106 = vmatpush3.msra.mxu1 %v7950_v46  ;;  %4117 = vmatpush3.msra.mxu0 %v6004_v15  ;;  %v6193_v46 = vsub.f32 %v122_v17, %v6153_v57  ;;  %v6211_v17 = vsub.f32 %v6109_v6, %v7829_v31 }
  0xa5   :  { %8004 = vst [vmem:[#allocation30_spill] sm:$0xff] %v6180_v56  ;;  %4107 = vmatprep.subr.mxu1 %v7952_v7  ;;  %4118 = vmatprep.subr.mxu0 %v6022_v52  ;;  %v135_v7 = vld [vmem:[#allocation5 + $0x1a8] sm:$0xff]  ;;  %v6240_v53 = vsub.f32 %v137_v54, %v6180_v56  ;;  %v1288_v54 = vand.u32 4294901760, %v6206_v10  ;;  %v6269_v10 = vsub.f32 %v119_v30, %v6224_v47  ;;  %v116_v52 = vld [vmem:[#allocation5 + $0x110] sm:$0xff] }
  0xa6   :  { %8006 = vst [vmem:[#allocation32_spill] sm:$0xff] %v6193_v46  ;;  %4108 = vmatpush3.msra.mxu1 %v5749_v28  ;;  %4119 = vmatpush3.msra.mxu0 %v6014_v61  ;;  %v6221_v28 = vsub.f32 %v6126_v18, %v7830_v32  ;;  %v6235_v32 = vsub.f32 %v6145_v42, %v7833_v20  ;;  %v8013_v20 = vand.u32 4294901760, %v6084_v3  ;;  %v6255_v61 = vand.u32 4294901760, %v135_v7 }
  0xa7   :  { %4109 = vmatprep.subr.mxu1 %v5763_v41  ;;  %4120 = vmatprep.subr.mxu0 %v6058_v62  ;;  %v6230_v41 = vsub.f32 %v121_v33, %v6182_v13  ;;  %v6237_v62 = vand.u32 4294901760, %v118_v37  ;;  %8012 = vst [vmem:[#allocation34_spill] sm:$0xff] %v6240_v53  ;;  %v8015_v33 = vand.u32 4294901760, %v6089_v1  ;;  %v8016_v3 = vand.u32 4294901760, %v6175_v58 }
  0xa8   :  { %4110 = vmatpush3.msra.mxu1 %v5779_v24  ;;  %1024 = vmatprep.mubr.f32.mxu1 %v7997_v29  ;;  %v1281_v24 = vand.u32 4294901760, %v6190_v4  ;;  %v6246_v29 = vsub.f32 %v120_v0, %v6195_v8  ;;  %8014 = vst [vmem:[#allocation28_spill] sm:$0xff] %v6255_v61  ;;  %v117_v4 = vld [vmem:[#allocation5 + $0x118] sm:$0xff]  ;;  %v80_v0 = vld [vmem:[#allocation2 + $0x18] sm:$0xff]  ;;  %v1295_v1 = vand.u32 4294901760, %v6235_v32  ;;  %v6284_v30 = vsub.f32 %v6171_v36, %v6214_v16 }
  0xa9   :  { %8011 = vst [vmem:[#allocation38_spill] sm:$0xff] %v6237_v62  ;;  %4121 = vmatpush3.msra.mxu0 %v6036_v51  ;;  %1026 = vmatmul.mubr.f32.vlgmr.msra.gmra.mxu1 %v8000_v44  ;;  %v1176_v51 = vand.u32 4294901760, %v6211_v17  ;;  %v6257_v44 = vand.u32 4294901760, %v134_v43  ;;  %v8017_v17 = vand.u32 4294901760, %v6158_v35  ;;  %v8021_v32 = vand.u32 4294901760, %v6193_v46 }
  0xaa   :  { %4122 = vmatprep.subr.mxu0 %v6067_v40  ;;  %4149 = vmatprep.subr.mxu1 %v8013_v20  ;;  %v6266_v20 = vsub.f32 %v6175_v58, %v8016_v3  ;;  %v133_v3 = vld [vmem:[#allocation5 + $0x198] sm:$0xff]  ;;  %v6299_v31 = vand.u32 4294901760, %v117_v4  ;;  %v6301_v36 = vand.u32 4294901760, %v80_v0 }
  0xab   :  { %4123 = vmatpush3.msra.mxu0 %v6069_v45  ;;  %4150 = vmatpush3.msra.mxu1 %v8015_v33  ;;  %v6274_v40 = vsub.f32 %v6158_v35, %v8017_v17  ;;  %v79_v45 = vld [vmem:[#allocation2 + $0x10] sm:$0xff]  ;;  %v6279_v33 = vsub.f32 %v118_v37, %v6237_v62  ;;  %v8019_v17 = vand.u32 4294901760, %v6100_v39  ;;  %v6297_v37 = vsub.f32 %v6193_v46, %v8021_v32  ;;  %v132_v35 = vld [vmem:[#allocation5 + $0x190] sm:$0xff] }
  0xac   :  { %4124 = vmatprep.subr.mxu0 %v6091_v2  ;;  %4151 = vmatprep.subr.mxu1 %v1267_v38  ;;  %v8020_v2 = vand.u32 4294901760, %v6198_v26  ;;  %8022 = vst [vmem:[#allocation39_spill] sm:$0xff] %v6301_v36  ;;  %v8023_v39 = vand.u32 4294901760, %v6142_v25  ;;  %v8025_v32 = vand.u32 4294901760, %v6133_v49  ;;  %v1302_v46 = vand.u32 4294901760, %v6266_v20 }
  0xad   :  { %8018 = vst [vmem:[#allocation35_spill] sm:$0xff] %v6279_v33  ;;  %4125 = vmatpush3.msra.mxu0 %v6075_v59  ;;  %4152 = vmatpush3.msra.mxu1 %v8019_v17  ;;  %v6307_v59 = vand.u32 4294901760, %v116_v52  ;;  %v6319_v25 = vand.u32 4294901760, %v133_v3  ;;  %v6332_v20 = vsub.f32 %v134_v43, %v6257_v44  ;;  %v8029_v43 = vand.u32 4294901760, %v6230_v41 }
  0xae   :  { %v6292_v38 = vsub.f32 %v6198_v26, %v8020_v2  ;;  %4126 = vmatprep.subr.mxu0 %v6128_v21  ;;  %4153 = vmatprep.subr.mxu1 %v8023_v39  ;;  %v6310_v2 = vsub.f32 %v135_v7, %v6255_v61  ;;  %v6312_v26 = vand.u32 4294901760, %v79_v45  ;;  %v1190_v21 = vand.u32 4294901760, %v6274_v40 }
  0xaf   :  { %4127 = vmatpush3.msra.mxu0 %v6111_v63  ;;  %4154 = vmatpush3.msra.mxu1 %v8025_v32  ;;  %v8026_v7 = vand.u32 4294901760, %v6240_v53  ;;  %v6328_v63 = vand.u32 4294901760, %v132_v35  ;;  %v131_v32 = vld [vmem:[#allocation5 + $0x188] sm:$0xff]  ;;  %v8028_v40 = vand.u32 4294901760, %v6163_v19  ;;  %v1197_v39 = vand.u32 4294901760, %v6297_v37  ;;  %v130_v37 = vld [vmem:[#allocation5 + $0x180] sm:$0xff] }
  0xb0   :  { %8024 = vst [vmem:[#allocation40_spill] sm:$0xff] %v6312_v26  ;;  %4128 = vmatprep.subr.mxu0 %v6150_v5  ;;  %4155 = vmatprep.subr.mxu1 %v1281_v24  ;;  %v1309_v24 = vand.u32 4294901760, %v6292_v38  ;;  %v115_v5 = vld [vmem:[#allocation5 + $0x108] sm:$0xff]  ;;  %v1203_v49 = vsub.f32 %v6230_v41, %v8029_v43  ;;  %v6350_v19 = vsub.f32 %v116_v52, %v6307_v59  ;;  %v8031_v38 = vand.u32 4294901760, %v6284_v30 }
  0xb1   :  { %v6326_v17 = vsub.f32 %v6240_v53, %v8026_v7  ;;  %8027 = vst [vmem:[#allocation41_spill] sm:$0xff] %v6328_v63  ;;  %4129 = vmatpush3.msra.mxu0 %v6153_v57  ;;  %4156 = vmatpush3.msra.mxu1 %v8028_v40  ;;  %v6340_v7 = vsub.f32 %v117_v4, %v6299_v31  ;;  %v114_v40 = vld [vmem:[#allocation5 + $0x100] sm:$0xff]  ;;  %v8032_v43 = vand.u32 4294901760, %v6221_v28  ;;  %v7874_v28 = vand.u32 4294901760, %v6279_v33 }
  0xb2   :  { %v6343_v53 = vsub.f32 %v80_v0, %v6301_v36  ;;  %4130 = vmatprep.subr.mxu0 %v6180_v56  ;;  %4157 = vmatprep.subr.mxu1 %v1288_v54  ;;  %v6354_v4 = vsub.f32 %v79_v45, %v6312_v26  ;;  %v8030_v0 = vand.u32 4294901760, %v6246_v29  ;;  %v6360_v56 = vand.u32 4294901760, %v131_v32 }
  0xb3   :  { %4131 = vmatpush3.msra.mxu0 %v6182_v13  ;;  %4158 = vmatpush3.msra.mxu1 %v1176_v51  ;;  %v6364_v52 = vsub.f32 %v133_v3, %v6319_v25  ;;  %v1316_v45 = vand.u32 4294901760, %v6326_v17  ;;  %v1322_v51 = vsub.f32 %v6284_v30, %v8031_v38  ;;  %v6371_v13 = vand.u32 4294901760, %v115_v5 }
  0xb4   :  { %v1210_v54 = vsub.f32 %v6246_v29, %v8030_v0  ;;  %4132 = vmatprep.subr.mxu0 %v6214_v16  ;;  %4159 = vmatprep.subr.mxu1 %v1295_v1  ;;  %v6377_v3 = vand.u32 4294901760, %v130_v37  ;;  %v6379_v57 = vand.u32 4294901760, %v114_v40  ;;  %v6383_v17 = vsub.f32 %v132_v35, %v6328_v63 }
  0xb5   :  { %4133 = vmatpush3.msra.mxu0 %v6195_v8  ;;  %4160 = vmatpush3.msra.mxu1 %v8032_v43  ;;  %v1204_v38 = vand.u32 4294901760, %v1203_v49  ;;  %v8033_v0 = vand.u32 4294901760, %v6310_v2  ;;  %v8034_v1 = vand.u32 4294901760, %v6269_v10  ;;  %v1323_v49 = vand.u32 4294901760, %v1322_v51 }
  0xb6   :  { %4134 = vmatprep.subr.mxu0 %v6255_v61  ;;  %4161 = vmatprep.subr.mxu1 %v1302_v46  ;;  %v1211_v16 = vand.u32 4294901760, %v1210_v54  ;;  %v6397_v46 = vsub.f32 %v131_v32, %v6360_v56  ;;  %v8035_v43 = vand.u32 4294901760, %v6332_v20  ;;  %v8037_v32 = vand.u32 4294901760, %v6343_v53 }
  0xb7   :  { %v1329_v8 = vsub.f32 %v6310_v2, %v8033_v0  ;;  %4135 = vmatpush3.msra.mxu0 %v6224_v47  ;;  %4162 = vmatpush3.msra.mxu1 %v1190_v21  ;;  %v1217_v35 = vsub.f32 %v6269_v10, %v8034_v1  ;;  %v6401_v0 = vsub.f32 %v115_v5, %v6371_v13 }
  0xb8   :  { %4136 = vmatprep.subr.mxu0 %v6257_v44  ;;  %4163 = vmatprep.subr.mxu1 %v1309_v24  ;;  %v1336_v21 = vsub.f32 %v6332_v20, %v8035_v43  ;;  %v6409_v1 = vsub.f32 %v114_v40, %v6379_v57  ;;  %v1130_v24 = vsub.f32 %v6343_v53, %v8037_v32  ;;  %v8039_v40 = vand.u32 4294901760, %v6354_v4 }
  0xb9   :  { %4137 = vmatpush3.msra.mxu0 %v6237_v62  ;;  %4164 = vmatpush3.msra.mxu1 %v1197_v39  ;;  %v6416_v5 = vsub.f32 %v130_v37, %v6377_v3  ;;  %v1330_v43 = vand.u32 4294901760, %v1329_v8  ;;  %v1224_v39 = vsub.f32 %v6279_v33, %v7874_v28  ;;  %v1218_v32 = vand.u32 4294901760, %v1217_v35 }
  0xba   :  { %8036 = vst [vmem:[#allocation42_spill] sm:$0xff] %v6409_v1  ;;  %4138 = vmatprep.subr.mxu0 %v6319_v25  ;;  %4165 = vmatprep.subr.mxu1 %v1316_v45  ;;  %v1136_v54 = vsub.f32 %v6354_v4, %v8039_v40  ;;  %v8040_v37 = vand.u32 4294901760, %v6364_v52  ;;  %v1337_v45 = vand.u32 4294901760, %v1336_v21  ;;  %v8041_v28 = vand.u32 4294901760, %v6340_v7 }
  0xbb   :  { %8038 = vst [vmem:[#allocation43_spill] sm:$0xff] %v6416_v5  ;;  %4139 = vmatpush3.msra.mxu0 %v6299_v31  ;;  %4166 = vmatpush3.msra.mxu1 %v1204_v38  ;;  %v1131_v38 = vand.u32 4294901760, %v1130_v24  ;;  %v8042_v35 = vand.u32 4294901760, %v6383_v17  ;;  %v7878_v8 = vand.u32 4294901760, %v6416_v5  ;;  %v7877_v61 = vand.u32 4294901760, %v6409_v1 }
  0xbc   :  { %v1343_v51 = vsub.f32 %v6364_v52, %v8040_v37  ;;  %4140 = vmatprep.subr.mxu0 %v6328_v63  ;;  %4167 = vmatprep.subr.mxu1 %v1323_v49  ;;  %v1231_v40 = vsub.f32 %v6340_v7, %v8041_v28  ;;  %v1225_v49 = vand.u32 4294901760, %v1224_v39  ;;  %v1137_v21 = vand.u32 4294901760, %v1136_v54 }
  0xbd   :  { %4141 = vmatpush3.msra.mxu0 %v6307_v59  ;;  %4168 = vmatpush3.msra.mxu1 %v1211_v16  ;;  %v1350_v37 = vsub.f32 %v6383_v17, %v8042_v35  ;;  %v8043_v63 = vand.u32 4294901760, %v6350_v19  ;;  %v8044_v24 = vand.u32 4294901760, %v6397_v46  ;;  %v8045_v54 = vand.u32 4294901760, %v6401_v0 }
  0xbe   :  { %4142 = vmatprep.subr.mxu0 %v6360_v56  ;;  %4169 = vmatprep.subr.mxu1 %v1330_v43  ;;  %v1344_v16 = vand.u32 4294901760, %v1343_v51  ;;  %v1232_v43 = vand.u32 4294901760, %v1231_v40  ;;  %v1364_v51 = vsub.f32 %v6416_v5, %v7878_v8  ;;  %v8063_v8 = vld [vmem:[#allocation31_spill] sm:$0xff] }
  0xbf   :  { %v1238_v28 = vsub.f32 %v6350_v19, %v8043_v63  ;;  %4143 = vmatpush3.msra.mxu0 %v6371_v13  ;;  %4170 = vmatpush3.msra.mxu1 %v1218_v32  ;;  %v1357_v35 = vsub.f32 %v6397_v46, %v8044_v24  ;;  %v1245_v39 = vsub.f32 %v6401_v0, %v8045_v54  ;;  %v1351_v63 = vand.u32 4294901760, %v1350_v37  ;;  %v8049_v24 = vld [vmem:[#allocation26_spill] sm:$0xff]  ;;  %v8052_v54 = vld [vmem:[#allocation33_spill] sm:$0xff] }
  0xc0   :  { %4144 = vmatprep.subr.mxu0 %v6377_v3  ;;  %4171 = vmatprep.subr.mxu1 %v1337_v45  ;;  %v1252_v45 = vsub.f32 %v6409_v1, %v7877_v61  ;;  %v1365_v37 = vand.u32 4294901760, %v1364_v51  ;;  %v8055_v51 = vld [vmem:[#allocation19_spill] sm:$0xff]  ;;  %v8062_v61 = vld [vmem:[#allocation30_spill] sm:$0xff] }
  0xc1   :  { %4145 = vmatpush3.msra.mxu0 %v6379_v57  ;;  %1132 = vmatprep.mubr.f32.mxu0 %v1131_v38  ;;  %v1239_v32 = vand.u32 4294901760, %v1238_v28  ;;  %v1358_v40 = vand.u32 4294901760, %v1357_v35  ;;  %v1246_v38 = vand.u32 4294901760, %v1245_v39  ;;  %v8047_v28 = vld [vmem:[#allocation29_spill] sm:$0xff]  ;;  %v8053_v39 = vld [vmem:[#allocation34_spill] sm:$0xff] }
  0xc2   :  { %4172 = vmatpush3.msra.mxu1 %v1225_v49  ;;  %1138 = vmatmul.mubr.f32.vlgmr.msra.gmra.mxu0 %v1137_v21  ;;  %v1253_v49 = vand.u32 4294901760, %v1252_v45  ;;  %v8046_v21 = vld [vmem:[#allocation16_spill] sm:$0xff]  ;;  %v8050_v35 = vld [vmem:[#allocation17_spill] sm:$0xff] }
  0xc3   :  { %4173 = vmatprep.subr.mxu1 %v1344_v16  ;;  %4184 = vmatprep.subr.mxu0 %v6025_v27  ;;  %v8048_v16 = vld [vmem:[#allocation15_spill] sm:$0xff]  ;;  %v8057_v45 = vld [vmem:[#allocation20_spill] sm:$0xff] }
  0xc4   :  { %4174 = vmatpush3.msra.mxu1 %v1232_v43  ;;  %4185 = vmatpush3.msra.mxu0 %v6020_v60  ;;  %v8051_v43 = vld [vmem:[#allocation32_spill] sm:$0xff] }
  0xc5   :  { %4175 = vmatprep.subr.mxu1 %v1351_v63  ;;  %4186 = vmatprep.subr.mxu0 %v6045_v23  ;;  %v8054_v63 = vld [vmem:[#allocation18_spill] sm:$0xff] }
  0xc6   :  { %4176 = vmatpush3.msra.mxu1 %v1239_v32  ;;  %4187 = vmatpush3.msra.mxu0 %v6031_v12  ;;  %v8056_v32 = vld [vmem:[#allocation21_spill] sm:$0xff] }
  0xc7   :  { %4177 = vmatprep.subr.mxu1 %v1358_v40  ;;  %4188 = vmatprep.subr.mxu0 %v6053_v34  ;;  %v8058_v40 = vld [vmem:[#allocation23_spill] sm:$0xff] }
  0xc8   :  { %4178 = vmatpush3.msra.mxu1 %v1246_v38  ;;  %4189 = vmatpush3.msra.mxu0 %v6042_v50  ;;  %v8059_v38 = vld [vmem:[#allocation22_spill] sm:$0xff] }
  0xc9   :  { %4179 = vmatprep.subr.mxu1 %v1365_v37  ;;  %4190 = vmatprep.subr.mxu0 %v6103_v9  ;;  %v8060_v37 = vld [vmem:[#allocation24_spill] sm:$0xff] }
  0xca   :  { %4180 = vmatpush3.msra.mxu1 %v1253_v49  ;;  %1368 = vmatprep.mubr.f32.mxu1 %v6301_v36  ;;  %v8061_v49 = vld [vmem:[#allocation25_spill] sm:$0xff]  ;;  %v8065_v36 = vld [vmem:[#allocation36_spill] sm:$0xff] }
  0xcb   :  { %4191 = vmatpush3.msra.mxu0 %v6065_v14  ;;  %1370 = vmatmul.mubr.f32.vlgmr.msra.gmra.mxu1 %v6312_v26  ;;  %v8064_v26 = vld [vmem:[#allocation37_spill] sm:$0xff] }
  0xcc   :  { %4192 = vmatprep.subr.mxu0 %v6115_v22  ;;  %4219 = vmatprep.subr.mxu1 %v5997_v48 }
  0xcd   :  { %4193 = vmatpush3.msra.mxu0 %v6109_v6  ;;  %4220 = vmatpush3.msra.mxu1 %v5999_v11 }
  0xce   :  { %4194 = vmatprep.subr.mxu0 %v6145_v42  ;;  %4221 = vmatprep.subr.mxu1 %v6012_v55 }
  0xcf   :  { %4195 = vmatpush3.msra.mxu0 %v6126_v18  ;;  %4222 = vmatpush3.msra.mxu1 %v6004_v15 }
  0xd0   :  { %4196 = vmatprep.subr.mxu0 %v6175_v58  ;;  %4223 = vmatprep.subr.mxu1 %v8046_v21 }
  0xd1   :  { %4197 = vmatpush3.msra.mxu0 %v8047_v28  ;;  %4224 = vmatpush3.msra.mxu1 %v8048_v16 }
  0xd2   :  { %4198 = vmatprep.subr.mxu0 %v8049_v24  ;;  %4225 = vmatprep.subr.mxu1 %v8050_v35 }
  0xd3   :  { %4199 = vmatpush3.msra.mxu0 %v8051_v43  ;;  %4226 = vmatpush3.msra.mxu1 %v8052_v54 }
  0xd4   :  { %4200 = vmatprep.subr.mxu0 %v8053_v39  ;;  %4227 = vmatprep.subr.mxu1 %v8054_v63 }
  0xd5   :  { %4201 = vmatpush3.msra.mxu0 %v6230_v41  ;;  %4228 = vmatpush3.msra.mxu1 %v8055_v51 }
  0xd6   :  { %4202 = vmatprep.subr.mxu0 %v6284_v30  ;;  %4229 = vmatprep.subr.mxu1 %v8056_v32 }
  0xd7   :  { %4203 = vmatpush3.msra.mxu0 %v6246_v29  ;;  %4230 = vmatpush3.msra.mxu1 %v8057_v45 }
  0xd8   :  { %4204 = vmatprep.subr.mxu0 %v6310_v2  ;;  %4231 = vmatprep.subr.mxu1 %v8058_v40 }
  0xd9   :  { %4205 = vmatpush3.msra.mxu0 %v6269_v10  ;;  %4232 = vmatpush3.msra.mxu1 %v8059_v38 }
  0xda   :  { %4206 = vmatprep.subr.mxu0 %v6332_v20  ;;  %4233 = vmatprep.subr.mxu1 %v8060_v37 }
  0xdb   :  { %4207 = vmatpush3.msra.mxu0 %v6279_v33  ;;  %4234 = vmatpush3.msra.mxu1 %v8061_v49  ;;  %v8066_v33 = vld [vmem:[#allocation28_spill] sm:$0xff] }
  0xdc   :  { %4208 = vmatprep.subr.mxu0 %v6364_v52  ;;  %4235 = vmatprep.subr.mxu1 %v8062_v61 }
  0xdd   :  { %4209 = vmatpush3.msra.mxu0 %v6340_v7  ;;  %4236 = vmatpush3.msra.mxu1 %v8063_v8 }
  0xde   :  { %4210 = vmatprep.subr.mxu0 %v6383_v17  ;;  %4237 = vmatprep.subr.mxu1 %v8064_v26 }
  0xdf   :  { %4211 = vmatpush3.msra.mxu0 %v6350_v19  ;;  %4238 = vmatpush3.msra.mxu1 %v8065_v36 }
  0xe0   :  { %4212 = vmatprep.subr.mxu0 %v6397_v46  ;;  %4239 = vmatprep.subr.mxu1 %v8066_v33  ;;  %v8067_v33 = vand.u32 4294901760, %v6025_v27  ;;  %v8072_v27 = vand.u32 4294901760, %v6053_v34  ;;  %v8077_v34 = vand.u32 4294901760, %v6354_v4 }
  0xe1   :  { %4213 = vmatpush3.msra.mxu0 %v6401_v0  ;;  %4240 = vmatpush3.msra.mxu1 %v6224_v47  ;;  %v8068_v47 = vand.u32 4294901760, %v6020_v60  ;;  %v8073_v60 = vand.u32 4294901760, %v6042_v50  ;;  %v8079_v50 = vand.u32 4294901760, %v6109_v6  ;;  %v8087_v6 = vand.u32 4294901760, %v6230_v41 }
  0xe2   :  { %4214 = vmatprep.subr.mxu0 %v6416_v5  ;;  %4241 = vmatprep.subr.mxu1 %v6257_v44  ;;  %v8069_v5 = vld [vmem:[#allocation41_spill] sm:$0xff]  ;;  %v8091_v41 = vand.u32 4294901760, %v6269_v10  ;;  %v8096_v10 = vand.u32 4294901760, %v6340_v7  ;;  %v8099_v7 = vand.u32 4294901760, %v6397_v46 }
  0xe3   :  { %4215 = vmatpush3.msra.mxu0 %v6409_v1  ;;  %1505 = vmatprep.mubr.f32.mxu0 %v6343_v53  ;;  %v8070_v1 = vand.u32 4294901760, %v6045_v23  ;;  %v8074_v23 = vand.u32 4294901760, %v6103_v9  ;;  %v8080_v9 = vand.u32 4294901760, %v6145_v42  ;;  %v8090_v42 = vand.u32 4294901760, %v6310_v2 }
  0xe4   :  { %4242 = vmatpush3.msra.mxu1 %v6237_v62  ;;  %1508 = vmatmul.mubr.f32.vlgmr.msra.gmra.mxu0 %v6354_v4  ;;  %v8071_v62 = vand.u32 4294901760, %v6031_v12  ;;  %v8075_v12 = vand.u32 4294901760, %v6343_v53  ;;  %v161_v53 = vld [vmem:[#allocation5 + $0x278] sm:$0xff] }
  0xe5   :  { %4243 = vmatprep.subr.mxu1 %v6319_v25  ;;  %4254 = vmatprep.subr.mxu0 %v8067_v33  ;;  %v8092_v33 = vand.u32 4294901760, %v6332_v20  ;;  %v6597_v2 = vand.u32 4294901760, %v161_v53 }
  0xe6   :  { %4244 = vmatpush3.msra.mxu1 %v6299_v31  ;;  %4255 = vmatpush3.msra.mxu0 %v8068_v47  ;;  %v8078_v47 = vand.u32 4294901760, %v6115_v22  ;;  %v8082_v22 = vand.u32 4294901760, %v6175_v58  ;;  %v8088_v58 = vand.u32 4294901760, %v6284_v30  ;;  %v8093_v30 = vld [vmem:[#allocation35_spill] sm:$0xff] }
  0xe7   :  { %4245 = vmatprep.subr.mxu1 %v8069_v5  ;;  %4256 = vmatprep.subr.mxu0 %v8070_v1  ;;  %v8094_v4 = vand.u32 4294901760, %v8093_v30  ;;  %v159_v1 = vld [vmem:[#allocation5 + $0x268] sm:$0xff] }
  0xe8   :  { %4246 = vmatpush3.msra.mxu1 %v6307_v59  ;;  %4257 = vmatpush3.msra.mxu0 %v8071_v62  ;;  %v8076_v62 = vand.u32 4294901760, %v6065_v14  ;;  %v8081_v14 = vand.u32 4294901760, %v6126_v18  ;;  %v8089_v18 = vand.u32 4294901760, %v6246_v29  ;;  %v160_v29 = vld [vmem:[#allocation5 + $0x270] sm:$0xff] }
  0xe9   :  { %4247 = vmatprep.subr.mxu1 %v6360_v56  ;;  %4258 = vmatprep.subr.mxu0 %v8072_v27  ;;  %v6605_v20 = vand.u32 4294901760, %v160_v29 }
  0xea   :  { %4248 = vmatpush3.msra.mxu1 %v6371_v13  ;;  %4259 = vmatpush3.msra.mxu0 %v8073_v60 }
  0xeb   :  { %4249 = vmatprep.subr.mxu1 %v6377_v3  ;;  %4260 = vmatprep.subr.mxu0 %v8074_v23 }
  0xec   :  { %4250 = vmatpush3.msra.mxu1 %v6379_v57  ;;  %1612 = vmatprep.mubr.f32.mxu1 %v8075_v12  ;;  %v154_v12 = vld [vmem:[#allocation5 + $0x240] sm:$0xff] }
  0xed   :  { %4261 = vmatpush3.msra.mxu0 %v8076_v62  ;;  %1616 = vmatmul.mubr.f32.vlgmr.msra.gmra.mxu1 %v8077_v34 }
  0xee   :  { %4262 = vmatprep.subr.mxu0 %v8078_v47  ;;  %4289 = vmatprep.subr.mxu1 %v5997_v48  ;;  %v8083_v48 = vand.u32 4294901760, %v8047_v28  ;;  %v158_v28 = vld [vmem:[#allocation5 + $0x260] sm:$0xff]  ;;  %v153_v47 = vld [vmem:[#allocation5 + $0x238] sm:$0xff] }
  0xef   :  { %4263 = vmatpush3.msra.mxu0 %v8079_v50  ;;  %4290 = vmatpush3.msra.mxu1 %v5999_v11  ;;  %v8084_v11 = vand.u32 4294901760, %v8049_v24  ;;  %v6610_v24 = vand.u32 4294901760, %v159_v1 }
  0xf0   :  { %4264 = vmatprep.subr.mxu0 %v8080_v9  ;;  %4291 = vmatprep.subr.mxu1 %v6012_v55  ;;  %v8085_v55 = vand.u32 4294901760, %v8051_v43  ;;  %v8102_v43 = vld [vmem:[#allocation27_spill] sm:$0xff]  ;;  %v6675_v9 = vand.u32 4294901760, %v154_v12 }
  0xf1   :  { %4265 = vmatpush3.msra.mxu0 %v8081_v14  ;;  %4292 = vmatpush3.msra.mxu1 %v6004_v15  ;;  %v8086_v15 = vand.u32 4294901760, %v8053_v39  ;;  %v6633_v46 = vsub.f32 %v159_v1, %v6610_v24  ;;  %v156_v39 = vld [vmem:[#allocation5 + $0x250] sm:$0xff] }
  0xf2   :  { %4266 = vmatprep.subr.mxu0 %v8082_v22  ;;  %4293 = vmatprep.subr.mxu1 %v8046_v21  ;;  %v8095_v21 = vand.u32 4294901760, %v6364_v52  ;;  %v8098_v52 = vand.u32 4294901760, %v6350_v19  ;;  %v6627_v19 = vsub.f32 %v160_v29, %v6605_v20  ;;  %v6648_v27 = vand.u32 4294901760, %v156_v39  ;;  %v81_v29 = vld [vmem:[#allocation2 + $0x20] sm:$0xff] }
  0xf3   :  { %4267 = vmatpush3.msra.mxu0 %v8083_v48  ;;  %4294 = vmatpush3.msra.mxu1 %v8048_v16  ;;  %v8097_v16 = vand.u32 4294901760, %v6383_v17  ;;  %v157_v17 = vld [vmem:[#allocation5 + $0x258] sm:$0xff]  ;;  %v2001_v23 = vand.u32 4294901760, %v6633_v46  ;;  %v6687_v48 = vand.u32 4294901760, %v153_v47 }
  0xf4   :  { %4268 = vmatprep.subr.mxu0 %v8084_v11  ;;  %4295 = vmatprep.subr.mxu1 %v8050_v35  ;;  %v6621_v35 = vand.u32 4294901760, %v158_v28  ;;  %v1994_v60 = vand.u32 4294901760, %v6627_v19 }
  0xf5   :  { %4269 = vmatpush3.msra.mxu0 %v8085_v55  ;;  %4296 = vmatpush3.msra.mxu1 %v8052_v54  ;;  %v151_v55 = vld [vmem:[#allocation5 + $0x228] sm:$0xff] }
  0xf6   :  { %4270 = vmatprep.subr.mxu0 %v8086_v15  ;;  %4297 = vmatprep.subr.mxu1 %v8054_v63  ;;  %v8105_v63 = vld [vmem:[#allocation42_spill] sm:$0xff]  ;;  %v1995_v50 = vsub.f32 %v6627_v19, %v1994_v60  ;;  %v6698_v15 = vsub.f32 %v154_v12, %v6675_v9 }
  0xf7   :  { %4271 = vmatpush3.msra.mxu0 %v8087_v6  ;;  %4298 = vmatpush3.msra.mxu1 %v8055_v51  ;;  %v8106_v51 = vand.u32 4294901760, %v8105_v63 }
  0xf8   :  { %4272 = vmatprep.subr.mxu0 %v8088_v58  ;;  %4299 = vmatprep.subr.mxu1 %v8056_v32  ;;  %v8107_v32 = vld [vmem:[#allocation39_spill] sm:$0xff] }
  0xf9   :  { %4273 = vmatpush3.msra.mxu0 %v8089_v18  ;;  %4300 = vmatpush3.msra.mxu1 %v8057_v45  ;;  %v150_v18 = vld [vmem:[#allocation5 + $0x220] sm:$0xff] }
  0xfa   :  { %4274 = vmatprep.subr.mxu0 %v8090_v42  ;;  %4301 = vmatprep.subr.mxu1 %v8058_v40  ;;  %v8108_v40 = vld [vmem:[#allocation38_spill] sm:$0xff]  ;;  %v6707_v42 = vsub.f32 %v153_v47, %v6687_v48 }
  0xfb   :  { %4275 = vmatpush3.msra.mxu0 %v8091_v41  ;;  %4302 = vmatpush3.msra.mxu1 %v8059_v38  ;;  %v8109_v38 = vld [vmem:[#allocation40_spill] sm:$0xff]  ;;  %v6712_v41 = vand.u32 4294901760, %v151_v55 }
  0xfc   :  { %4276 = vmatprep.subr.mxu0 %v8092_v33  ;;  %4303 = vmatprep.subr.mxu1 %v8060_v37  ;;  %v6644_v37 = vsub.f32 %v158_v28, %v6621_v35  ;;  %v149_v28 = vld [vmem:[#allocation5 + $0x218] sm:$0xff] }
  0xfd   :  { %4277 = vmatpush3.msra.mxu0 %v8094_v4  ;;  %4304 = vmatpush3.msra.mxu1 %v8061_v49  ;;  %v5390_v49 = vmov 0.0  }
  0xfe   :  { %4278 = vmatprep.subr.mxu0 %v8095_v21  ;;  %4305 = vmatprep.subr.mxu1 %v8062_v61  ;;  %v6616_v61 = vsub.f32 %v161_v53, %v6597_v2  ;;  %v6724_v21 = vand.u32 4294901760, %v150_v18 }
  0xff   :  { %4279 = vmatpush3.msra.mxu0 %v8096_v10  ;;  %4306 = vmatpush3.msra.mxu1 %v8063_v8  ;;  %v8100_v8 = vld [vmem:[#allocation28_spill] sm:$0xff]  ;;  %v2036_v10 = vand.u32 4294901760, %v6698_v15 }
 0x100   :  { %4280 = vmatprep.subr.mxu0 %v8097_v16  ;;  %4307 = vmatprep.subr.mxu1 %v8064_v26  ;;  %v8101_v26 = vand.u32 4294901760, %v6401_v0  ;;  %v6638_v0 = vand.u32 4294901760, %v157_v17  ;;  %v1987_v45 = vand.u32 4294901760, %v6616_v61  ;;  %v6729_v16 = vand.u32 4294901760, %v81_v29 }
 0x101   :  { %4281 = vmatpush3.msra.mxu0 %v8098_v52  ;;  %4308 = vmatpush3.msra.mxu1 %v8065_v36  ;;  %v8103_v36 = vld [vmem:[#allocation43_spill] sm:$0xff] }
 0x102   :  { %4282 = vmatprep.subr.mxu0 %v8099_v7  ;;  %4309 = vmatprep.subr.mxu1 %v8100_v8  ;;  %v8104_v54 = vand.u32 4294901760, %v8103_v36  ;;  %v1988_v62 = vsub.f32 %v6616_v61, %v1987_v45  ;;  %v6733_v7 = vsub.f32 %v151_v55, %v6712_v41 }
 0x103   :  { %4283 = vmatpush3.msra.mxu0 %v8101_v26  ;;  %4310 = vmatpush3.msra.mxu1 %v8102_v43  ;;  %v148_v26 = vld [vmem:[#allocation5 + $0x210] sm:$0xff]  ;;  %v6741_v43 = vand.u32 4294901760, %v149_v28 }
 0x104   :  { %4284 = vmatprep.subr.mxu0 %v8104_v54  ;;  %4311 = vmatprep.subr.mxu1 %v6257_v44  ;;  %v155_v44 = vld [vmem:[#allocation5 + $0x248] sm:$0xff]  ;;  %v1989_v14 = vand.u32 4294901760, %v1988_v62  ;;  %v6745_v54 = vsub.f32 %v150_v18, %v6724_v21  ;;  %v2057_v12 = vand.u32 4294901760, %v6733_v7  ;;  %v146_v62 = vld [vmem:[#allocation5 + $0x200] sm:$0xff] }
 0x105   :  { %4285 = vmatpush3.msra.mxu0 %v8106_v51  ;;  %1782 = vmatprep.mubr.f32.mxu0 %v8107_v32  ;;  %v6662_v34 = vand.u32 4294901760, %v155_v44  ;;  %v147_v51 = vld [vmem:[#allocation5 + $0x208] sm:$0xff]  ;;  %v6766_v47 = vsub.f32 %v149_v28, %v6741_v43  ;;  %v6780_v55 = vand.u32 4294901760, %v146_v62 }
 0x106   :  { %4312 = vmatpush3.msra.mxu1 %v8108_v40  ;;  %1784 = vmatmul.mubr.f32.vlgmr.msra.gmra.mxu0 %v8109_v38  ;;  %v6756_v40 = vsub.f32 %v81_v29, %v6729_v16  ;;  %v2058_v18 = vsub.f32 %v6733_v7, %v2057_v12 }
 0x107   :  { %4313 = vmatprep.subr.mxu1 %v6319_v25  ;;  %4630 = vmatprep.subr.mxu0 %v5390_v49  ;;  %v6657_v25 = vsub.f32 %v157_v17, %v6638_v0  ;;  %v6685_v22 = vsub.f32 %v155_v44, %v6662_v34  ;;  %v2043_v17 = vand.u32 4294901760, %v6707_v42  ;;  %v2071_v29 = vand.u32 4294901760, %v6766_v47 }
 0x108   :  { %4314 = vmatpush3.msra.mxu1 %v6299_v31  ;;  %4631 = vmatpush3.msra.mxu0 %v6597_v2  ;;  %v2008_v31 = vand.u32 4294901760, %v6644_v37  ;;  %v6800_v28 = vsub.f32 %v146_v62, %v6780_v55 }
 0x109   :  { %4315 = vmatprep.subr.mxu1 %v8069_v5  ;;  %4632 = vmatprep.subr.mxu0 %v5390_v49  ;;  %v6670_v5 = vsub.f32 %v156_v39, %v6648_v27  ;;  %v2015_v11 = vand.u32 4294901760, %v6657_v25  ;;  %v2029_v33 = vand.u32 4294901760, %v6685_v22  ;;  %v2037_v39 = vsub.f32 %v6698_v15, %v2036_v10 }
 0x10a   :  { %4316 = vmatpush3.msra.mxu1 %v6307_v59  ;;  %4633 = vmatpush3.msra.mxu0 %v6605_v20  ;;  %v2002_v59 = vsub.f32 %v6633_v46, %v2001_v23  ;;  %v2044_v44 = vsub.f32 %v6707_v42, %v2043_v17  ;;  %v2092_v62 = vand.u32 4294901760, %v6800_v28 }
 0x10b   :  { %4317 = vmatprep.subr.mxu1 %v6360_v56  ;;  %4634 = vmatprep.subr.mxu0 %v5390_v49  ;;  %v152_v56 = vld [vmem:[#allocation5 + $0x230] sm:$0xff]  ;;  %v2022_v58 = vand.u32 4294901760, %v6670_v5  ;;  %v2016_v53 = vsub.f32 %v6657_v25, %v2015_v11  ;;  %v2030_v8 = vsub.f32 %v6685_v22, %v2029_v33 }
 0x10c   :  { %4318 = vmatpush3.msra.mxu1 %v6371_v13  ;;  %4635 = vmatpush3.msra.mxu0 %v6610_v24  ;;  %v2009_v13 = vsub.f32 %v6644_v37, %v2008_v31  ;;  %v6700_v6 = vand.u32 4294901760, %v152_v56 }
 0x10d   :  { %4319 = vmatprep.subr.mxu1 %v6377_v3  ;;  %4636 = vmatprep.subr.mxu0 %v5390_v49  ;;  %v1996_v3 = vand.u32 4294901760, %v1995_v50  ;;  %v2023_v1 = vsub.f32 %v6670_v5, %v2022_v58  ;;  %v2017_v52 = vand.u32 4294901760, %v2016_v53  ;;  %v6768_v50 = vand.u32 4294901760, %v147_v51 }
 0x10e   :  { %4320 = vmatpush3.msra.mxu1 %v6379_v57  ;;  %1886 = vmatprep.mubr.f32.mxu1 %v8107_v32  ;;  %v2003_v57 = vand.u32 4294901760, %v2002_v59  ;;  %v2010_v30 = vand.u32 4294901760, %v2009_v13  ;;  %v6719_v4 = vsub.f32 %v152_v56, %v6700_v6  ;;  %v6753_v32 = vand.u32 4294901760, %v148_v26 }
 0x10f   :  { %4637 = vmatpush3.msra.mxu0 %v6621_v35  ;;  %1888 = vmatmul.mubr.f32.vlgmr.msra.gmra.mxu1 %v8109_v38  ;;  %v2024_v36 = vand.u32 4294901760, %v2023_v1  ;;  %v2031_v38 = vand.u32 4294901760, %v2030_v8  ;;  %v2038_v59 = vand.u32 4294901760, %v2037_v39  ;;  %v6790_v53 = vsub.f32 %v147_v51, %v6768_v50 }
 0x110   :  { %4638 = vmatprep.subr.mxu0 %v5390_v49  ;;  %4665 = vmatprep.subr.mxu1 %v5390_v49  ;;  %v2050_v63 = vand.u32 4294901760, %v6719_v4  ;;  %v6778_v13 = vsub.f32 %v148_v26, %v6753_v32  ;;  %v2059_v26 = vand.u32 4294901760, %v2058_v18  ;;  %v2093_v18 = vsub.f32 %v6800_v28, %v2092_v62 }
 0x111   :  { %4639 = vmatpush3.msra.mxu0 %v6638_v0  ;;  %4666 = vmatpush3.msra.mxu1 %v1989_v14  ;;  %v2064_v14 = vand.u32 4294901760, %v6745_v54  ;;  %v2085_v39 = vand.u32 4294901760, %v6790_v53 }
 0x112   :  { %4640 = vmatprep.subr.mxu0 %v5390_v49  ;;  %4667 = vmatprep.subr.mxu1 %v5390_v49  ;;  %v2051_v56 = vsub.f32 %v6719_v4, %v2050_v63  ;;  %v2078_v8 = vand.u32 4294901760, %v6778_v13 }
 0x113   :  { %4641 = vmatpush3.msra.mxu0 %v6648_v27  ;;  %4668 = vmatpush3.msra.mxu1 %v1996_v3  ;;  %v1976_v3 = vand.u32 4294901760, %v6756_v40  ;;  %v2065_v1 = vsub.f32 %v6745_v54, %v2064_v14 }
 0x114   :  { %4642 = vmatprep.subr.mxu0 %v5390_v49  ;;  %4669 = vmatprep.subr.mxu1 %v5390_v49 }
 0x115   :  { %4643 = vmatpush3.msra.mxu0 %v6662_v34  ;;  %4670 = vmatpush3.msra.mxu1 %v2003_v57  ;;  %v2045_v57 = vand.u32 4294901760, %v2044_v44  ;;  %v2066_v51 = vand.u32 4294901760, %v2065_v1  ;;  %v2079_v44 = vsub.f32 %v6778_v13, %v2078_v8  ;;  %v2094_v1 = vand.u32 4294901760, %v2093_v18 }
 0x116   :  { %4644 = vmatprep.subr.mxu0 %v5390_v49  ;;  %4671 = vmatprep.subr.mxu1 %v5390_v49 }
 0x117   :  { %4645 = vmatpush3.msra.mxu0 %v6675_v9  ;;  %4672 = vmatpush3.msra.mxu1 %v2010_v30  ;;  %v2052_v30 = vand.u32 4294901760, %v2051_v56  ;;  %v2086_v56 = vsub.f32 %v6790_v53, %v2085_v39 }
 0x118   :  { %4646 = vmatprep.subr.mxu0 %v5390_v49  ;;  %4673 = vmatprep.subr.mxu1 %v5390_v49 }
 0x119   :  { %4647 = vmatpush3.msra.mxu0 %v6687_v48  ;;  %4674 = vmatpush3.msra.mxu1 %v2017_v52  ;;  %v1977_v52 = vsub.f32 %v6756_v40, %v1976_v3 }
 0x11a   :  { %4648 = vmatprep.subr.mxu0 %v5390_v49  ;;  %4675 = vmatprep.subr.mxu1 %v5390_v49 }
 0x11b   :  { %4649 = vmatpush3.msra.mxu0 %v6700_v6  ;;  %4676 = vmatpush3.msra.mxu1 %v2024_v36  ;;  %v2072_v36 = vsub.f32 %v6766_v47, %v2071_v29 }
 0x11c   :  { %4650 = vmatprep.subr.mxu0 %v5390_v49  ;;  %4677 = vmatprep.subr.mxu1 %v5390_v49 }
 0x11d   :  { %4651 = vmatpush3.msra.mxu0 %v6712_v41  ;;  %4678 = vmatpush3.msra.mxu1 %v2031_v38  ;;  %v1978_v38 = vand.u32 4294901760, %v1977_v52 }
 0x11e   :  { %4652 = vmatprep.subr.mxu0 %v5390_v49  ;;  %4679 = vmatprep.subr.mxu1 %v5390_v49  ;;  %v3936_v52 = vpop.f32.mrf.mxu0 }
 0x11f   :  { %4653 = vmatpush3.msra.mxu0 %v6724_v21  ;;  %4680 = vmatpush3.msra.mxu1 %v2038_v59  ;;  %v2073_v59 = vand.u32 4294901760, %v2072_v36 }
 0x120   :  { %4654 = vmatprep.subr.mxu0 %v5390_v49  ;;  %4681 = vmatprep.subr.mxu1 %v5390_v49 }
 0x121   :  { %4655 = vmatpush3.msra.mxu0 %v6741_v43  ;;  %4682 = vmatpush3.msra.mxu1 %v2045_v57  ;;  %v2080_v57 = vand.u32 4294901760, %v2079_v44 }
 0x122   :  { %4656 = vmatprep.subr.mxu0 %v5390_v49  ;;  %4683 = vmatprep.subr.mxu1 %v5390_v49 }
 0x123   :  { %4657 = vmatpush3.msra.mxu0 %v6753_v32  ;;  %4684 = vmatpush3.msra.mxu1 %v2052_v30  ;;  %v2087_v30 = vand.u32 4294901760, %v2086_v56 }
 0x124   :  { %4658 = vmatprep.subr.mxu0 %v5390_v49  ;;  %4685 = vmatprep.subr.mxu1 %v5390_v49 }
 0x125   :  { %4659 = vmatpush3.msra.mxu0 %v6768_v50  ;;  %4686 = vmatpush3.msra.mxu1 %v2059_v26  ;;  %v3937_v26 = vpop.f32.mrf.mxu0 }
 0x126   :  { %4660 = vmatprep.subr.mxu0 %v5390_v49  ;;  %4687 = vmatprep.subr.mxu1 %v5390_v49  ;;  %v3971_v36 = vpop.f32.mrf.mxu1 }
 0x127   :  { %4661 = vmatpush3.msra.mxu0 %v6780_v55  ;;  %4662 = vmatprep.mubr.msk.f32.mxu0 %vm5391_vm0, %v5390_v49 }
 0x128   :  { %4688 = vmatpush3.msra.mxu1 %v2066_v51  ;;  %4663 = vmatmul.mubr.f32.vlgmr.msra.gmra.mxu0 %v1978_v38  ;;  %v3938_v51 = vadd.f32 %v3937_v26, %v3936_v52  ;;  %v3902_v38 = vld [vmem:[%s7747_s2] ss:$0 sm:$0xff]  ;;  %v3972_v44 = vpop.f32.mrf.mxu1 }
 0x129   :  { %4689 = vmatprep.subr.mxu1 %v5390_v49  ;;  %4700 = vmatprep.subr.mxu0 %v5390_v49  ;;  %v3973_v56 = vadd.f32 %v3972_v44, %v3971_v36 }
 0x12a   :  { %4690 = vmatpush3.msra.mxu1 %v2073_v59  ;;  %4701 = vmatpush3.msra.mxu0 %v6616_v61  ;;  %v278_v59 = vadd.f32 %v3938_v51, %v3902_v38 }
 0x12b   :  { %4691 = vmatprep.subr.mxu1 %v5390_v49  ;;  %4702 = vmatprep.subr.mxu0 %v5390_v49 }
 0x12c   :  { %4692 = vmatpush3.msra.mxu1 %v2080_v57  ;;  %4703 = vmatpush3.msra.mxu0 %v6627_v19 }
 0x12d   :  { %4693 = vmatprep.subr.mxu1 %v5390_v49  ;;  %4704 = vmatprep.subr.mxu0 %v5390_v49 }
 0x12e   :  { %4694 = vmatpush3.msra.mxu1 %v2087_v30  ;;  %4705 = vmatpush3.msra.mxu0 %v6633_v46  ;;  %v510_v30 = vadd.f32 %v3973_v56, %v278_v59 }
 0x12f   :  { %4695 = vmatprep.subr.mxu1 %v5390_v49  ;;  %4706 = vmatprep.subr.mxu0 %v5390_v49 }
 0x130   :  { %4696 = vmatpush3.msra.mxu1 %v2094_v1  ;;  %4697 = vmatprep.mubr.msk.f32.mxu1 %vm5391_vm0, %v5390_v49 }
 0x131   :  { %4707 = vmatpush3.msra.mxu0 %v6644_v37  ;;  %4698 = vmatmul.mubr.f32.vlgmr.msra.gmra.mxu1 %v6729_v16 }
 0x132   :  { %4708 = vmatprep.subr.mxu0 %v5390_v49  ;;  %4735 = vmatprep.subr.mxu1 %v5390_v49 }
 0x133   :  { %4709 = vmatpush3.msra.mxu0 %v6657_v25  ;;  %4736 = vmatpush3.msra.mxu1 %v6597_v2 }
 0x134   :  { %4710 = vmatprep.subr.mxu0 %v5390_v49  ;;  %4737 = vmatprep.subr.mxu1 %v5390_v49 }
 0x135   :  { %4711 = vmatpush3.msra.mxu0 %v6670_v5  ;;  %4738 = vmatpush3.msra.mxu1 %v6605_v20  ;;  %v2552_v5 = vld [vmem:[#allocation7 + $0x78] sm:$0xff] }
 0x136   :  { %4712 = vmatprep.subr.mxu0 %v5390_v49  ;;  %4739 = vmatprep.subr.mxu1 %v5390_v49 }
 0x137   :  { %4713 = vmatpush3.msra.mxu0 %v6685_v22  ;;  %4740 = vmatpush3.msra.mxu1 %v6610_v24  ;;  %v2551_v22 = vld [vmem:[#allocation7 + $0x70] sm:$0xff] }
 0x138   :  { %4714 = vmatprep.subr.mxu0 %v5390_v49  ;;  %4741 = vmatprep.subr.mxu1 %v5390_v49 }
 0x139   :  { %4715 = vmatpush3.msra.mxu0 %v6698_v15  ;;  %4742 = vmatpush3.msra.mxu1 %v6621_v35  ;;  %v2550_v15 = vld [vmem:[#allocation7 + $0x68] sm:$0xff] }
 0x13a   :  { %4716 = vmatprep.subr.mxu0 %v5390_v49  ;;  %4743 = vmatprep.subr.mxu1 %v5390_v49 }
 0x13b   :  { %4717 = vmatpush3.msra.mxu0 %v6707_v42  ;;  %4744 = vmatpush3.msra.mxu1 %v6638_v0  ;;  %v7018_v42 = vand.u32 4294901760, %v2550_v15 }
 0x13c   :  { %4718 = vmatprep.subr.mxu0 %v5390_v49  ;;  %4745 = vmatprep.subr.mxu1 %v5390_v49 }
 0x13d   :  { %4719 = vmatpush3.msra.mxu0 %v6719_v4  ;;  %4746 = vmatpush3.msra.mxu1 %v6648_v27  ;;  %v2547_v4 = vld [vmem:[#allocation7 + $0x50] sm:$0xff] }
 0x13e   :  { %4720 = vmatprep.subr.mxu0 %v5390_v49  ;;  %4747 = vmatprep.subr.mxu1 %v5390_v49  ;;  %v4006_v57 = vpop.f32.mrf.mxu0 }
 0x13f   :  { %4721 = vmatpush3.msra.mxu0 %v6733_v7  ;;  %4748 = vmatpush3.msra.mxu1 %v6662_v34 }
 0x140   :  { %4722 = vmatprep.subr.mxu0 %v5390_v49  ;;  %4749 = vmatprep.subr.mxu1 %v5390_v49  ;;  %v4007_v18 = vpop.f32.mrf.mxu0 }
 0x141   :  { %4723 = vmatpush3.msra.mxu0 %v6745_v54  ;;  %4750 = vmatpush3.msra.mxu1 %v6675_v9  ;;  %v4008_v1 = vadd.f32 %v4007_v18, %v4006_v57  ;;  %v7035_v54 = vsub.f32 %v2550_v15, %v7018_v42 }
 0x142   :  { %4724 = vmatprep.subr.mxu0 %v5390_v49  ;;  %4751 = vmatprep.subr.mxu1 %v5390_v49 }
 0x143   :  { %4725 = vmatpush3.msra.mxu0 %v6766_v47  ;;  %4752 = vmatpush3.msra.mxu1 %v6687_v48  ;;  %v6886_v52 = vadd.f32 %v4008_v1, %v510_v30 }
 0x144   :  { %4726 = vmatprep.subr.mxu0 %v5390_v49  ;;  %4753 = vmatprep.subr.mxu1 %v5390_v49 }
 0x145   :  { %4727 = vmatpush3.msra.mxu0 %v6778_v13  ;;  %4754 = vmatpush3.msra.mxu1 %v6700_v6  ;;  %v2668_v13 = vand.u32 4294901760, %v7035_v54 }
 0x146   :  { %4728 = vmatprep.subr.mxu0 %v5390_v49  ;;  %4755 = vmatprep.subr.mxu1 %v5390_v49 }
 0x147   :  { %4729 = vmatpush3.msra.mxu0 %v6790_v53  ;;  %4756 = vmatpush3.msra.mxu1 %v6712_v41  ;;  %v4041_v61 = vpop.f32.mrf.mxu1 }
 0x148   :  { %4730 = vmatprep.subr.mxu0 %v5390_v49  ;;  %4757 = vmatprep.subr.mxu1 %v5390_v49 }
 0x149   :  { %4731 = vmatpush3.msra.mxu0 %v6800_v28  ;;  %4732 = vmatprep.mubr.msk.f32.mxu0 %vm5391_vm0, %v5390_v49 }
 0x14a   :  { %4758 = vmatpush3.msra.mxu1 %v6724_v21  ;;  %4733 = vmatmul.mubr.f32.vlgmr.msra.gmra.mxu0 %v6756_v40 }
 0x14b   :  { %4759 = vmatprep.subr.mxu1 %v5390_v49  ;;  %4770 = vmatprep.subr.mxu0 %v5390_v49 }
 0x14c   :  { %4760 = vmatpush3.msra.mxu1 %v6741_v43  ;;  %4771 = vmatpush3.msra.mxu0 %v1987_v45 }
 0x14d   :  { %4761 = vmatprep.subr.mxu1 %v5390_v49  ;;  %4772 = vmatprep.subr.mxu0 %v5390_v49 }
 0x14e   :  { %4762 = vmatpush3.msra.mxu1 %v6753_v32  ;;  %4773 = vmatpush3.msra.mxu0 %v1994_v60 }
 0x14f   :  { %4763 = vmatprep.subr.mxu1 %v5390_v49  ;;  %4774 = vmatprep.subr.mxu0 %v5390_v49 }
 0x150   :  { %4764 = vmatpush3.msra.mxu1 %v6768_v50  ;;  %4775 = vmatpush3.msra.mxu0 %v2001_v23 }
 0x151   :  { %4765 = vmatprep.subr.mxu1 %v5390_v49  ;;  %4776 = vmatprep.subr.mxu0 %v5390_v49 }
 0x152   :  { %4766 = vmatpush3.msra.mxu1 %v6780_v55  ;;  %4767 = vmatprep.mubr.msk.f32.mxu1 %vm5391_vm0, %v5390_v49 }
 0x153   :  { %4777 = vmatpush3.msra.mxu0 %v2008_v31  ;;  %4768 = vmatmul.mubr.f32.vlgmr.msra.gmra.mxu1 %v1976_v3 }
 0x154   :  { %4778 = vmatprep.subr.mxu0 %v5390_v49  ;;  %4805 = vmatprep.subr.mxu1 %v5390_v49 }
 0x155   :  { %4779 = vmatpush3.msra.mxu0 %v2015_v11  ;;  %4806 = vmatpush3.msra.mxu1 %v6597_v2  ;;  %v4042_v2 = vpop.f32.mrf.mxu1  ;;  %v7015_v11 = vand.u32 4294901760, %v2551_v22 }
 0x156   :  { %4780 = vmatprep.subr.mxu0 %v5390_v49  ;;  %4807 = vmatprep.subr.mxu1 %v5390_v49 }
 0x157   :  { %4781 = vmatpush3.msra.mxu0 %v2022_v58  ;;  %4808 = vmatpush3.msra.mxu1 %v6605_v20  ;;  %v4043_v20 = vadd.f32 %v4042_v2, %v4041_v61  ;;  %v2548_v58 = vld [vmem:[#allocation7 + $0x58] sm:$0xff]  ;;  %v7027_v7 = vsub.f32 %v2551_v22, %v7015_v11 }
 0x158   :  { %4782 = vmatprep.subr.mxu0 %v5390_v49  ;;  %4809 = vmatprep.subr.mxu1 %v5390_v49  ;;  %v2544_v2 = vld [vmem:[#allocation7 + $0x38] sm:$0xff] }
 0x159   :  { %4783 = vmatpush3.msra.mxu0 %v2029_v33  ;;  %4810 = vmatpush3.msra.mxu1 %v6610_v24  ;;  %v756_v19 = vadd.f32 %v4043_v20, %v6886_v52  ;;  %v7022_v33 = vand.u32 4294901760, %v2548_v58  ;;  %v2661_v47 = vand.u32 4294901760, %v7027_v7 }
 0x15a   :  { %4784 = vmatprep.subr.mxu0 %v5390_v49  ;;  %4811 = vmatprep.subr.mxu1 %v5390_v49 }
 0x15b   :  { %4785 = vmatpush3.msra.mxu0 %v2036_v10  ;;  %4812 = vmatpush3.msra.mxu1 %v6621_v35  ;;  %v2545_v10 = vld [vmem:[#allocation7 + $0x40] sm:$0xff] }
 0x15c   :  { %4786 = vmatprep.subr.mxu0 %v5390_v49  ;;  %4813 = vmatprep.subr.mxu1 %v5390_v49  ;;  %v7044_v40 = vand.u32 4294901760, %v2545_v10 }
 0x15d   :  { %4787 = vmatpush3.msra.mxu0 %v2043_v17  ;;  %4814 = vmatpush3.msra.mxu1 %v6638_v0  ;;  %v7030_v17 = vand.u32 4294901760, %v2547_v4 }
 0x15e   :  { %4788 = vmatprep.subr.mxu0 %v5390_v49  ;;  %4815 = vmatprep.subr.mxu1 %v5390_v49  ;;  %v7062_v53 = vsub.f32 %v2545_v10, %v7044_v40  ;;  %v2540_v10 = vld [vmem:[#allocation7 + $0x18] sm:$0xff] }
 0x15f   :  { %4789 = vmatpush3.msra.mxu0 %v2050_v63  ;;  %4816 = vmatpush3.msra.mxu1 %v6648_v27 }
 0x160   :  { %4790 = vmatprep.subr.mxu0 %v5390_v49  ;;  %4817 = vmatprep.subr.mxu1 %v5390_v49  ;;  %v4076_v24 = vpop.f32.mrf.mxu0  ;;  %v7896_v59 = vand.u32 4294901760, %v7062_v53 }
 0x161   :  { %4791 = vmatpush3.msra.mxu0 %v2057_v12  ;;  %4818 = vmatpush3.msra.mxu1 %v6662_v34 }
 0x162   :  { %4792 = vmatprep.subr.mxu0 %v5390_v49  ;;  %4819 = vmatprep.subr.mxu1 %v5390_v49  ;;  %v4077_v35 = vpop.f32.mrf.mxu0  ;;  %v2704_v61 = vsub.f32 %v7062_v53, %v7896_v59 }
 0x163   :  { %4793 = vmatpush3.msra.mxu0 %v2064_v14  ;;  %4820 = vmatpush3.msra.mxu1 %v6675_v9  ;;  %v4078_v46 = vadd.f32 %v4077_v35, %v4076_v24  ;;  %v7010_v9 = vand.u32 4294901760, %v2552_v5  ;;  %v7099_v24 = vand.u32 4294901760, %v2544_v2 }
 0x164   :  { %4794 = vmatprep.subr.mxu0 %v5390_v49  ;;  %4821 = vmatprep.subr.mxu1 %v5390_v49 }
 0x165   :  { %4795 = vmatpush3.msra.mxu0 %v2071_v29  ;;  %4822 = vmatpush3.msra.mxu1 %v6687_v48  ;;  %v924_v0 = vadd.f32 %v4078_v46, %v756_v19  ;;  %v7013_v48 = vsub.f32 %v2552_v5, %v7010_v9  ;;  %v2543_v19 = vld [vmem:[#allocation7 + $0x30] sm:$0xff] }
 0x166   :  { %4796 = vmatprep.subr.mxu0 %v5390_v49  ;;  %4823 = vmatprep.subr.mxu1 %v5390_v49 }
 0x167   :  { %4797 = vmatpush3.msra.mxu0 %v2078_v8  ;;  %4824 = vmatpush3.msra.mxu1 %v6700_v6  ;;  %v2549_v6 = vld [vmem:[#allocation7 + $0x60] sm:$0xff]  ;;  %v2662_v8 = vsub.f32 %v7027_v7, %v2661_v47 }
 0x168   :  { %4798 = vmatprep.subr.mxu0 %v5390_v49  ;;  %4825 = vmatprep.subr.mxu1 %v5390_v49 }
 0x169   :  { %4799 = vmatpush3.msra.mxu0 %v2085_v39  ;;  %4826 = vmatpush3.msra.mxu1 %v6712_v41  ;;  %v4111_v45 = vpop.f32.mrf.mxu1  ;;  %v7020_v41 = vand.u32 4294901760, %v2549_v6  ;;  %v2663_v36 = vand.u32 4294901760, %v2662_v8  ;;  %v7140_v8 = vand.u32 4294901760, %v2540_v10 }
 0x16a   :  { %4800 = vmatprep.subr.mxu0 %v5390_v49  ;;  %4827 = vmatprep.subr.mxu1 %v5390_v49 }
 0x16b   :  { %4801 = vmatpush3.msra.mxu0 %v2092_v62  ;;  %4802 = vmatprep.mubr.msk.f32.mxu0 %vm5391_vm0, %v5390_v49  ;;  %v4112_v37 = vpop.f32.mrf.mxu1  ;;  %v7038_v63 = vsub.f32 %v2549_v6, %v7020_v41  ;;  %v2669_v62 = vsub.f32 %v7035_v54, %v2668_v13 }
 0x16c   :  { %4828 = vmatpush3.msra.mxu1 %v6724_v21  ;;  %4803 = vmatmul.mubr.f32.vlgmr.msra.gmra.mxu0 %v6729_v16  ;;  %v4113_v27 = vadd.f32 %v4112_v37, %v4111_v45  ;;  %v2546_v21 = vld [vmem:[#allocation7 + $0x48] sm:$0xff]  ;;  %v7107_v45 = vand.u32 4294901760, %v2543_v19 }
 0x16d   :  { %4829 = vmatprep.subr.mxu1 %v5390_v49  ;;  %4837 = vmatprep.mubr.msk.f32.mxu1 %vm5391_vm0, %v5390_v49  ;;  %v2670_v44 = vand.u32 4294901760, %v2669_v62 }
 0x16e   :  { %4830 = vmatpush3.msra.mxu1 %v6741_v43  ;;  %4840 = vmatprep.subr.mxu0 %v5390_v49  ;;  %v1028_v25 = vadd.f32 %v4113_v27, %v924_v0  ;;  %v7032_v43 = vand.u32 4294901760, %v2546_v21  ;;  %v7105_v0 = vsub.f32 %v2544_v2, %v7099_v24  ;;  %v7115_v5 = vsub.f32 %v2543_v19, %v7107_v45 }
 0x16f   :  { %4831 = vmatprep.subr.mxu1 %v5390_v49  ;;  %4872 = vmatprep.mubr.msk.f32.mxu0 %vm5391_vm0, %v5390_v49 }
 0x170   :  { %4832 = vmatpush3.msra.mxu1 %v6753_v32  ;;  %4841 = vmatpush3.msra.mxu0 %v7010_v9  ;;  %v7041_v32 = vsub.f32 %v2548_v58, %v7022_v33  ;;  %v7055_v14 = vsub.f32 %v2546_v21, %v7032_v43  ;;  %v7894_v58 = vand.u32 4294901760, %v7115_v5 }
 0x171   :  { %4833 = vmatprep.subr.mxu1 %v5390_v49  ;;  %4842 = vmatprep.subr.mxu0 %v5390_v49 }
 0x172   :  { %4834 = vmatpush3.msra.mxu1 %v6768_v50  ;;  %4843 = vmatpush3.msra.mxu0 %v7015_v11  ;;  %v7051_v50 = vsub.f32 %v2547_v4, %v7030_v17  ;;  %v2682_v3 = vand.u32 4294901760, %v7041_v32  ;;  %v2696_v38 = vand.u32 4294901760, %v7055_v14 }
 0x173   :  { %4835 = vmatprep.subr.mxu1 %v5390_v49  ;;  %4844 = vmatprep.subr.mxu0 %v5390_v49 }
 0x174   :  { %4836 = vmatpush3.msra.mxu1 %v6780_v55  ;;  %4845 = vmatpush3.msra.mxu0 %v7018_v42  ;;  %v2675_v55 = vand.u32 4294901760, %v7038_v63  ;;  %v2689_v39 = vand.u32 4294901760, %v7051_v50  ;;  %v2683_v51 = vsub.f32 %v7041_v32, %v2682_v3  ;;  %v2697_v1 = vsub.f32 %v7055_v14, %v2696_v38 }
 0x175   :  { %4838 = vmatmul.mubr.f32.vlgmr.msra.gmra.mxu1 %v6729_v16  ;;  %4875 = vmatprep.subr.mxu1 %v5390_v49  ;;  %v2654_v16 = vand.u32 4294901760, %v7013_v48 }
 0x176   :  { %4907 = vmatprep.mubr.msk.f32.mxu1 %vm5391_vm0, %v5390_v49  ;;  %4846 = vmatprep.subr.mxu0 %v5390_v49  ;;  %v2676_v26 = vsub.f32 %v7038_v63, %v2675_v55  ;;  %v2690_v18 = vsub.f32 %v7051_v50, %v2689_v39  ;;  %v2684_v30 = vand.u32 4294901760, %v2683_v51  ;;  %v2698_v46 = vand.u32 4294901760, %v2697_v1 }
 0x177   :  { %v2655_v12 = vsub.f32 %v7013_v48, %v2654_v16  ;;  %4847 = vmatpush3.msra.mxu0 %v7020_v41 }
 0x178   :  { %4848 = vmatprep.subr.mxu0 %v5390_v49  ;;  %v2677_v57 = vand.u32 4294901760, %v2676_v26  ;;  %v2691_v20 = vand.u32 4294901760, %v2690_v18  ;;  %v2539_v26 = vld [vmem:[#allocation7 + $0x10] sm:$0xff]  ;;  %v2538_v18 = vld [vmem:[#allocation7 + $0x8] sm:$0xff] }
 0x179   :  { %v2656_v28 = vand.u32 4294901760, %v2655_v12  ;;  %4849 = vmatpush3.msra.mxu0 %v7022_v33 }
 0x17a   :  { %4850 = vmatprep.subr.mxu0 %v5390_v49 }
 0x17b   :  { %4876 = vmatpush3.msra.mxu1 %v2656_v28  ;;  %4851 = vmatpush3.msra.mxu0 %v7030_v17 }
 0x17c   :  { %4877 = vmatprep.subr.mxu1 %v5390_v49  ;;  %4852 = vmatprep.subr.mxu0 %v5390_v49 }
 0x17d   :  { %4878 = vmatpush3.msra.mxu1 %v2663_v36  ;;  %4853 = vmatpush3.msra.mxu0 %v7032_v43 }
 0x17e   :  { %4879 = vmatprep.subr.mxu1 %v5390_v49  ;;  %4854 = vmatprep.subr.mxu0 %v5390_v49 }
 0x17f   :  { %4880 = vmatpush3.msra.mxu1 %v2670_v44  ;;  %4855 = vmatpush3.msra.mxu0 %v7044_v40  ;;  %v7151_v44 = vsub.f32 %v2540_v10, %v7140_v8 }
 0x180   :  { %4881 = vmatprep.subr.mxu1 %v5390_v49  ;;  %4856 = vmatprep.subr.mxu0 %v5390_v49 }
 0x181   :  { %4882 = vmatpush3.msra.mxu1 %v2677_v57  ;;  %4857 = vmatpush3.msra.mxu0 %v7099_v24  ;;  %v7891_v1 = vand.u32 4294901760, %v7151_v44 }
 0x182   :  { %v4146_v60 = vpop.f32.mrf.mxu0  ;;  %4883 = vmatprep.subr.mxu1 %v5390_v49  ;;  %4858 = vmatprep.subr.mxu0 %v5390_v49 }
 0x183   :  { %4884 = vmatpush3.msra.mxu1 %v2684_v30  ;;  %4859 = vmatpush3.msra.mxu0 %v7107_v45 }
 0x184   :  { %v4147_v23 = vpop.f32.mrf.mxu0  ;;  %4885 = vmatprep.subr.mxu1 %v5390_v49  ;;  %4860 = vmatprep.subr.mxu0 %v5390_v49 }
 0x185   :  { %v4148_v34 = vadd.f32 %v4147_v23, %v4146_v60  ;;  %v2705_v60 = vand.u32 4294901760, %v2704_v61  ;;  %v2542_v23 = vld [vmem:[#allocation7 + $0x28] sm:$0xff]  ;;  %4886 = vmatpush3.msra.mxu1 %v2691_v20  ;;  %v7163_v61 = vand.u32 4294901760, %v2538_v18  ;;  %v2537_v20 = vld [vmem:[#allocation7] sm:$0xff] }
 0x186   :  { %v7117_v22 = vand.u32 4294901760, %v2542_v23  ;;  %4887 = vmatprep.subr.mxu1 %v5390_v49 }
 0x187   :  { %v7008_v31 = vadd.f32 %v4148_v34, %v1028_v25  ;;  %v7895_v34 = vand.u32 4294901760, %v7105_v0  ;;  %4888 = vmatpush3.msra.mxu1 %v2698_v46  ;;  %v7176_v46 = vsub.f32 %v2538_v18, %v7163_v61 }
 0x188   :  { %v7129_v4 = vsub.f32 %v2542_v23, %v7117_v22  ;;  %4861 = vmatpush3.msra.mxu0 %v7117_v22  ;;  %4889 = vmatprep.subr.mxu1 %v5390_v49 }
 0x189   :  { %v2711_v6 = vsub.f32 %v7105_v0, %v7895_v34  ;;  %4862 = vmatprep.subr.mxu0 %v5390_v49  ;;  %4890 = vmatpush3.msra.mxu1 %v2705_v60 }
 0x18a   :  { %v7893_v28 = vand.u32 4294901760, %v7129_v4  ;;  %4891 = vmatprep.subr.mxu1 %v5390_v49 }
 0x18b   :  { %v4181_v29 = vpop.f32.mrf.mxu1  ;;  %v2712_v12 = vand.u32 4294901760, %v2711_v6 }
 0x18c   :  { %v2725_v51 = vsub.f32 %v7129_v4, %v7893_v28 }
 0x18d   :  { %v4182_v56 = vpop.f32.mrf.mxu1  ;;  %4892 = vmatpush3.msra.mxu1 %v2712_v12 }
 0x18e   :  { %v4183_v52 = vadd.f32 %v4182_v56, %v4181_v29  ;;  %v2718_v29 = vsub.f32 %v7115_v5, %v7894_v58  ;;  %v7153_v56 = vand.u32 4294901760, %v2539_v26  ;;  %4893 = vmatprep.subr.mxu1 %v5390_v49  ;;  %v2726_v30 = vand.u32 4294901760, %v2725_v51 }
 0x190   :  { %v1372_v37 = vadd.f32 %v4183_v52, %v7008_v31  ;;  %v2541_v31 = vld [vmem:[#allocation7 + $0x20] sm:$0xff]  ;;  %v2719_v36 = vand.u32 4294901760, %v2718_v29  ;;  %v7161_v52 = vsub.f32 %v2539_v26, %v7153_v56 }
 0x191   :  { %v7133_v21 = vand.u32 4294901760, %v2541_v31 }
 0x192   :  { %4894 = vmatpush3.msra.mxu1 %v2719_v36  ;;  %v7890_v19 = vand.u32 4294901760, %v7161_v52 }
 0x193   :  { %v7144_v62 = vsub.f32 %v2541_v31, %v7133_v21  ;;  %4863 = vmatpush3.msra.mxu0 %v7133_v21  ;;  %4895 = vmatprep.subr.mxu1 %v5390_v49 }
 0x194   :  { %4864 = vmatprep.subr.mxu0 %v5390_v49  ;;  %4896 = vmatpush3.msra.mxu1 %v2726_v30  ;;  %v2746_v23 = vsub.f32 %v7161_v52, %v7890_v19 }
 0x195   :  { %v7892_v57 = vand.u32 4294901760, %v7144_v62  ;;  %4865 = vmatpush3.msra.mxu0 %v7140_v8  ;;  %4897 = vmatprep.subr.mxu1 %v5390_v49 }
 0x196   :  { %4866 = vmatprep.subr.mxu0 %v5390_v49  ;;  %v2747_v6 = vand.u32 4294901760, %v2746_v23 }
 0x197   :  { %v2732_v2 = vsub.f32 %v7144_v62, %v7892_v57  ;;  %4867 = vmatpush3.msra.mxu0 %v7153_v56 }
 0x198   :  { %4868 = vmatprep.subr.mxu0 %v5390_v49 }
 0x199   :  { %4869 = vmatpush3.msra.mxu0 %v7163_v61 }
 0x19a   :  { %4870 = vmatprep.subr.mxu0 %v5390_v49 }
 0x1a4   :  { %v4216_v35 = vpop.f32.mrf.mxu0 }
 0x1a6   :  { %v4217_v27 = vpop.f32.mrf.mxu0 }
 0x1a7   :  { %v4218_v25 = vadd.f32 %v4217_v27, %v4216_v35  ;;  %v2739_v35 = vsub.f32 %v7151_v44, %v7891_v1  ;;  %v2733_v27 = vand.u32 4294901760, %v2732_v2 }
 0x1a9   :  { %v7122_v15 = vadd.f32 %v4218_v25, %v1372_v37  ;;  %v7178_v37 = vand.u32 4294901760, %v2537_v20  ;;  %v2740_v60 = vand.u32 4294901760, %v2739_v35  ;;  %v7889_v25 = vand.u32 4294901760, %v7176_v46  ;;  %4898 = vmatpush3.msra.mxu1 %v2733_v27 }
 0x1aa   :  { %4899 = vmatprep.subr.mxu1 %v5390_v49 }
 0x1ab   :  { %v7188_v31 = vsub.f32 %v2537_v20, %v7178_v37  ;;  %4871 = vmatpush3.msra.mxu0 %v7178_v37  ;;  %v2753_v10 = vsub.f32 %v7176_v46, %v7889_v25  ;;  %4900 = vmatpush3.msra.mxu1 %v2740_v60 }
 0x1ac   :  { %4910 = vmatprep.subr.mxu0 %v5390_v49  ;;  %4901 = vmatprep.subr.mxu1 %v5390_v49 }
 0x1ad   :  { %v7888_v12 = vand.u32 4294901760, %v7188_v31  ;;  %v2754_v29 = vand.u32 4294901760, %v2753_v10  ;;  %4902 = vmatpush3.msra.mxu1 %v2747_v6  ;;  %v4251_v51 = vpop.f32.mrf.mxu1 }
 0x1ae   :  { %4903 = vmatprep.subr.mxu1 %v5390_v49 }
 0x1af   :  { %v2760_v26 = vsub.f32 %v7188_v31, %v7888_v12  ;;  %4904 = vmatpush3.msra.mxu1 %v2754_v29  ;;  %v4252_v18 = vpop.f32.mrf.mxu1 }
 0x1b0   :  { %4905 = vmatprep.subr.mxu1 %v5390_v49  ;;  %v4253_v30 = vadd.f32 %v4252_v18, %v4251_v51 }
 0x1b1   :  { %v2761_v36 = vand.u32 4294901760, %v2760_v26 }
 0x1b2   :  { %v1618_v35 = vadd.f32 %v4253_v30, %v7122_v15 }
 0x1b3   :  { %4906 = vmatpush3.msra.mxu1 %v2761_v36 }
 0x1b4   :  { %4945 = vmatprep.subr.mxu1 %v5390_v49 }
 0x1c6   :  { %v4286_v2 = vpop.f32.mrf.mxu0 }
 0x1c8   :  { %v4287_v20 = vpop.f32.mrf.mxu0 }
 0x1c9   :  { %v4288_v27 = vadd.f32 %v4287_v20, %v4286_v2 }
 0x1cb   :  { %v1786_v60 = vadd.f32 %v4288_v27, %v1618_v35 }
 0x1cf   :  { %v4321_v23 = vpop.f32.mrf.mxu1 }
 0x1d1   :  { %v4322_v6 = vpop.f32.mrf.mxu1 }
 0x1d2   :  { %v4323_v10 = vadd.f32 %v4322_v6, %v4321_v23 }
 0x1d4   :  { %v1890_v12 = vadd.f32 %v4323_v10, %v1786_v60 }
 0x1e8   :  { %v1980_v26 = vpop.f32.mrf.mxu0 }
 0x1e9   :  { %v1981_v29 = vadd.f32 %v1980_v26, %v1890_v12 }
 0x1ea   :  { %v4664_v25 = vpop.f32.mrf.mxu0 }
 0x1f1   :  { %v2131_v19 = vpop.f32.mrf.mxu1 }
 0x1f2   :  { %v2132_v18 = vadd.f32 %v2131_v19, %v1981_v29 }
 0x1f3   :  { %v4699_v36 = vpop.f32.mrf.mxu1 }
 0x20a   :  { %v2235_v1 = vpop.f32.mrf.mxu0 }
 0x20b   :  { %v2236_v59 = vadd.f32 %v2235_v1, %v2132_v18  ;;  %v3239_v1 = vld [vmem:[#allocation8 + $0x60] sm:$0xff] }
 0x20c   :  { %v4734_v57 = vpop.f32.mrf.mxu0 }
 0x213   :  { %v2324_v28 = vpop.f32.mrf.mxu1 }
 0x214   :  { %v2325_v15 = vadd.f32 %v2324_v28, %v2236_v59  ;;  %v3242_v28 = vld [vmem:[#allocation8 + $0x78] sm:$0xff] }
 0x215   :  { %v4769_v58 = vpop.f32.mrf.mxu1 }
 0x22c   :  { %v2443_v51 = vpop.f32.mrf.mxu0 }
 0x22d   :  { %v2444_v30 = vadd.f32 %v2443_v51, %v2325_v15 }
 0x22e   :  { %v4804_v34 = vpop.f32.mrf.mxu0 }
 0x235   :  { %v2530_v2 = vpop.f32.mrf.mxu1 }
 0x236   :  { %v2531_v20 = vadd.f32 %v2530_v2, %v2444_v30 }
 0x237   :  { %v4839_v35 = vpop.f32.mrf.mxu1 }
 0x238   :  { %vm2534_vm1 = vcmp.gt.f32.partialorder %v2531_v20, 0.0  ;;  %v2535_v27 = vmul.f32 0.01, %v2531_v20 }
 0x23a   :  { %v2536_v60 = vsel %vm2534_vm1, %v2531_v20, %v2535_v27  ;;  %v3238_v27 = vld [vmem:[#allocation8 + $0x58] sm:$0xff] }
 0x23b   :  { %v7206_v12 = vand.u32 4294901760, %v2536_v60 }
 0x23d   :  { %v7209_v25 = vsub.f32 %v2536_v60, %v7206_v12  ;;  %4908 = vmatmul.mubr.f32.vlgmr.msra.gmra.mxu1 %v7206_v12 }
 0x23e   :  { %4946 = vmatpush3.msra.mxu1 %v7010_v9  ;;  %4977 = vmatprep.mubr.msk.f32.mxu1 %vm5391_vm0, %v5390_v49 }
 0x23f   :  { %4947 = vmatprep.subr.mxu1 %v5390_v49  ;;  %v2643_v59 = vand.u32 4294901760, %v7209_v25 }
 0x240   :  { %4948 = vmatpush3.msra.mxu1 %v7015_v11 }
 0x241   :  { %4949 = vmatprep.subr.mxu1 %v5390_v49  ;;  %v2644_v34 = vsub.f32 %v7209_v25, %v2643_v59 }
 0x242   :  { %4950 = vmatpush3.msra.mxu1 %v7018_v42 }
 0x243   :  { %4951 = vmatprep.subr.mxu1 %v5390_v49  ;;  %v2645_v58 = vand.u32 4294901760, %v2644_v34 }
 0x244   :  { %4952 = vmatpush3.msra.mxu1 %v7020_v41 }
 0x245   :  { %4953 = vmatprep.subr.mxu1 %v5390_v49  ;;  %4873 = vmatmul.mubr.f32.vlgmr.msra.gmra.mxu0 %v2645_v58 }
 0x246   :  { %4911 = vmatpush3.msra.mxu0 %v7013_v48  ;;  %4954 = vmatpush3.msra.mxu1 %v7022_v33  ;;  %v8111_v48 = vand.u32 4294901760, %v7105_v0 }
 0x247   :  { %4912 = vmatprep.subr.mxu0 %v5390_v49  ;;  %4955 = vmatprep.subr.mxu1 %v5390_v49 }
 0x248   :  { %4913 = vmatpush3.msra.mxu0 %v7027_v7  ;;  %4956 = vmatpush3.msra.mxu1 %v7030_v17  ;;  %v8117_v7 = vand.u32 4294901760, %v7176_v46 }
 0x249   :  { %4914 = vmatprep.subr.mxu0 %v5390_v49  ;;  %4957 = vmatprep.subr.mxu1 %v5390_v49 }
 0x24a   :  { %4915 = vmatpush3.msra.mxu0 %v7035_v54  ;;  %4958 = vmatpush3.msra.mxu1 %v7032_v43 }
 0x24b   :  { %4916 = vmatprep.subr.mxu0 %v5390_v49  ;;  %4959 = vmatprep.subr.mxu1 %v5390_v49 }
 0x24c   :  { %4917 = vmatpush3.msra.mxu0 %v7038_v63  ;;  %4960 = vmatpush3.msra.mxu1 %v7044_v40 }
 0x24d   :  { %4918 = vmatprep.subr.mxu0 %v5390_v49  ;;  %4961 = vmatprep.subr.mxu1 %v5390_v49 }
 0x24e   :  { %4919 = vmatpush3.msra.mxu0 %v7041_v32  ;;  %4962 = vmatpush3.msra.mxu1 %v7099_v24 }
 0x24f   :  { %4920 = vmatprep.subr.mxu0 %v5390_v49  ;;  %4963 = vmatprep.subr.mxu1 %v5390_v49 }
 0x250   :  { %4921 = vmatpush3.msra.mxu0 %v7051_v50  ;;  %4964 = vmatpush3.msra.mxu1 %v7107_v45 }
 0x251   :  { %4922 = vmatprep.subr.mxu0 %v5390_v49  ;;  %4965 = vmatprep.subr.mxu1 %v5390_v49 }
 0x252   :  { %4923 = vmatpush3.msra.mxu0 %v7055_v14  ;;  %4966 = vmatpush3.msra.mxu1 %v7117_v22 }
 0x253   :  { %4924 = vmatprep.subr.mxu0 %v5390_v49  ;;  %4967 = vmatprep.subr.mxu1 %v5390_v49 }
 0x254   :  { %4925 = vmatpush3.msra.mxu0 %v7062_v53  ;;  %4968 = vmatpush3.msra.mxu1 %v7133_v21 }
 0x255   :  { %4926 = vmatprep.subr.mxu0 %v5390_v49  ;;  %4969 = vmatprep.subr.mxu1 %v5390_v49 }
 0x256   :  { %4927 = vmatpush3.msra.mxu0 %v7105_v0  ;;  %4970 = vmatpush3.msra.mxu1 %v7140_v8 }
 0x257   :  { %4928 = vmatprep.subr.mxu0 %v5390_v49  ;;  %4971 = vmatprep.subr.mxu1 %v5390_v49 }
 0x258   :  { %4929 = vmatpush3.msra.mxu0 %v7115_v5  ;;  %4972 = vmatpush3.msra.mxu1 %v7153_v56 }
 0x259   :  { %4930 = vmatprep.subr.mxu0 %v5390_v49  ;;  %4973 = vmatprep.subr.mxu1 %v5390_v49 }
 0x25a   :  { %4931 = vmatpush3.msra.mxu0 %v7129_v4  ;;  %4974 = vmatpush3.msra.mxu1 %v7163_v61 }
 0x25b   :  { %4932 = vmatprep.subr.mxu0 %v5390_v49  ;;  %4975 = vmatprep.subr.mxu1 %v5390_v49 }
 0x25c   :  { %4933 = vmatpush3.msra.mxu0 %v7144_v62  ;;  %4976 = vmatpush3.msra.mxu1 %v7178_v37 }
 0x25d   :  { %4934 = vmatprep.subr.mxu0 %v5390_v49  ;;  %4978 = vmatmul.mubr.f32.vlgmr.msra.gmra.mxu1 %v2643_v59  ;;  %v3237_v59 = vld [vmem:[#allocation8 + $0x50] sm:$0xff] }
 0x25e   :  { %5015 = vmatprep.subr.mxu1 %v5390_v49  ;;  %4935 = vmatpush3.msra.mxu0 %v7151_v44 }
 0x25f   :  { %5016 = vmatpush3.msra.mxu1 %v7010_v9  ;;  %4936 = vmatprep.subr.mxu0 %v5390_v49  ;;  %v8110_v9 = vand.u32 4294901760, %v7062_v53 }
 0x260   :  { %5017 = vmatprep.subr.mxu1 %v5390_v49  ;;  %4937 = vmatpush3.msra.mxu0 %v7161_v52 }
 0x261   :  { %5018 = vmatpush3.msra.mxu1 %v7015_v11  ;;  %4938 = vmatprep.subr.mxu0 %v5390_v49  ;;  %v8112_v11 = vand.u32 4294901760, %v7115_v5 }
 0x262   :  { %5019 = vmatprep.subr.mxu1 %v5390_v49  ;;  %4939 = vmatpush3.msra.mxu0 %v7176_v46 }
 0x263   :  { %5020 = vmatpush3.msra.mxu1 %v7018_v42  ;;  %4940 = vmatprep.subr.mxu0 %v5390_v49  ;;  %v8113_v42 = vand.u32 4294901760, %v7129_v4 }
 0x264   :  { %5021 = vmatprep.subr.mxu1 %v5390_v49  ;;  %4941 = vmatpush3.msra.mxu0 %v7188_v31 }
 0x265   :  { %4942 = vmatprep.mubr.msk.f32.mxu0 %vm5391_vm0, %v5390_v49  ;;  %5022 = vmatpush3.msra.mxu1 %v7020_v41  ;;  %v8114_v41 = vand.u32 4294901760, %v7144_v62  ;;  %v3240_v62 = vld [vmem:[#allocation8 + $0x68] sm:$0xff] }
 0x266   :  { %4943 = vmatmul.mubr.f32.vlgmr.msra.gmra.mxu0 %v7209_v25  ;;  %4980 = vmatprep.subr.mxu0 %v5390_v49  ;;  %v7388_v57 = vand.u32 4294901760, %v3240_v62 }
 0x267   :  { %5023 = vmatprep.subr.mxu1 %v5390_v49  ;;  %4981 = vmatpush3.msra.mxu0 %v2654_v16  ;;  %v8116_v16 = vand.u32 4294901760, %v7161_v52  ;;  %v7390_v52 = vand.u32 4294901760, %v3239_v1 }
 0x268   :  { %5024 = vmatpush3.msra.mxu1 %v7022_v33  ;;  %4982 = vmatprep.subr.mxu0 %v5390_v49  ;;  %v8115_v33 = vand.u32 4294901760, %v7151_v44  ;;  %v7384_v44 = vand.u32 4294901760, %v3242_v28  ;;  %v7399_v46 = vsub.f32 %v3240_v62, %v7388_v57 }
 0x269   :  { %5025 = vmatprep.subr.mxu1 %v5390_v49  ;;  %4983 = vmatpush3.msra.mxu0 %v2661_v47 }
 0x26a   :  { %5026 = vmatpush3.msra.mxu1 %v7030_v17  ;;  %4984 = vmatprep.subr.mxu0 %v5390_v49  ;;  %v8118_v17 = vand.u32 4294901760, %v7188_v31  ;;  %v3351_v6 = vand.u32 4294901760, %v7399_v46 }
 0x26b   :  { %5027 = vmatprep.subr.mxu1 %v5390_v49  ;;  %4985 = vmatpush3.msra.mxu0 %v2668_v13  ;;  %v3903_v13 = vld [vmem:[%s7749_s4] ss:$0 sm:$0xff]  ;;  %s5394_s4 = smov 64  }
 0x26c   :  { %5028 = vmatpush3.msra.mxu1 %v7032_v43  ;;  %4986 = vmatprep.subr.mxu0 %v5390_v49  ;;  %v3352_v36 = vsub.f32 %v7399_v46, %v3351_v6 }
 0x26d   :  { %5029 = vmatprep.subr.mxu1 %v5390_v49  ;;  %4987 = vmatpush3.msra.mxu0 %v2675_v55 }
 0x26e   :  { %5030 = vmatpush3.msra.mxu1 %v7044_v40  ;;  %4988 = vmatprep.subr.mxu0 %v5390_v49  ;;  %v3353_v30 = vand.u32 4294901760, %v3352_v36 }
 0x26f   :  { %5031 = vmatprep.subr.mxu1 %v5390_v49  ;;  %4989 = vmatpush3.msra.mxu0 %v2682_v3 }
 0x270   :  { %5032 = vmatpush3.msra.mxu1 %v7099_v24  ;;  %4990 = vmatprep.subr.mxu0 %v5390_v49 }
 0x271   :  { %5033 = vmatprep.subr.mxu1 %v5390_v49  ;;  %4991 = vmatpush3.msra.mxu0 %v2689_v39 }
 0x272   :  { %5034 = vmatpush3.msra.mxu1 %v7107_v45  ;;  %4992 = vmatprep.subr.mxu0 %v5390_v49 }
 0x273   :  { %5035 = vmatprep.subr.mxu1 %v5390_v49  ;;  %4993 = vmatpush3.msra.mxu0 %v2696_v38 }
 0x274   :  { %5036 = vmatpush3.msra.mxu1 %v7117_v22  ;;  %4994 = vmatprep.subr.mxu0 %v5390_v49 }
 0x275   :  { %5037 = vmatprep.subr.mxu1 %v5390_v49  ;;  %4995 = vmatpush3.msra.mxu0 %v8110_v9  ;;  %v7438_v9 = vand.u32 4294901760, %v3237_v59 }
 0x276   :  { %5038 = vmatpush3.msra.mxu1 %v7133_v21  ;;  %4996 = vmatprep.subr.mxu0 %v5390_v49 }
 0x277   :  { %5039 = vmatprep.subr.mxu1 %v5390_v49  ;;  %4997 = vmatpush3.msra.mxu0 %v8111_v48 }
 0x278   :  { %5040 = vmatpush3.msra.mxu1 %v7140_v8  ;;  %4998 = vmatprep.subr.mxu0 %v5390_v49  ;;  %v3241_v8 = vld [vmem:[#allocation8 + $0x70] sm:$0xff] }
 0x279   :  { %5041 = vmatprep.subr.mxu1 %v5390_v49  ;;  %4999 = vmatpush3.msra.mxu0 %v8112_v11  ;;  %v3236_v11 = vld [vmem:[#allocation8 + $0x48] sm:$0xff] }
 0x27a   :  { %5042 = vmatpush3.msra.mxu1 %v7153_v56  ;;  %5000 = vmatprep.subr.mxu0 %v5390_v49  ;;  %v7386_v56 = vand.u32 4294901760, %v3241_v8 }
 0x27b   :  { %5043 = vmatprep.subr.mxu1 %v5390_v49  ;;  %5001 = vmatpush3.msra.mxu0 %v8113_v42 }
 0x27c   :  { %5044 = vmatpush3.msra.mxu1 %v7163_v61  ;;  %5002 = vmatprep.subr.mxu0 %v5390_v49  ;;  %v7393_v61 = vsub.f32 %v3242_v28, %v7384_v44  ;;  %v7396_v19 = vsub.f32 %v3241_v8, %v7386_v56  ;;  %v3231_v8 = vld [vmem:[#allocation8 + $0x20] sm:$0xff] }
 0x27d   :  { %5045 = vmatprep.subr.mxu1 %v5390_v49  ;;  %5003 = vmatpush3.msra.mxu0 %v8114_v41  ;;  %v7444_v41 = vsub.f32 %v3237_v59, %v7438_v9 }
 0x27e   :  { %5046 = vmatpush3.msra.mxu1 %v7178_v37  ;;  %5047 = vmatprep.mubr.msk.f32.mxu1 %vm5391_vm0, %v5390_v49  ;;  %v7403_v37 = vsub.f32 %v3239_v1, %v7390_v52  ;;  %v3337_v31 = vand.u32 4294901760, %v7393_v61  ;;  %v3344_v23 = vand.u32 4294901760, %v7396_v19 }
 0x27f   :  { %5004 = vmatprep.subr.mxu0 %v5390_v49  ;;  %5048 = vmatmul.mubr.f32.vlgmr.msra.gmra.mxu1 %v7206_v12 }
 0x280   :  { %5005 = vmatpush3.msra.mxu0 %v8115_v33  ;;  %5012 = vmatprep.mubr.msk.f32.mxu0 %vm5391_vm0, %v5390_v49  ;;  %v3358_v10 = vand.u32 4294901760, %v7403_v37  ;;  %v3338_v26 = vsub.f32 %v7393_v61, %v3337_v31  ;;  %v3345_v29 = vsub.f32 %v7396_v19, %v3344_v23  ;;  %v7446_v33 = vand.u32 4294901760, %v3236_v11 }
 0x281   :  { %5006 = vmatprep.subr.mxu0 %v5390_v49  ;;  %5085 = vmatprep.subr.mxu1 %v5390_v49 }
 0x282   :  { %5007 = vmatpush3.msra.mxu0 %v8116_v16  ;;  %5117 = vmatprep.mubr.msk.f32.mxu1 %vm5391_vm0, %v5390_v49  ;;  %v3339_v51 = vand.u32 4294901760, %v3338_v26  ;;  %v3346_v18 = vand.u32 4294901760, %v3345_v29  ;;  %v3359_v15 = vsub.f32 %v7403_v37, %v3358_v10  ;;  %v7500_v29 = vand.u32 4294901760, %v3231_v8 }
 0x283   :  { %5008 = vmatprep.subr.mxu0 %v5390_v49 }
 0x284   :  { %5009 = vmatpush3.msra.mxu0 %v8117_v7  ;;  %5086 = vmatpush3.msra.mxu1 %v3339_v51  ;;  %v3360_v2 = vand.u32 4294901760, %v3359_v15  ;;  %v3235_v7 = vld [vmem:[#allocation8 + $0x40] sm:$0xff]  ;;  %v3230_v51 = vld [vmem:[#allocation8 + $0x18] sm:$0xff] }
 0x285   :  { %5010 = vmatprep.subr.mxu0 %v5390_v49  ;;  %5087 = vmatprep.subr.mxu1 %v5390_v49 }
 0x286   :  { %5011 = vmatpush3.msra.mxu0 %v8118_v17  ;;  %5088 = vmatpush3.msra.mxu1 %v3346_v18 }
 0x287   :  { %5013 = vmatmul.mubr.f32.vlgmr.msra.gmra.mxu0 %v7206_v12  ;;  %5050 = vmatprep.subr.mxu0 %v5390_v49  ;;  %v7433_v12 = vand.u32 4294901760, %v3238_v27 }
 0x288   :  { %5082 = vmatprep.mubr.msk.f32.mxu0 %vm5391_vm0, %v5390_v49  ;;  %5051 = vmatpush3.msra.mxu0 %v7384_v44 }
 0x289   :  { %5052 = vmatprep.subr.mxu0 %v5390_v49  ;;  %5089 = vmatprep.subr.mxu1 %v5390_v49  ;;  %v7436_v58 = vsub.f32 %v3238_v27, %v7433_v12  ;;  %v3227_v27 = vld [vmem:[#allocation8] sm:$0xff] }
 0x28a   :  { %5053 = vmatpush3.msra.mxu0 %v7386_v56  ;;  %5090 = vmatpush3.msra.mxu1 %v3353_v30  ;;  %v7513_v30 = vsub.f32 %v3231_v8, %v7500_v29 }
 0x28b   :  { %5054 = vmatprep.subr.mxu0 %v5390_v49  ;;  %5091 = vmatprep.subr.mxu1 %v5390_v49  ;;  %v3365_v42 = vand.u32 4294901760, %v7436_v58 }
 0x28c   :  { %5055 = vmatpush3.msra.mxu0 %v7388_v57  ;;  %5092 = vmatpush3.msra.mxu1 %v3360_v2  ;;  %v7515_v2 = vand.u32 4294901760, %v3230_v51 }
 0x28d   :  { %5056 = vmatprep.subr.mxu0 %v5390_v49  ;;  %5093 = vmatprep.subr.mxu1 %v5390_v49  ;;  %v3366_v17 = vsub.f32 %v7436_v58, %v3365_v42 }
 0x28e   :  { %5057 = vmatpush3.msra.mxu0 %v7390_v52 }
 0x28f   :  { %5058 = vmatprep.subr.mxu0 %v5390_v49 }
 0x290   :  { %5059 = vmatpush3.msra.mxu0 %v7433_v12 }
 0x291   :  { %5060 = vmatprep.subr.mxu0 %v5390_v49 }
 0x292   :  { %5061 = vmatpush3.msra.mxu0 %v7438_v9 }
 0x293   :  { %5062 = vmatprep.subr.mxu0 %v5390_v49 }
 0x294   :  { %5063 = vmatpush3.msra.mxu0 %v7446_v33 }
 0x295   :  { %5064 = vmatprep.subr.mxu0 %v5390_v49 }
 0x2fd   :  { %v2798_v43 = vpop.f32.mrf.mxu1 }
 0x2ff   :  { %v4909_v54 = vpop.f32.mrf.mxu1 }
 0x300   :  { %v7456_v54 = vsub.f32 %v3236_v11, %v7446_v33 }
 0x305   :  { %v2647_v63 = vpop.f32.mrf.mxu0 }
 0x306   :  { %v2648_v55 = vadd.f32 %v3903_v13, %v2647_v63  ;;  %v7458_v63 = vand.u32 4294901760, %v3235_v7 }
 0x307   :  { %v4874_v32 = vpop.f32.mrf.mxu0 }
 0x308   :  { %v2799_v53 = vadd.f32 %v2798_v43, %v2648_v55  ;;  %v3372_v43 = vand.u32 4294901760, %v7444_v41  ;;  %v7467_v13 = vsub.f32 %v3235_v7, %v7458_v63  ;;  %5065 = vmatpush3.msra.mxu0 %v7458_v63  ;;  %v7531_v7 = vsub.f32 %v3230_v51, %v7515_v2 }
 0x309   :  { %5066 = vmatprep.subr.mxu0 %v5390_v49 }
 0x31d   :  { %v2991_v40 = vpop.f32.mrf.mxu1 }
 0x31f   :  { %v4979_v47 = vpop.f32.mrf.mxu1 }
 0x320   :  { %v3367_v47 = vand.u32 4294901760, %v3366_v17 }
 0x322   :  { %5094 = vmatpush3.msra.mxu1 %v3367_v47 }
 0x323   :  { %5095 = vmatprep.subr.mxu1 %v5390_v49 }
 0x326   :  { %v2902_v50 = vpop.f32.mrf.mxu0 }
 0x327   :  { %v2903_v38 = vadd.f32 %v2902_v50, %v2799_v53  ;;  %v3373_v50 = vsub.f32 %v7444_v41, %v3372_v43 }
 0x328   :  { %v4944_v14 = vpop.f32.mrf.mxu0 }
 0x329   :  { %v2992_v24 = vadd.f32 %v2991_v40, %v2903_v38  ;;  %v3234_v40 = vld [vmem:[#allocation8 + $0x38] sm:$0xff]  ;;  %v3379_v14 = vand.u32 4294901760, %v7456_v54  ;;  %v3374_v53 = vand.u32 4294901760, %v3373_v50  ;;  %v3386_v38 = vand.u32 4294901760, %v7467_v13 }
 0x32a   :  { %v7470_v55 = vand.u32 4294901760, %v3234_v40 }
 0x32b   :  { %5096 = vmatpush3.msra.mxu1 %v3374_v53 }
 0x32c   :  { %5067 = vmatpush3.msra.mxu0 %v7470_v55  ;;  %5097 = vmatprep.subr.mxu1 %v5390_v49 }
 0x32d   :  { %5068 = vmatprep.subr.mxu0 %v5390_v49 }
 0x33f   :  { %v3197_v3 = vpop.f32.mrf.mxu1 }
 0x341   :  { %v5049_v39 = vpop.f32.mrf.mxu1 }
 0x342   :  { %v3380_v39 = vsub.f32 %v7456_v54, %v3379_v14 }
 0x347   :  { %v3110_v0 = vpop.f32.mrf.mxu0 }
 0x348   :  { %v3111_v45 = vadd.f32 %v3110_v0, %v2992_v24  ;;  %v7481_v0 = vsub.f32 %v3234_v40, %v7470_v55 }
 0x349   :  { %v5014_v5 = vpop.f32.mrf.mxu0 }
 0x34a   :  { %v3198_v22 = vadd.f32 %v3197_v3, %v3111_v45  ;;  %v3233_v3 = vld [vmem:[#allocation8 + $0x30] sm:$0xff]  ;;  %v3232_v45 = vld [vmem:[#allocation8 + $0x28] sm:$0xff]  ;;  %v3381_v5 = vand.u32 4294901760, %v3380_v39  ;;  %v3393_v28 = vand.u32 4294901760, %v7481_v0 }
 0x34b   :  { %v7477_v24 = vand.u32 4294901760, %v3233_v3 }
 0x34c   :  { %vm3201_vm2 = vcmp.gt.f32.partialorder %v3198_v22, 0.0  ;;  %v3202_v4 = vmul.f32 0.01, %v3198_v22  ;;  %5098 = vmatpush3.msra.mxu1 %v3381_v5  ;;  %v3394_v36 = vsub.f32 %v7481_v0, %v3393_v28 }
 0x34d   :  { %5069 = vmatpush3.msra.mxu0 %v7477_v24  ;;  %5099 = vmatprep.subr.mxu1 %v5390_v49 }
 0x34e   :  { %v7376_v21 = vsel %vm3201_vm2, %v3198_v22, %v3202_v4  ;;  %v3387_v22 = vsub.f32 %v7467_v13, %v3386_v38  ;;  %v7488_v4 = vsub.f32 %v3233_v3, %v7477_v24  ;;  %5070 = vmatprep.subr.mxu0 %v5390_v49  ;;  %v3421_v3 = vand.u32 4294901760, %v7531_v7 }
 0x34f   :  { %3210 = vrot.lane.b32.xlu1 %v7376_v21, %s5392_s18  ;;  %3204 = vrot.lane.b32.xlu0 %v7376_v21, %s5393_s19 }
 0x350   :  { %v3388_v62 = vand.u32 4294901760, %v3387_v22  ;;  %v3400_v1 = vand.u32 4294901760, %v7488_v4  ;;  %v3422_v22 = vsub.f32 %v7531_v7, %v3421_v3 }
 0x352   :  { %5100 = vmatpush3.msra.mxu1 %v3388_v62  ;;  %v3401_v18 = vsub.f32 %v7488_v4, %v3400_v1 }
 0x353   :  { %3207 = vrot.lane.b32.xlu0 %v7376_v21, %s5394_s4  ;;  %5101 = vmatprep.subr.mxu1 %v5390_v49 }
 0x3c1   :  { %v3205_v20 = vpop.permute.xlu0 %3204  ;;  %v3211_v34 = vpop.permute.xlu1 %3210 }
 0x3c2   :  { %v3206_v35 = vmax.f32 %v7376_v21, %v3205_v20  ;;  %v3229_v20 = vld [vmem:[#allocation8 + $0x10] sm:$0xff] }
 0x3c5   :  { %v3208_v60 = vpop.permute.xlu0 %3207 }
 0x3c6   :  { %v3209_v25 = vmax.f32 %v3206_v35, %v3208_v60  ;;  %v3228_v35 = vld [vmem:[#allocation8 + $0x8] sm:$0xff]  ;;  %v3395_v60 = vand.u32 4294901760, %v3394_v36  ;;  %v3423_v36 = vand.u32 4294901760, %v3422_v22 }
 0x3c7   :  { %v7521_v59 = vand.u32 4294901760, %v3228_v35 }
 0x3c8   :  { %v3212_v48 = vmax.f32 %v3209_v25, %v3211_v34  ;;  %v7519_v25 = vand.u32 4294901760, %v3229_v20  ;;  %v7524_v34 = vand.u32 4294901760, %v3227_v27  ;;  %5102 = vmatpush3.msra.mxu1 %v3395_v60 }
 0x3c9   :  { %5103 = vmatprep.subr.mxu1 %v5390_v49 }
 0x3ca   :  { %v3213_v16 = vsub.f32 %v7376_v21, %v3212_v48  ;;  %v7490_v21 = vand.u32 4294901760, %v3232_v45  ;;  %v3402_v48 = vand.u32 4294901760, %v3401_v18  ;;  %v7535_v17 = vsub.f32 %v3229_v20, %v7519_v25 }
 0x3cb   :  { %v7541_v40 = vsub.f32 %v3227_v27, %v7524_v34 }
 0x3cc   :  { %v3214_v32 = vmul.f32 1.442695, %v3213_v16  ;;  %v7498_v26 = vsub.f32 %v3232_v45, %v7490_v21  ;;  %5071 = vmatpush3.msra.mxu0 %v7490_v21  ;;  %v3414_v16 = vand.u32 4294901760, %v7513_v30  ;;  %5104 = vmatpush3.msra.mxu1 %v3402_v48  ;;  %v3428_v53 = vand.u32 4294901760, %v7535_v17 }
 0x3cd   :  { %5072 = vmatprep.subr.mxu0 %v5390_v49  ;;  %5105 = vmatprep.subr.mxu1 %v5390_v49  ;;  %v3442_v8 = vand.u32 4294901760, %v7541_v40 }
 0x3ce   :  { %5272 = vpow2.f32 %v3214_v32  ;;  %v3407_v15 = vand.u32 4294901760, %v7498_v26  ;;  %5073 = vmatpush3.msra.mxu0 %v7500_v29  ;;  %v7538_v32 = vsub.f32 %v3228_v35, %v7521_v59  ;;  %v3415_v50 = vsub.f32 %v7513_v30, %v3414_v16 }
 0x3cf   :  { %5074 = vmatprep.subr.mxu0 %v5390_v49  ;;  %v3429_v62 = vsub.f32 %v7535_v17, %v3428_v53  ;;  %v3443_v20 = vsub.f32 %v7541_v40, %v3442_v8 }
 0x3d0   :  { %v3408_v11 = vsub.f32 %v7498_v26, %v3407_v15  ;;  %5075 = vmatpush3.msra.mxu0 %v7515_v2  ;;  %v3435_v39 = vand.u32 4294901760, %v7538_v32  ;;  %v3416_v5 = vand.u32 4294901760, %v3415_v50 }
 0x3d1   :  { %5076 = vmatprep.subr.mxu0 %v5390_v49  ;;  %v3430_v18 = vand.u32 4294901760, %v3429_v62  ;;  %v3444_v27 = vand.u32 4294901760, %v3443_v20 }
 0x3d2   :  { %v3409_v47 = vand.u32 4294901760, %v3408_v11  ;;  %5077 = vmatpush3.msra.mxu0 %v7519_v25  ;;  %v3436_v51 = vsub.f32 %v7538_v32, %v3435_v39 }
 0x3d3   :  { %5078 = vmatprep.subr.mxu0 %v5390_v49 }
 0x3d4   :  { %5106 = vmatpush3.msra.mxu1 %v3409_v47  ;;  %5079 = vmatpush3.msra.mxu0 %v7521_v59  ;;  %v3437_v35 = vand.u32 4294901760, %v3436_v51 }
 0x3d5   :  { %5107 = vmatprep.subr.mxu1 %v5390_v49  ;;  %5080 = vmatprep.subr.mxu0 %v5390_v49 }
 0x3d6   :  { %5108 = vmatpush3.msra.mxu1 %v3416_v5  ;;  %5081 = vmatpush3.msra.mxu0 %v7524_v34 }
 0x3d7   :  { %5109 = vmatprep.subr.mxu1 %v5390_v49  ;;  %5120 = vmatprep.subr.mxu0 %v5390_v49 }
 0x3d8   :  { %5110 = vmatpush3.msra.mxu1 %v3423_v36 }
 0x3d9   :  { %5111 = vmatprep.subr.mxu1 %v5390_v49 }
 0x3da   :  { %5112 = vmatpush3.msra.mxu1 %v3430_v18 }
 0x3db   :  { %v5273_v45 = vpop.eup %5272  ;;  %5113 = vmatprep.subr.mxu1 %v5390_v49 }
 0x3dc   :  { %3219 = vrot.lane.b32.xlu0 %v5273_v45, %s5394_s4  ;;  %3216 = vrot.lane.b32.xlu1 %v5273_v45, %s5393_s19 }
 0x3dd   :  { %5114 = vmatpush3.msra.mxu1 %v3437_v35 }
 0x3de   :  { %5115 = vmatprep.subr.mxu1 %v5390_v49 }
 0x3df   :  { %5116 = vmatpush3.msra.mxu1 %v3444_v27 }
 0x3e0   :  { %3222 = vrot.lane.b32.xlu1 %v5273_v45, %s5392_s18  ;;  %5155 = vmatprep.subr.mxu1 %v5390_v49 }
 0x44e   :  { %v3217_v60 = vpop.permute.xlu1 %3216  ;;  %v3220_v11 = vpop.permute.xlu0 %3219 }
 0x44f   :  { %v3218_v48 = vadd.f32 %v5273_v45, %v3217_v60 }
 0x451   :  { %v3221_v47 = vadd.f32 %v3220_v11, %v3218_v48 }
 0x452   :  { %v3223_v50 = vpop.permute.xlu1 %3222 }
 0x453   :  { %v3224_v5 = vadd.f32 %v3223_v50, %v3221_v47 }
 0x455   :  { %5274 = vrcp.f32 %v3224_v5 }
 0x462   :  { %v5275_v22 = vpop.eup %5274 }
 0x463   :  { %v3226_v62 = vmul.f32 %v5275_v22, %v5273_v45 }
 0x465   :  { %v7581_v36 = vand.u32 4294901760, %v3226_v62 }
 0x467   :  { %v7584_v51 = vsub.f32 %v3226_v62, %v7581_v36  ;;  %5118 = vmatmul.mubr.f32.vlgmr.msra.gmra.mxu1 %v7581_v36 }
 0x468   :  { %5156 = vmatpush3.msra.mxu1 %v7384_v44  ;;  %5187 = vmatprep.mubr.msk.f32.mxu1 %vm5391_vm0, %v5390_v49 }
 0x469   :  { %5157 = vmatprep.subr.mxu1 %v5390_v49  ;;  %v3326_v18 = vand.u32 4294901760, %v7584_v51 }
 0x46a   :  { %5158 = vmatpush3.msra.mxu1 %v7386_v56 }
 0x46b   :  { %5159 = vmatprep.subr.mxu1 %v5390_v49  ;;  %v3327_v45 = vsub.f32 %v7584_v51, %v3326_v18 }
 0x46c   :  { %5160 = vmatpush3.msra.mxu1 %v7388_v57 }
 0x46d   :  { %5161 = vmatprep.subr.mxu1 %v5390_v49  ;;  %v3328_v20 = vand.u32 4294901760, %v3327_v45 }
 0x46e   :  { %5162 = vmatpush3.msra.mxu1 %v7390_v52 }
 0x46f   :  { %5163 = vmatprep.subr.mxu1 %v5390_v49  ;;  %5083 = vmatmul.mubr.f32.vlgmr.msra.gmra.mxu0 %v3328_v20 }
 0x470   :  { %5121 = vmatpush3.msra.mxu0 %v7393_v61  ;;  %5164 = vmatpush3.msra.mxu1 %v7433_v12 }
 0x471   :  { %5122 = vmatprep.subr.mxu0 %v5390_v49  ;;  %5165 = vmatprep.subr.mxu1 %v5390_v49 }
 0x472   :  { %5123 = vmatpush3.msra.mxu0 %v7396_v19  ;;  %5166 = vmatpush3.msra.mxu1 %v7438_v9 }
 0x473   :  { %5124 = vmatprep.subr.mxu0 %v5390_v49  ;;  %5167 = vmatprep.subr.mxu1 %v5390_v49 }
 0x474   :  { %5125 = vmatpush3.msra.mxu0 %v7399_v46  ;;  %5168 = vmatpush3.msra.mxu1 %v7446_v33 }
 0x475   :  { %5126 = vmatprep.subr.mxu0 %v5390_v49  ;;  %5169 = vmatprep.subr.mxu1 %v5390_v49 }
 0x476   :  { %5127 = vmatpush3.msra.mxu0 %v7403_v37  ;;  %5170 = vmatpush3.msra.mxu1 %v7458_v63 }
 0x477   :  { %5128 = vmatprep.subr.mxu0 %v5390_v49  ;;  %5171 = vmatprep.subr.mxu1 %v5390_v49 }
 0x478   :  { %5129 = vmatpush3.msra.mxu0 %v7436_v58  ;;  %5172 = vmatpush3.msra.mxu1 %v7470_v55 }
 0x479   :  { %5130 = vmatprep.subr.mxu0 %v5390_v49  ;;  %5173 = vmatprep.subr.mxu1 %v5390_v49 }
 0x47a   :  { %5131 = vmatpush3.msra.mxu0 %v7444_v41  ;;  %5174 = vmatpush3.msra.mxu1 %v7477_v24 }
 0x47b   :  { %5132 = vmatprep.subr.mxu0 %v5390_v49  ;;  %5175 = vmatprep.subr.mxu1 %v5390_v49 }
 0x47c   :  { %5133 = vmatpush3.msra.mxu0 %v7456_v54  ;;  %5176 = vmatpush3.msra.mxu1 %v7490_v21 }
 0x47d   :  { %5134 = vmatprep.subr.mxu0 %v5390_v49  ;;  %5177 = vmatprep.subr.mxu1 %v5390_v49 }
 0x47e   :  { %5135 = vmatpush3.msra.mxu0 %v7467_v13  ;;  %5178 = vmatpush3.msra.mxu1 %v7500_v29 }
 0x47f   :  { %5136 = vmatprep.subr.mxu0 %v5390_v49  ;;  %5179 = vmatprep.subr.mxu1 %v5390_v49 }
 0x480   :  { %5137 = vmatpush3.msra.mxu0 %v7481_v0  ;;  %5180 = vmatpush3.msra.mxu1 %v7515_v2 }
 0x481   :  { %5138 = vmatprep.subr.mxu0 %v5390_v49  ;;  %5181 = vmatprep.subr.mxu1 %v5390_v49 }
 0x482   :  { %5139 = vmatpush3.msra.mxu0 %v7488_v4  ;;  %5182 = vmatpush3.msra.mxu1 %v7519_v25 }
 0x483   :  { %5140 = vmatprep.subr.mxu0 %v5390_v49  ;;  %5183 = vmatprep.subr.mxu1 %v5390_v49 }
 0x484   :  { %5141 = vmatpush3.msra.mxu0 %v7498_v26  ;;  %5184 = vmatpush3.msra.mxu1 %v7521_v59 }
 0x485   :  { %5142 = vmatprep.subr.mxu0 %v5390_v49  ;;  %5185 = vmatprep.subr.mxu1 %v5390_v49 }
 0x486   :  { %5143 = vmatpush3.msra.mxu0 %v7513_v30  ;;  %5186 = vmatpush3.msra.mxu1 %v7524_v34 }
 0x487   :  { %5144 = vmatprep.subr.mxu0 %v5390_v49  ;;  %5188 = vmatmul.mubr.f32.vlgmr.msra.gmra.mxu1 %v3326_v18 }
 0x488   :  { %5225 = vmatprep.subr.mxu1 %v5390_v49  ;;  %5145 = vmatpush3.msra.mxu0 %v7531_v7 }
 0x489   :  { %5226 = vmatpush3.msra.mxu1 %v7384_v44  ;;  %5146 = vmatprep.subr.mxu0 %v5390_v49 }
 0x48a   :  { %5227 = vmatprep.subr.mxu1 %v5390_v49  ;;  %5147 = vmatpush3.msra.mxu0 %v7535_v17 }
 0x48b   :  { %5228 = vmatpush3.msra.mxu1 %v7386_v56  ;;  %5148 = vmatprep.subr.mxu0 %v5390_v49 }
 0x48c   :  { %5229 = vmatprep.subr.mxu1 %v5390_v49  ;;  %5149 = vmatpush3.msra.mxu0 %v7538_v32 }
 0x48d   :  { %5230 = vmatpush3.msra.mxu1 %v7388_v57  ;;  %5150 = vmatprep.subr.mxu0 %v5390_v49 }
 0x48e   :  { %5231 = vmatprep.subr.mxu1 %v5390_v49  ;;  %5151 = vmatpush3.msra.mxu0 %v7541_v40 }
 0x48f   :  { %5152 = vmatprep.mubr.msk.f32.mxu0 %vm5391_vm0, %v5390_v49  ;;  %5232 = vmatpush3.msra.mxu1 %v7390_v52 }
 0x490   :  { %5153 = vmatmul.mubr.f32.vlgmr.msra.gmra.mxu0 %v7584_v51  ;;  %5190 = vmatprep.subr.mxu0 %v5390_v49 }
 0x491   :  { %5233 = vmatprep.subr.mxu1 %v5390_v49  ;;  %5191 = vmatpush3.msra.mxu0 %v3337_v31 }
 0x492   :  { %5234 = vmatpush3.msra.mxu1 %v7433_v12  ;;  %5192 = vmatprep.subr.mxu0 %v5390_v49 }
 0x493   :  { %5235 = vmatprep.subr.mxu1 %v5390_v49  ;;  %5193 = vmatpush3.msra.mxu0 %v3344_v23 }
 0x494   :  { %5236 = vmatpush3.msra.mxu1 %v7438_v9  ;;  %5194 = vmatprep.subr.mxu0 %v5390_v49 }
 0x495   :  { %5237 = vmatprep.subr.mxu1 %v5390_v49  ;;  %5195 = vmatpush3.msra.mxu0 %v3351_v6 }
 0x496   :  { %5238 = vmatpush3.msra.mxu1 %v7446_v33  ;;  %5196 = vmatprep.subr.mxu0 %v5390_v49 }
 0x497   :  { %5239 = vmatprep.subr.mxu1 %v5390_v49  ;;  %5197 = vmatpush3.msra.mxu0 %v3358_v10 }
 0x498   :  { %5240 = vmatpush3.msra.mxu1 %v7458_v63  ;;  %5198 = vmatprep.subr.mxu0 %v5390_v49 }
 0x499   :  { %5241 = vmatprep.subr.mxu1 %v5390_v49  ;;  %5199 = vmatpush3.msra.mxu0 %v3365_v42 }
 0x49a   :  { %5242 = vmatpush3.msra.mxu1 %v7470_v55  ;;  %5200 = vmatprep.subr.mxu0 %v5390_v49 }
 0x49b   :  { %5243 = vmatprep.subr.mxu1 %v5390_v49  ;;  %5201 = vmatpush3.msra.mxu0 %v3372_v43 }
 0x49c   :  { %5244 = vmatpush3.msra.mxu1 %v7477_v24  ;;  %5202 = vmatprep.subr.mxu0 %v5390_v49 }
 0x49d   :  { %5245 = vmatprep.subr.mxu1 %v5390_v49  ;;  %5203 = vmatpush3.msra.mxu0 %v3379_v14 }
 0x49e   :  { %5246 = vmatpush3.msra.mxu1 %v7490_v21  ;;  %5204 = vmatprep.subr.mxu0 %v5390_v49 }
 0x49f   :  { %5247 = vmatprep.subr.mxu1 %v5390_v49  ;;  %5205 = vmatpush3.msra.mxu0 %v3386_v38 }
 0x4a0   :  { %5248 = vmatpush3.msra.mxu1 %v7500_v29  ;;  %5206 = vmatprep.subr.mxu0 %v5390_v49 }
 0x4a1   :  { %5249 = vmatprep.subr.mxu1 %v5390_v49  ;;  %5207 = vmatpush3.msra.mxu0 %v3393_v28 }
 0x4a2   :  { %5250 = vmatpush3.msra.mxu1 %v7515_v2  ;;  %5208 = vmatprep.subr.mxu0 %v5390_v49 }
 0x4a3   :  { %5251 = vmatprep.subr.mxu1 %v5390_v49  ;;  %5209 = vmatpush3.msra.mxu0 %v3400_v1 }
 0x4a4   :  { %5252 = vmatpush3.msra.mxu1 %v7519_v25  ;;  %5210 = vmatprep.subr.mxu0 %v5390_v49 }
 0x4a5   :  { %5253 = vmatprep.subr.mxu1 %v5390_v49  ;;  %5211 = vmatpush3.msra.mxu0 %v3407_v15 }
 0x4a6   :  { %5254 = vmatpush3.msra.mxu1 %v7521_v59  ;;  %5212 = vmatprep.subr.mxu0 %v5390_v49 }
 0x4a7   :  { %5255 = vmatprep.subr.mxu1 %v5390_v49  ;;  %5213 = vmatpush3.msra.mxu0 %v3414_v16 }
 0x4a8   :  { %5256 = vmatpush3.msra.mxu1 %v7524_v34  ;;  %5257 = vmatprep.mubr.msk.f32.mxu1 %vm5391_vm0, %v5390_v49 }
 0x4a9   :  { %5214 = vmatprep.subr.mxu0 %v5390_v49  ;;  %5258 = vmatmul.mubr.f32.vlgmr.msra.gmra.mxu1 %v7581_v36 }
 0x4aa   :  { %5215 = vmatpush3.msra.mxu0 %v3421_v3  ;;  %5222 = vmatprep.mubr.msk.f32.mxu0 %vm5391_vm0, %v5390_v49 }
 0x4ab   :  { %5216 = vmatprep.subr.mxu0 %v5390_v49 }
 0x4ac   :  { %5217 = vmatpush3.msra.mxu0 %v3428_v53 }
 0x4ad   :  { %5218 = vmatprep.subr.mxu0 %v5390_v49 }
 0x4ae   :  { %5219 = vmatpush3.msra.mxu0 %v3435_v39 }
 0x4af   :  { %5220 = vmatprep.subr.mxu0 %v5390_v49 }
 0x4b0   :  { %5221 = vmatpush3.msra.mxu0 %v3442_v8 }
 0x4b1   :  { %5223 = vmatmul.mubr.f32.vlgmr.msra.gmra.mxu0 %v7581_v36 }
 0x527   :  { %v3481_v44 = vpop.f32.mrf.mxu1 }
 0x529   :  { %v5119_v56 = vpop.f32.mrf.mxu1 }
 0x52f   :  { %v3330_v57 = vpop.f32.mrf.mxu0 }
 0x530   :  { %v3482_v23 = vadd.f32 %v3481_v44, %v3330_v57 }
 0x531   :  { %v5084_v52 = vpop.f32.mrf.mxu0 }
 0x547   :  { %v3674_v61 = vpop.f32.mrf.mxu1 }
 0x549   :  { %v5189_v19 = vpop.f32.mrf.mxu1 }
 0x550   :  { %v3585_v46 = vpop.f32.mrf.mxu0 }
 0x551   :  { %v3586_v10 = vadd.f32 %v3585_v46, %v3482_v23 }
 0x552   :  { %v5154_v37 = vpop.f32.mrf.mxu0 }
 0x553   :  { %v3675_v12 = vadd.f32 %v3674_v61, %v3586_v10 }
 0x569   :  { %v3880_v31 = vpop.f32.mrf.mxu1 }
 0x56b   :  { %v5259_v6 = vpop.f32.mrf.mxu1 }
 0x571   :  { %v3793_v58 = vpop.f32.mrf.mxu0 }
 0x572   :  { %v3794_v49 = vadd.f32 %v3793_v58, %v3675_v12 }
 0x573   :  { %v5224_v9 = vpop.f32.mrf.mxu0 }
 0x574   :  { %v3881_v42 = vadd.f32 %v3880_v31, %v3794_v49 }
 0x576   :  { %3884 = vst [vmem:[#allocation10] sm:$0xff] %v3881_v42 }
 0x577   :  { %5367 = shalt.err (!%p5364_p10)
}
 0x578   :  { %3894 = dma.vmem_to_hbm [thread:$0]  %s3892_s21, 128, %s7751_s6, [#allocation4]  }
 0x579   :  { %5382 = dma.done.wait [#allocation4], 128  }
 0x57a   :  { %5383 = vsyncadd [#allocation4], 4294967168 }
 0x57b   :  { %3898 = vsyncpa [#allocation3], 1 }
 0x57c   :  { %3899 = vsyncpa [#allocation6], 1 }
 0x57d   :  { %3900 = vsyncpa [#allocation9], 1 }
 0x57e   :  { %3901 = vsyncpa [#allocation4], 1 }

</bundles_post_ra>
